<compile_context>
chip_gen: v6e
topology: v6e:2x2x1
jax: 0.10.0
libtpu: 0.0.40
codegen_flags: <defaults>
</compile_context>

<pallas_src>
import math
from functools import partial

import jax
import jax.numpy as jnp
from jax import lax
from jax.experimental import pallas as pl
from jax.experimental.pallas import tpu as pltpu

# ---------------- model hyper-parameters (small, synthetic) -----------------
D_MODEL = 32
N_HEADS = 4
D_HEAD = D_MODEL // N_HEADS
D_FF = 64
N_LAYERS = 2
SRC_VOCAB = 50
TGT_VOCAB = 50
V_PAD = 128          # lane-dense padded width for the final projection
MAX_LEN = 64
LN_EPS = 1e-6
NEG_INF = -1e9


# ------------------------- in-kernel building blocks -------------------------
def _add_ln(x, y, g, b):
    # LayerNorm(x + y) over the last axis, in f32
    z = x + y
    mu = jnp.mean(z, axis=-1, keepdims=True)
    var = jnp.mean((z - mu) ** 2, axis=-1, keepdims=True)
    return (z - mu) * lax.rsqrt(var + LN_EPS) * g + b


def _mha(q, k, v, mask_add, wo_bf16, bo):
    """Multi-head attention with fused single output projection.

    q already carries 1/sqrt(D_HEAD) (folded into the Q weights/bias).
    q:(Rq,D) k,v:(Rk,D) f32, mask_add:(Rq,Rk) f32, wo:(D,D) bf16, bo:(1,D) f32.
    Scores use dot_general contracting the last dim of both operands (no .T).
    """
    qb = q.astype(jnp.bfloat16)
    kb = k.astype(jnp.bfloat16)
    vb = v.astype(jnp.bfloat16)
    heads = []
    for h in range(N_HEADS):
        sl = slice(h * D_HEAD, (h + 1) * D_HEAD)
        s = lax.dot_general(qb[:, sl], kb[:, sl],
                            dimension_numbers=(((1,), (1,)), ((), ())),
                            preferred_element_type=jnp.float32)
        s = s + mask_add
        s = s - jnp.max(s, axis=-1, keepdims=True)     # keep stabilization (safe)
        p = jnp.exp(s)
        p = p * pl.reciprocal(jnp.sum(p, axis=-1, keepdims=True), approx=True)
        heads.append(jnp.dot(p.astype(jnp.bfloat16), vb[:, sl],
                             preferred_element_type=jnp.float32))
    o = jnp.concatenate(heads, axis=-1)                # lane concat -> (Rq, D)
    return jnp.dot(o.astype(jnp.bfloat16), wo_bf16,
                   preferred_element_type=jnp.float32) + bo


def _ffn(x, w1, b1, w2, b2):
    h = jnp.dot(x.astype(jnp.bfloat16), w1, preferred_element_type=jnp.float32) + b1
    h = jnp.maximum(h, 0.0)
    return jnp.dot(h.astype(jnp.bfloat16), w2, preferred_element_type=jnp.float32) + b2


def _block_diag(rq, rk, sq, sk, nb):
    """Row/col iotas plus the block-diagonal 'same batch' boolean mask."""
    ri = lax.broadcasted_iota(jnp.int32, (rq, rk), 0)
    ci = lax.broadcasted_iota(jnp.int32, (rq, rk), 1)
    conds = [((ri >= b * sq) & (ri < (b + 1) * sq)
              & (ci >= b * sk) & (ci < (b + 1) * sk)) for b in range(nb)]
    allowed = conds[0]
    for c in conds[1:]:
        allowed = allowed | c
    return ri, ci, allowed


# ------------------------- weight-slab packing -------------------------------
def _pack_slab(entries, dtype, row_align=8):
    """Pack named 2-D arrays row-wise into one lane-128 slab; return (slab, offsets)."""
    offs = {}
    blocks = []
    row = 0
    for name, arr in entries:
        nr, nc = arr.shape
        nr_pad = -(-nr // row_align) * row_align
        blk = jnp.zeros((nr_pad, 128), jnp.float32).at[:nr, :nc].set(arr)
        blocks.append(blk)
        offs[name] = (row, nr, nc)
        row += nr_pad
    return jnp.concatenate(blocks, axis=0).astype(dtype), offs


def _full_spec(arr):
    nd = arr.ndim
    return pl.BlockSpec(tuple(arr.shape), lambda i, _nd=nd: (0,) * _nd)


# ------------------------------ fused kernels --------------------------------
def encoder_stack(x, src_add, mats, moffs, vecs, voffs, B, Ss):
    R = B * Ss

    def kernel(x_ref, sk_ref, wm_ref, wv_ref, o_ref):
        def mread(name):
            r0, nr, nc = moffs[name]
            return wm_ref[r0:r0 + nr, 0:nc]          # bf16, static slice (view)

        def vread(name):
            r0, nr, nc = voffs[name]
            return wv_ref[r0:r0 + 1, 0:nc]           # f32 (1, nc)

        xv = x_ref[...]                               # (R, D) f32
        # block-diagonal (same-batch) mask + source key-padding row, built in-kernel
        _, _, allowed = _block_diag(R, R, Ss, Ss, B)
        mask = jnp.where(allowed, 0.0, NEG_INF) + sk_ref[...]
        for l in range(N_LAYERS):
            qkv = jnp.dot(xv.astype(jnp.bfloat16), mread(f"wqkv{l}"),
                          preferred_element_type=jnp.float32) + vread(f"bqkv{l}")
            attn = _mha(qkv[:, :D_MODEL], qkv[:, D_MODEL:2 * D_MODEL],
                        qkv[:, 2 * D_MODEL:], mask,
                        mread(f"wo{l}"), vread(f"bo{l}"))
            xv = _add_ln(xv, attn, vread(f"ln1g{l}"), vread(f"ln1b{l}"))
            ff = _ffn(xv, mread(f"w1{l}"), vread(f"b1{l}"),
                      mread(f"w2{l}"), vread(f"b2{l}"))
            xv = _add_ln(xv, ff, vread(f"ln2g{l}"), vread(f"ln2b{l}"))
        # lane-pad to 128 so the store (and the decoder's load) is lane-dense
        o_ref[...] = jnp.concatenate(
            [xv, jnp.zeros((R, 128 - D_MODEL), jnp.float32)], axis=-1)

    return pl.pallas_call(
        kernel,
        out_shape=jax.ShapeDtypeStruct((R, 128), jnp.float32),
        grid=(1,),
        in_specs=[_full_spec(x), _full_spec(src_add),
                  _full_spec(mats), _full_spec(vecs)],
        out_specs=pl.BlockSpec((R, 128), lambda i: (0, 0)),
        compiler_params=pltpu.CompilerParams(dimension_semantics=("arbitrary",)),
    )(x, src_add, mats, vecs)


def decoder_stack(y, enc_pad, src_add, tgt_add, mats, moffs, vecs, voffs, B, St, Ss):
    Rt = B * St
    Rs = B * Ss

    def kernel(y_ref, enc_ref, sk_ref, tk_ref, wm_ref, wv_ref, o_ref):
        def mread(name):
            r0, nr, nc = moffs[name]
            return wm_ref[r0:r0 + nr, 0:nc]

        def vread(name):
            r0, nr, nc = voffs[name]
            return wv_ref[r0:r0 + 1, 0:nc]

        yv = y_ref[...]                               # (Rt, D) f32
        enc = enc_ref[:, 0:D_MODEL]                   # (Rs, D) from lane-padded slab
        # masks (loop-invariant), built in-kernel:
        ri, ci, sallow = _block_diag(Rt, Rt, St, St, B)
        smask = jnp.where(sallow & (ri >= ci), 0.0, NEG_INF) + tk_ref[...]
        _, _, callow = _block_diag(Rt, Rs, St, Ss, B)
        cmask = jnp.where(callow, 0.0, NEG_INF) + sk_ref[...]
        for l in range(N_LAYERS):
            # masked self-attention + add&LN
            qkv = jnp.dot(yv.astype(jnp.bfloat16), mread(f"wqkv{l}"),
                          preferred_element_type=jnp.float32) + vread(f"bqkv{l}")
            sa = _mha(qkv[:, :D_MODEL], qkv[:, D_MODEL:2 * D_MODEL],
                      qkv[:, 2 * D_MODEL:], smask,
                      mread(f"wos{l}"), vread(f"bos{l}"))
            yv = _add_ln(yv, sa, vread(f"ln1g{l}"), vread(f"ln1b{l}"))
            # cross-attention over encoder output + add&LN
            qc = jnp.dot(yv.astype(jnp.bfloat16), mread(f"wqc{l}"),
                         preferred_element_type=jnp.float32) + vread(f"bqc{l}")
            kvc = jnp.dot(enc.astype(jnp.bfloat16), mread(f"wkvc{l}"),
                          preferred_element_type=jnp.float32) + vread(f"bkvc{l}")
            ca = _mha(qc, kvc[:, :D_MODEL], kvc[:, D_MODEL:], cmask,
                      mread(f"woc{l}"), vread(f"boc{l}"))
            yv = _add_ln(yv, ca, vread(f"ln2g{l}"), vread(f"ln2b{l}"))
            # position-wise FFN + add&LN
            ff = _ffn(yv, mread(f"w1{l}"), vread(f"b1{l}"),
                      mread(f"w2{l}"), vread(f"b2{l}"))
            yv = _add_ln(yv, ff, vread(f"ln3g{l}"), vread(f"ln3b{l}"))
        # final bias-free vocab projection, lane-dense (V_PAD = 128) store
        o_ref[...] = jnp.dot(yv.astype(jnp.bfloat16), mread("wproj"),
                             preferred_element_type=jnp.float32)

    return pl.pallas_call(
        kernel,
        out_shape=jax.ShapeDtypeStruct((Rt, V_PAD), jnp.float32),
        grid=(1,),
        in_specs=[_full_spec(y), _full_spec(enc_pad),
                  _full_spec(src_add), _full_spec(tgt_add),
                  _full_spec(mats), _full_spec(vecs)],
        out_specs=pl.BlockSpec((Rt, V_PAD), lambda i: (0, 0)),
        compiler_params=pltpu.CompilerParams(dimension_semantics=("arbitrary",)),
    )(y, enc_pad, src_add, tgt_add, mats, vecs)


# ------------------------------ model glue -----------------------------------
def embed(tokens, table, pe):
    # token embedding * sqrt(d_model) + sinusoidal PE   (XLA gather: tiny table)
    B, S = tokens.shape
    return (table[tokens] * math.sqrt(D_MODEL) + pe[:S][None, :, :]).astype(jnp.float32)


def encoder_decoder_forward(fp, src, src_mask, tgt, tgt_mask):
    B, Ss = src.shape
    _, St = tgt.shape
    x = embed(src, fp["src_emb"], fp["pe"]).reshape(B * Ss, D_MODEL)
    y = embed(tgt, fp["tgt_emb"], fp["pe"]).reshape(B * St, D_MODEL)
    # tiny per-key additive rows; the (causal, block-diagonal) structure is
    # built in-kernel from iota compares.
    src_add = jnp.where(src_mask[:, 0, :], 0.0, NEG_INF).astype(jnp.float32).reshape(1, B * Ss)
    # TODO(synk): arbitrary (non causal-and-padding) tgt_mask patterns are not
    # representable in-kernel; the standard causal&pad mask is recovered from its last row.
    tgt_add = jnp.where(tgt_mask[:, -1, :], 0.0, NEG_INF).astype(jnp.float32).reshape(1, B * St)

    enc_out = encoder_stack(x, src_add, fp["enc_mats"], fp["enc_moffs"],
                            fp["enc_vecs"], fp["enc_voffs"], B, Ss)       # 1 pallas_call
    scores_pad = decoder_stack(y, enc_out, src_add, tgt_add,
                               fp["dec_mats"], fp["dec_moffs"],
                               fp["dec_vecs"], fp["dec_voffs"], B, St, Ss)  # 1 pallas_call
    return scores_pad.reshape(B, St, V_PAD)[:, :, :TGT_VOCAB]


# --------------------------- deterministic init -------------------------------
def make_pe(max_len, d_model):
    pos = jnp.arange(max_len, dtype=jnp.float32)[:, None]
    div = jnp.exp(
        jnp.arange(0, d_model, 2, dtype=jnp.float32) * (-math.log(10000.0) / d_model)
    )
    pe = jnp.zeros((max_len, d_model), jnp.float32)
    pe = pe.at[:, 0::2].set(jnp.sin(pos * div))
    pe = pe.at[:, 1::2].set(jnp.cos(pos * div))
    return pe


def init_params(key):
    keys = iter(jax.random.split(key, 512))

    def dense(shape, scale=0.02):
        return jax.random.normal(next(keys), shape, jnp.float32) * scale

    def mha_params():
        return dict(
            wq=dense((D_MODEL, D_MODEL)), bq=jnp.zeros((1, D_MODEL), jnp.float32),
            wk=dense((D_MODEL, D_MODEL)), bk=jnp.zeros((1, D_MODEL), jnp.float32),
            wv=dense((D_MODEL, D_MODEL)), bv=jnp.zeros((1, D_MODEL), jnp.float32),
            wo=dense((D_MODEL, D_MODEL)), bo=jnp.zeros((1, D_MODEL), jnp.float32),
        )

    def ffn_params():
        return dict(
            w1=dense((D_MODEL, D_FF)), b1=jnp.zeros((1, D_FF), jnp.float32),
            w2=dense((D_FF, D_MODEL)), b2=jnp.zeros((1, D_MODEL), jnp.float32),
        )

    def enc_layer_params():
        return dict(
            self_attn=mha_params(), ffn=ffn_params(),
            ln1_g=jnp.ones((1, D_MODEL), jnp.float32), ln1_b=jnp.zeros((1, D_MODEL), jnp.float32),
            ln2_g=jnp.ones((1, D_MODEL), jnp.float32), ln2_b=jnp.zeros((1, D_MODEL), jnp.float32),
        )

    def dec_layer_params():
        return dict(
            self_attn=mha_params(), cross_attn=mha_params(), ffn=ffn_params(),
            ln1_g=jnp.ones((1, D_MODEL), jnp.float32), ln1_b=jnp.zeros((1, D_MODEL), jnp.float32),
            ln2_g=jnp.ones((1, D_MODEL), jnp.float32), ln2_b=jnp.zeros((1, D_MODEL), jnp.float32),
            ln3_g=jnp.ones((1, D_MODEL), jnp.float32), ln3_b=jnp.zeros((1, D_MODEL), jnp.float32),
        )

    return dict(
        src_emb=dense((SRC_VOCAB, D_MODEL), scale=1.0),
        tgt_emb=dense((TGT_VOCAB, D_MODEL), scale=1.0),
        pe=make_pe(MAX_LEN, D_MODEL),
        enc_layers=[enc_layer_params() for _ in range(N_LAYERS)],
        dec_layers=[dec_layer_params() for _ in range(N_LAYERS)],
        proj_w=dense((D_MODEL, TGT_VOCAB)),
    )


def prepare_fused(params):
    """Fuse Q/K/V (1/sqrt(Dh) folded into Q), pack matrices into ONE bf16 slab
    and biases/LN params into ONE f32 slab per kernel, lane-pad the projection."""
    scale = 1.0 / math.sqrt(D_HEAD)

    def fuse_qkv_w(a):
        return jnp.concatenate([a["wq"] * scale, a["wk"], a["wv"]], axis=1)

    def fuse_qkv_b(a):
        return jnp.concatenate([a["bq"] * scale, a["bk"], a["bv"]], axis=1)

    enc_m, enc_v = [], []
    for l, p in enumerate(params["enc_layers"]):
        a, f = p["self_attn"], p["ffn"]
        enc_m += [(f"wqkv{l}", fuse_qkv_w(a)), (f"wo{l}", a["wo"]),
                  (f"w1{l}", f["w1"]), (f"w2{l}", f["w2"])]
        enc_v += [(f"bqkv{l}", fuse_qkv_b(a)), (f"bo{l}", a["bo"]),
                  (f"ln1g{l}", p["ln1_g"]), (f"ln1b{l}", p["ln1_b"]),
                  (f"b1{l}", f["b1"]), (f"b2{l}", f["b2"]),
                  (f"ln2g{l}", p["ln2_g"]), (f"ln2b{l}", p["ln2_b"])]

    dec_m, dec_v = [], []
    for l, p in enumerate(params["dec_layers"]):
        a, c, f = p["self_attn"], p["cross_attn"], p["ffn"]
        dec_m += [(f"wqkv{l}", fuse_qkv_w(a)), (f"wos{l}", a["wo"]),
                  (f"wqc{l}", c["wq"] * scale),
                  (f"wkvc{l}", jnp.concatenate([c["wk"], c["wv"]], axis=1)),
                  (f"woc{l}", c["wo"]),
                  (f"w1{l}", f["w1"]), (f"w2{l}", f["w2"])]
        dec_v += [(f"bqkv{l}", fuse_qkv_b(a)), (f"bos{l}", a["bo"]),
                  (f"ln1g{l}", p["ln1_g"]), (f"ln1b{l}", p["ln1_b"]),
                  (f"bqc{l}", c["bq"] * scale),
                  (f"bkvc{l}", jnp.concatenate([c["bk"], c["bv"]], axis=1)),
                  (f"boc{l}", c["bo"]),
                  (f"ln2g{l}", p["ln2_g"]), (f"ln2b{l}", p["ln2_b"]),
                  (f"b1{l}", f["b1"]), (f"b2{l}", f["b2"]),
                  (f"ln3g{l}", p["ln3_g"]), (f"ln3b{l}", p["ln3_b"])]
    wproj_pad = jnp.zeros((D_MODEL, V_PAD), jnp.float32).at[:, :TGT_VOCAB].set(params["proj_w"])
    dec_m.append(("wproj", wproj_pad))

    enc_mats, enc_moffs = _pack_slab(enc_m, jnp.bfloat16, row_align=8)
    enc_vecs, enc_voffs = _pack_slab(enc_v, jnp.float32, row_align=1)
    dec_mats, dec_moffs = _pack_slab(dec_m, jnp.bfloat16, row_align=8)
    dec_vecs, dec_voffs = _pack_slab(dec_v, jnp.float32, row_align=1)

    return dict(src_emb=params["src_emb"], tgt_emb=params["tgt_emb"], pe=params["pe"],
                enc_mats=enc_mats, enc_moffs=enc_moffs,
                enc_vecs=enc_vecs, enc_voffs=enc_voffs,
                dec_mats=dec_mats, dec_moffs=dec_moffs,
                dec_vecs=dec_vecs, dec_voffs=dec_voffs)


# ----------------------------------- main -------------------------------------
if __name__ == "__main__":
    key = jax.random.PRNGKey(0)
    pkey, skey, tkey = jax.random.split(key, 3)
    params = init_params(pkey)
    fparams = prepare_fused(params)

    B, Ss, St = 2, 8, 8
    src = jax.random.randint(skey, (B, Ss), 1, SRC_VOCAB, dtype=jnp.int32)
    tgt = jax.random.randint(tkey, (B, St), 1, TGT_VOCAB, dtype=jnp.int32)
    # src_mask: (B, 1, Ss) padding mask (all valid here); tgt_mask: causal (B, St, St)
    src_mask = jnp.ones((B, 1, Ss), dtype=bool)
    tgt_mask = jnp.broadcast_to(
        jnp.tril(jnp.ones((St, St), dtype=bool))[None], (B, St, St)
    )

    fwd = jax.jit(partial(encoder_decoder_forward, fparams))
    scores = jax.block_until_ready(fwd(src, src_mask, tgt, tgt_mask))

    assert scores.shape == (B, St, TGT_VOCAB)
    assert scores.dtype == jnp.float32
    assert bool(jnp.all(jnp.isfinite(scores)))
    print("KERNEL_OK")
</pallas_src>

<mosaic_0001>
module attributes {stable_mosaic.version = 11 : i64} {
  func.func @kernel(%arg0: i32, %arg1: memref<16x32xf32, #tpu.memory_space<vmem>>, %arg2: memref<1x16xf32, #tpu.memory_space<vmem>>, %arg3: memref<320x128xbf16, #tpu.memory_space<vmem>>, %arg4: memref<16x128xf32, #tpu.memory_space<vmem>>, %arg5: memref<16x128xf32, #tpu.memory_space<vmem>>) attributes {dimension_semantics = [#tpu.dimension_semantics<arbitrary>], iteration_bounds = array<i64: 1>, scalar_prefetch = 0 : i64, scratch_operands = 0 : i64, tpu.core_type = #tpu.core_type<tc>, window_params = [{pipeline_mode = #tpu.pipeline_mode<synchronous>, transform_indices = @transform_0, window_bounds = array<i64: 16, 32>}, {pipeline_mode = #tpu.pipeline_mode<synchronous>, transform_indices = @transform_1, window_bounds = array<i64: 1, 16>}, {pipeline_mode = #tpu.pipeline_mode<synchronous>, transform_indices = @transform_2, window_bounds = array<i64: 320, 128>}, {pipeline_mode = #tpu.pipeline_mode<synchronous>, transform_indices = @transform_3, window_bounds = array<i64: 16, 128>}, {pipeline_mode = #tpu.pipeline_mode<synchronous>, transform_indices = @transform_4, window_bounds = array<i64: 16, 128>}]} {
    %c0 = arith.constant 0 : index
    %c0_0 = arith.constant 0 : index
    %0 = vector.load %arg1[%c0, %c0_0] : memref<16x32xf32, #tpu.memory_space<vmem>>, vector<16x32xf32>
    %1 = tpu.iota {dimensions = array<i32: 0>} : vector<16x16xi32>
    %2 = tpu.iota {dimensions = array<i32: 1>} : vector<16x16xi32>
    %c0_i32 = arith.constant 0 : i32
    %3 = vector.broadcast %c0_i32 : i32 to vector<16x16xi32>
    %4 = arith.cmpi sge, %1, %3 : vector<16x16xi32>
    %c8_i32 = arith.constant 8 : i32
    %5 = vector.broadcast %c8_i32 : i32 to vector<16x16xi32>
    %6 = arith.cmpi slt, %1, %5 : vector<16x16xi32>
    %7 = arith.andi %4, %6 : vector<16x16xi1>
    %c0_i32_1 = arith.constant 0 : i32
    %8 = vector.broadcast %c0_i32_1 : i32 to vector<16x16xi32>
    %9 = arith.cmpi sge, %2, %8 : vector<16x16xi32>
    %10 = arith.andi %7, %9 : vector<16x16xi1>
    %c8_i32_2 = arith.constant 8 : i32
    %11 = vector.broadcast %c8_i32_2 : i32 to vector<16x16xi32>
    %12 = arith.cmpi slt, %2, %11 : vector<16x16xi32>
    %13 = arith.andi %10, %12 : vector<16x16xi1>
    %c8_i32_3 = arith.constant 8 : i32
    %14 = vector.broadcast %c8_i32_3 : i32 to vector<16x16xi32>
    %15 = arith.cmpi sge, %1, %14 : vector<16x16xi32>
    %c16_i32 = arith.constant 16 : i32
    %16 = vector.broadcast %c16_i32 : i32 to vector<16x16xi32>
    %17 = arith.cmpi slt, %1, %16 : vector<16x16xi32>
    %18 = arith.andi %15, %17 : vector<16x16xi1>
    %c8_i32_4 = arith.constant 8 : i32
    %19 = vector.broadcast %c8_i32_4 : i32 to vector<16x16xi32>
    %20 = arith.cmpi sge, %2, %19 : vector<16x16xi32>
    %21 = arith.andi %18, %20 : vector<16x16xi1>
    %c16_i32_5 = arith.constant 16 : i32
    %22 = vector.broadcast %c16_i32_5 : i32 to vector<16x16xi32>
    %23 = arith.cmpi slt, %2, %22 : vector<16x16xi32>
    %24 = arith.andi %21, %23 : vector<16x16xi1>
    %25 = arith.ori %13, %24 : vector<16x16xi1>
    %cst = arith.constant 0.000000e+00 : f32
    %cst_6 = arith.constant -1.000000e+09 : f32
    %26 = vector.broadcast %cst : f32 to vector<16x16xf32>
    %27 = vector.broadcast %cst_6 : f32 to vector<16x16xf32>
    %28 = arith.select %25, %26, %27 : vector<16x16xi1>, vector<16x16xf32>
    %c0_7 = arith.constant 0 : index
    %c0_8 = arith.constant 0 : index
    %29 = vector.load %arg2[%c0_7, %c0_8] : memref<1x16xf32, #tpu.memory_space<vmem>>, vector<1x16xf32>
    %30 = vector.broadcast %29 : vector<1x16xf32> to vector<16x16xf32>
    %31 = arith.addf %28, %30 : vector<16x16xf32>
    %32 = arith.truncf %0 : vector<16x32xf32> to vector<16x32xbf16>
    %c0_9 = arith.constant 0 : index
    %c0_10 = arith.constant 0 : index
    %33 = vector.load %arg3[%c0_9, %c0_10] : memref<320x128xbf16, #tpu.memory_space<vmem>>, vector<32x96xbf16>
    %cst_11 = arith.constant dense<0.000000e+00> : vector<16x96xf32>
    %34 = tpu.matmul %32, %33, %cst_11 {dimension_numbers = #tpu.dot_dimension_numbers<[1], [0], [0], [1], [0, 0, 1, 1], [], []>} : vector<16x32xbf16>, vector<32x96xbf16>, vector<16x96xf32> -> vector<16x96xf32>
    %c0_12 = arith.constant 0 : index
    %c0_13 = arith.constant 0 : index
    %35 = vector.load %arg4[%c0_12, %c0_13] : memref<16x128xf32, #tpu.memory_space<vmem>>, vector<1x96xf32>
    %36 = vector.broadcast %35 : vector<1x96xf32> to vector<16x96xf32>
    %37 = arith.addf %34, %36 : vector<16x96xf32>
    %38 = vector.extract_strided_slice %37 {offsets = [0, 0], sizes = [16, 32], strides = [1, 1]} : vector<16x96xf32> to vector<16x32xf32>
    %39 = vector.extract_strided_slice %37 {offsets = [0, 32], sizes = [16, 32], strides = [1, 1]} : vector<16x96xf32> to vector<16x32xf32>
    %40 = vector.extract_strided_slice %37 {offsets = [0, 64], sizes = [16, 32], strides = [1, 1]} : vector<16x96xf32> to vector<16x32xf32>
    %c32 = arith.constant 32 : index
    %c0_14 = arith.constant 0 : index
    %41 = vector.load %arg3[%c32, %c0_14] : memref<320x128xbf16, #tpu.memory_space<vmem>>, vector<32x32xbf16>
    %c1 = arith.constant 1 : index
    %c0_15 = arith.constant 0 : index
    %42 = vector.load %arg4[%c1, %c0_15] : memref<16x128xf32, #tpu.memory_space<vmem>>, vector<1x32xf32>
    %43 = arith.truncf %38 : vector<16x32xf32> to vector<16x32xbf16>
    %44 = arith.truncf %39 : vector<16x32xf32> to vector<16x32xbf16>
    %45 = arith.truncf %40 : vector<16x32xf32> to vector<16x32xbf16>
    %46 = vector.extract_strided_slice %43 {offsets = [0, 0], sizes = [16, 8], strides = [1, 1]} : vector<16x32xbf16> to vector<16x8xbf16>
    %47 = vector.extract_strided_slice %44 {offsets = [0, 0], sizes = [16, 8], strides = [1, 1]} : vector<16x32xbf16> to vector<16x8xbf16>
    %cst_16 = arith.constant dense<0.000000e+00> : vector<16x16xf32>
    %48 = tpu.matmul %46, %47, %cst_16 {dimension_numbers = #tpu.dot_dimension_numbers<[1], [1], [0], [0], [0, 0, 1, 0], [], []>} : vector<16x8xbf16>, vector<16x8xbf16>, vector<16x16xf32> -> vector<16x16xf32>
    %49 = arith.addf %48, %31 : vector<16x16xf32>
    %cst_17 = arith.constant dense<0xFF800000> : vector<16xf32>
    %50 = vector.multi_reduction <maximumf>, %49, %cst_17 [1] : vector<16x16xf32> to vector<16xf32>
    %51 = vector.shape_cast %50 : vector<16xf32> to vector<16x1xf32>
    %52 = vector.broadcast %51 : vector<16x1xf32> to vector<16x16xf32>
    %53 = arith.subf %49, %52 : vector<16x16xf32>
    %54 = math.exp %53 : vector<16x16xf32>
    %cst_18 = arith.constant dense<0.000000e+00> : vector<16xf32>
    %55 = vector.multi_reduction <add>, %54, %cst_18 [1] : vector<16x16xf32> to vector<16xf32>
    %56 = vector.shape_cast %55 : vector<16xf32> to vector<16x1xf32>
    %57 = tpu.reciprocal %56 {approx = true} : vector<16x1xf32> -> vector<16x1xf32>
    %58 = vector.broadcast %57 : vector<16x1xf32> to vector<16x16xf32>
    %59 = arith.mulf %54, %58 : vector<16x16xf32>
    %60 = arith.truncf %59 : vector<16x16xf32> to vector<16x16xbf16>
    %61 = vector.extract_strided_slice %45 {offsets = [0, 0], sizes = [16, 8], strides = [1, 1]} : vector<16x32xbf16> to vector<16x8xbf16>
    %cst_19 = arith.constant dense<0.000000e+00> : vector<16x8xf32>
    %62 = tpu.matmul %60, %61, %cst_19 {dimension_numbers = #tpu.dot_dimension_numbers<[1], [0], [0], [1], [0, 0, 1, 1], [], []>} : vector<16x16xbf16>, vector<16x8xbf16>, vector<16x8xf32> -> vector<16x8xf32>
    %63 = vector.extract_strided_slice %43 {offsets = [0, 8], sizes = [16, 8], strides = [1, 1]} : vector<16x32xbf16> to vector<16x8xbf16>
    %64 = vector.extract_strided_slice %44 {offsets = [0, 8], sizes = [16, 8], strides = [1, 1]} : vector<16x32xbf16> to vector<16x8xbf16>
    %cst_20 = arith.constant dense<0.000000e+00> : vector<16x16xf32>
    %65 = tpu.matmul %63, %64, %cst_20 {dimension_numbers = #tpu.dot_dimension_numbers<[1], [1], [0], [0], [0, 0, 1, 0], [], []>} : vector<16x8xbf16>, vector<16x8xbf16>, vector<16x16xf32> -> vector<16x16xf32>
    %66 = arith.addf %65, %31 : vector<16x16xf32>
    %cst_21 = arith.constant dense<0xFF800000> : vector<16xf32>
    %67 = vector.multi_reduction <maximumf>, %66, %cst_21 [1] : vector<16x16xf32> to vector<16xf32>
    %68 = vector.shape_cast %67 : vector<16xf32> to vector<16x1xf32>
    %69 = vector.broadcast %68 : vector<16x1xf32> to vector<16x16xf32>
    %70 = arith.subf %66, %69 : vector<16x16xf32>
    %71 = math.exp %70 : vector<16x16xf32>
    %cst_22 = arith.constant dense<0.000000e+00> : vector<16xf32>
    %72 = vector.multi_reduction <add>, %71, %cst_22 [1] : vector<16x16xf32> to vector<16xf32>
    %73 = vector.shape_cast %72 : vector<16xf32> to vector<16x1xf32>
    %74 = tpu.reciprocal %73 {approx = true} : vector<16x1xf32> -> vector<16x1xf32>
    %75 = vector.broadcast %74 : vector<16x1xf32> to vector<16x16xf32>
    %76 = arith.mulf %71, %75 : vector<16x16xf32>
    %77 = arith.truncf %76 : vector<16x16xf32> to vector<16x16xbf16>
    %78 = vector.extract_strided_slice %45 {offsets = [0, 8], sizes = [16, 8], strides = [1, 1]} : vector<16x32xbf16> to vector<16x8xbf16>
    %cst_23 = arith.constant dense<0.000000e+00> : vector<16x8xf32>
    %79 = tpu.matmul %77, %78, %cst_23 {dimension_numbers = #tpu.dot_dimension_numbers<[1], [0], [0], [1], [0, 0, 1, 1], [], []>} : vector<16x16xbf16>, vector<16x8xbf16>, vector<16x8xf32> -> vector<16x8xf32>
    %80 = vector.extract_strided_slice %43 {offsets = [0, 16], sizes = [16, 8], strides = [1, 1]} : vector<16x32xbf16> to vector<16x8xbf16>
    %81 = vector.extract_strided_slice %44 {offsets = [0, 16], sizes = [16, 8], strides = [1, 1]} : vector<16x32xbf16> to vector<16x8xbf16>
    %cst_24 = arith.constant dense<0.000000e+00> : vector<16x16xf32>
    %82 = tpu.matmul %80, %81, %cst_24 {dimension_numbers = #tpu.dot_dimension_numbers<[1], [1], [0], [0], [0, 0, 1, 0], [], []>} : vector<16x8xbf16>, vector<16x8xbf16>, vector<16x16xf32> -> vector<16x16xf32>
    %83 = arith.addf %82, %31 : vector<16x16xf32>
    %cst_25 = arith.constant dense<0xFF800000> : vector<16xf32>
    %84 = vector.multi_reduction <maximumf>, %83, %cst_25 [1] : vector<16x16xf32> to vector<16xf32>
    %85 = vector.shape_cast %84 : vector<16xf32> to vector<16x1xf32>
    %86 = vector.broadcast %85 : vector<16x1xf32> to vector<16x16xf32>
    %87 = arith.subf %83, %86 : vector<16x16xf32>
    %88 = math.exp %87 : vector<16x16xf32>
    %cst_26 = arith.constant dense<0.000000e+00> : vector<16xf32>
    %89 = vector.multi_reduction <add>, %88, %cst_26 [1] : vector<16x16xf32> to vector<16xf32>
    %90 = vector.shape_cast %89 : vector<16xf32> to vector<16x1xf32>
    %91 = tpu.reciprocal %90 {approx = true} : vector<16x1xf32> -> vector<16x1xf32>
    %92 = vector.broadcast %91 : vector<16x1xf32> to vector<16x16xf32>
    %93 = arith.mulf %88, %92 : vector<16x16xf32>
    %94 = arith.truncf %93 : vector<16x16xf32> to vector<16x16xbf16>
    %95 = vector.extract_strided_slice %45 {offsets = [0, 16], sizes = [16, 8], strides = [1, 1]} : vector<16x32xbf16> to vector<16x8xbf16>
    %cst_27 = arith.constant dense<0.000000e+00> : vector<16x8xf32>
    %96 = tpu.matmul %94, %95, %cst_27 {dimension_numbers = #tpu.dot_dimension_numbers<[1], [0], [0], [1], [0, 0, 1, 1], [], []>} : vector<16x16xbf16>, vector<16x8xbf16>, vector<16x8xf32> -> vector<16x8xf32>
    %97 = vector.extract_strided_slice %43 {offsets = [0, 24], sizes = [16, 8], strides = [1, 1]} : vector<16x32xbf16> to vector<16x8xbf16>
    %98 = vector.extract_strided_slice %44 {offsets = [0, 24], sizes = [16, 8], strides = [1, 1]} : vector<16x32xbf16> to vector<16x8xbf16>
    %cst_28 = arith.constant dense<0.000000e+00> : vector<16x16xf32>
    %99 = tpu.matmul %97, %98, %cst_28 {dimension_numbers = #tpu.dot_dimension_numbers<[1], [1], [0], [0], [0, 0, 1, 0], [], []>} : vector<16x8xbf16>, vector<16x8xbf16>, vector<16x16xf32> -> vector<16x16xf32>
    %100 = arith.addf %99, %31 : vector<16x16xf32>
    %cst_29 = arith.constant dense<0xFF800000> : vector<16xf32>
    %101 = vector.multi_reduction <maximumf>, %100, %cst_29 [1] : vector<16x16xf32> to vector<16xf32>
    %102 = vector.shape_cast %101 : vector<16xf32> to vector<16x1xf32>
    %103 = vector.broadcast %102 : vector<16x1xf32> to vector<16x16xf32>
    %104 = arith.subf %100, %103 : vector<16x16xf32>
    %105 = math.exp %104 : vector<16x16xf32>
    %cst_30 = arith.constant dense<0.000000e+00> : vector<16xf32>
    %106 = vector.multi_reduction <add>, %105, %cst_30 [1] : vector<16x16xf32> to vector<16xf32>
    %107 = vector.shape_cast %106 : vector<16xf32> to vector<16x1xf32>
    %108 = tpu.reciprocal %107 {approx = true} : vector<16x1xf32> -> vector<16x1xf32>
    %109 = vector.broadcast %108 : vector<16x1xf32> to vector<16x16xf32>
    %110 = arith.mulf %105, %109 : vector<16x16xf32>
    %111 = arith.truncf %110 : vector<16x16xf32> to vector<16x16xbf16>
    %112 = vector.extract_strided_slice %45 {offsets = [0, 24], sizes = [16, 8], strides = [1, 1]} : vector<16x32xbf16> to vector<16x8xbf16>
    %cst_31 = arith.constant dense<0.000000e+00> : vector<16x8xf32>
    %113 = tpu.matmul %111, %112, %cst_31 {dimension_numbers = #tpu.dot_dimension_numbers<[1], [0], [0], [1], [0, 0, 1, 1], [], []>} : vector<16x16xbf16>, vector<16x8xbf16>, vector<16x8xf32> -> vector<16x8xf32>
    %114 = tpu.concatenate %62, %79, %96, %113 in 1 : vector<16x8xf32>, vector<16x8xf32>, vector<16x8xf32>, vector<16x8xf32> -> vector<16x32xf32>
    %115 = arith.truncf %114 : vector<16x32xf32> to vector<16x32xbf16>
    %cst_32 = arith.constant dense<0.000000e+00> : vector<16x32xf32>
    %116 = tpu.matmul %115, %41, %cst_32 {dimension_numbers = #tpu.dot_dimension_numbers<[1], [0], [0], [1], [0, 0, 1, 1], [], []>} : vector<16x32xbf16>, vector<32x32xbf16>, vector<16x32xf32> -> vector<16x32xf32>
    %117 = vector.broadcast %42 : vector<1x32xf32> to vector<16x32xf32>
    %118 = arith.addf %116, %117 : vector<16x32xf32>
    %c2 = arith.constant 2 : index
    %c0_33 = arith.constant 0 : index
    %119 = vector.load %arg4[%c2, %c0_33] : memref<16x128xf32, #tpu.memory_space<vmem>>, vector<1x32xf32>
    %c3 = arith.constant 3 : index
    %c0_34 = arith.constant 0 : index
    %120 = vector.load %arg4[%c3, %c0_34] : memref<16x128xf32, #tpu.memory_space<vmem>>, vector<1x32xf32>
    %121 = arith.addf %0, %118 : vector<16x32xf32>
    %cst_35 = arith.constant dense<0.000000e+00> : vector<16xf32>
    %122 = vector.multi_reduction <add>, %121, %cst_35 [1] : vector<16x32xf32> to vector<16xf32>
    %123 = vector.shape_cast %122 : vector<16xf32> to vector<16x1xf32>
    %cst_36 = arith.constant 3.200000e+01 : f32
    %124 = vector.broadcast %cst_36 : f32 to vector<16x1xf32>
    %125 = arith.divf %123, %124 : vector<16x1xf32>
    %126 = vector.broadcast %125 : vector<16x1xf32> to vector<16x32xf32>
    %127 = arith.subf %121, %126 : vector<16x32xf32>
    %128 = arith.mulf %127, %127 : vector<16x32xf32>
    %cst_37 = arith.constant dense<0.000000e+00> : vector<16xf32>
    %129 = vector.multi_reduction <add>, %128, %cst_37 [1] : vector<16x32xf32> to vector<16xf32>
    %130 = vector.shape_cast %129 : vector<16xf32> to vector<16x1xf32>
    %cst_38 = arith.constant 3.200000e+01 : f32
    %131 = vector.broadcast %cst_38 : f32 to vector<16x1xf32>
    %132 = arith.divf %130, %131 : vector<16x1xf32>
    %133 = vector.broadcast %125 : vector<16x1xf32> to vector<16x32xf32>
    %134 = arith.subf %121, %133 : vector<16x32xf32>
    %cst_39 = arith.constant 9.99999997E-7 : f32
    %135 = vector.broadcast %cst_39 : f32 to vector<16x1xf32>
    %136 = arith.addf %132, %135 : vector<16x1xf32>
    %137 = math.rsqrt %136 : vector<16x1xf32>
    %138 = vector.broadcast %137 : vector<16x1xf32> to vector<16x32xf32>
    %139 = arith.mulf %134, %138 : vector<16x32xf32>
    %140 = vector.broadcast %119 : vector<1x32xf32> to vector<16x32xf32>
    %141 = arith.mulf %139, %140 : vector<16x32xf32>
    %142 = vector.broadcast %120 : vector<1x32xf32> to vector<16x32xf32>
    %143 = arith.addf %141, %142 : vector<16x32xf32>
    %c64 = arith.constant 64 : index
    %c0_40 = arith.constant 0 : index
    %144 = vector.load %arg3[%c64, %c0_40] : memref<320x128xbf16, #tpu.memory_space<vmem>>, vector<32x64xbf16>
    %c4 = arith.constant 4 : index
    %c0_41 = arith.constant 0 : index
    %145 = vector.load %arg4[%c4, %c0_41] : memref<16x128xf32, #tpu.memory_space<vmem>>, vector<1x64xf32>
    %c96 = arith.constant 96 : index
    %c0_42 = arith.constant 0 : index
    %146 = vector.load %arg3[%c96, %c0_42] : memref<320x128xbf16, #tpu.memory_space<vmem>>, vector<64x32xbf16>
    %c5 = arith.constant 5 : index
    %c0_43 = arith.constant 0 : index
    %147 = vector.load %arg4[%c5, %c0_43] : memref<16x128xf32, #tpu.memory_space<vmem>>, vector<1x32xf32>
    %148 = arith.truncf %143 : vector<16x32xf32> to vector<16x32xbf16>
    %cst_44 = arith.constant dense<0.000000e+00> : vector<16x64xf32>
    %149 = tpu.matmul %148, %144, %cst_44 {dimension_numbers = #tpu.dot_dimension_numbers<[1], [0], [0], [1], [0, 0, 1, 1], [], []>} : vector<16x32xbf16>, vector<32x64xbf16>, vector<16x64xf32> -> vector<16x64xf32>
    %150 = vector.broadcast %145 : vector<1x64xf32> to vector<16x64xf32>
    %151 = arith.addf %149, %150 : vector<16x64xf32>
    %cst_45 = arith.constant 0.000000e+00 : f32
    %152 = vector.broadcast %cst_45 : f32 to vector<16x64xf32>
    %153 = arith.maximumf %151, %152 : vector<16x64xf32>
    %154 = arith.truncf %153 : vector<16x64xf32> to vector<16x64xbf16>
    %cst_46 = arith.constant dense<0.000000e+00> : vector<16x32xf32>
    %155 = tpu.matmul %154, %146, %cst_46 {dimension_numbers = #tpu.dot_dimension_numbers<[1], [0], [0], [1], [0, 0, 1, 1], [], []>} : vector<16x64xbf16>, vector<64x32xbf16>, vector<16x32xf32> -> vector<16x32xf32>
    %156 = vector.broadcast %147 : vector<1x32xf32> to vector<16x32xf32>
    %157 = arith.addf %155, %156 : vector<16x32xf32>
    %c6 = arith.constant 6 : index
    %c0_47 = arith.constant 0 : index
    %158 = vector.load %arg4[%c6, %c0_47] : memref<16x128xf32, #tpu.memory_space<vmem>>, vector<1x32xf32>
    %c7 = arith.constant 7 : index
    %c0_48 = arith.constant 0 : index
    %159 = vector.load %arg4[%c7, %c0_48] : memref<16x128xf32, #tpu.memory_space<vmem>>, vector<1x32xf32>
    %160 = arith.addf %143, %157 : vector<16x32xf32>
    %cst_49 = arith.constant dense<0.000000e+00> : vector<16xf32>
    %161 = vector.multi_reduction <add>, %160, %cst_49 [1] : vector<16x32xf32> to vector<16xf32>
    %162 = vector.shape_cast %161 : vector<16xf32> to vector<16x1xf32>
    %cst_50 = arith.constant 3.200000e+01 : f32
    %163 = vector.broadcast %cst_50 : f32 to vector<16x1xf32>
    %164 = arith.divf %162, %163 : vector<16x1xf32>
    %165 = vector.broadcast %164 : vector<16x1xf32> to vector<16x32xf32>
    %166 = arith.subf %160, %165 : vector<16x32xf32>
    %167 = arith.mulf %166, %166 : vector<16x32xf32>
    %cst_51 = arith.constant dense<0.000000e+00> : vector<16xf32>
    %168 = vector.multi_reduction <add>, %167, %cst_51 [1] : vector<16x32xf32> to vector<16xf32>
    %169 = vector.shape_cast %168 : vector<16xf32> to vector<16x1xf32>
    %cst_52 = arith.constant 3.200000e+01 : f32
    %170 = vector.broadcast %cst_52 : f32 to vector<16x1xf32>
    %171 = arith.divf %169, %170 : vector<16x1xf32>
    %172 = vector.broadcast %164 : vector<16x1xf32> to vector<16x32xf32>
    %173 = arith.subf %160, %172 : vector<16x32xf32>
    %cst_53 = arith.constant 9.99999997E-7 : f32
    %174 = vector.broadcast %cst_53 : f32 to vector<16x1xf32>
    %175 = arith.addf %171, %174 : vector<16x1xf32>
    %176 = math.rsqrt %175 : vector<16x1xf32>
    %177 = vector.broadcast %176 : vector<16x1xf32> to vector<16x32xf32>
    %178 = arith.mulf %173, %177 : vector<16x32xf32>
    %179 = vector.broadcast %158 : vector<1x32xf32> to vector<16x32xf32>
    %180 = arith.mulf %178, %179 : vector<16x32xf32>
    %181 = vector.broadcast %159 : vector<1x32xf32> to vector<16x32xf32>
    %182 = arith.addf %180, %181 : vector<16x32xf32>
    %183 = arith.truncf %182 : vector<16x32xf32> to vector<16x32xbf16>
    %c160 = arith.constant 160 : index
    %c0_54 = arith.constant 0 : index
    %184 = vector.load %arg3[%c160, %c0_54] : memref<320x128xbf16, #tpu.memory_space<vmem>>, vector<32x96xbf16>
    %cst_55 = arith.constant dense<0.000000e+00> : vector<16x96xf32>
    %185 = tpu.matmul %183, %184, %cst_55 {dimension_numbers = #tpu.dot_dimension_numbers<[1], [0], [0], [1], [0, 0, 1, 1], [], []>} : vector<16x32xbf16>, vector<32x96xbf16>, vector<16x96xf32> -> vector<16x96xf32>
    %c8 = arith.constant 8 : index
    %c0_56 = arith.constant 0 : index
    %186 = vector.load %arg4[%c8, %c0_56] : memref<16x128xf32, #tpu.memory_space<vmem>>, vector<1x96xf32>
    %187 = vector.broadcast %186 : vector<1x96xf32> to vector<16x96xf32>
    %188 = arith.addf %185, %187 : vector<16x96xf32>
    %189 = vector.extract_strided_slice %188 {offsets = [0, 0], sizes = [16, 32], strides = [1, 1]} : vector<16x96xf32> to vector<16x32xf32>
    %190 = vector.extract_strided_slice %188 {offsets = [0, 32], sizes = [16, 32], strides = [1, 1]} : vector<16x96xf32> to vector<16x32xf32>
    %191 = vector.extract_strided_slice %188 {offsets = [0, 64], sizes = [16, 32], strides = [1, 1]} : vector<16x96xf32> to vector<16x32xf32>
    %c192 = arith.constant 192 : index
    %c0_57 = arith.constant 0 : index
    %192 = vector.load %arg3[%c192, %c0_57] : memref<320x128xbf16, #tpu.memory_space<vmem>>, vector<32x32xbf16>
    %c9 = arith.constant 9 : index
    %c0_58 = arith.constant 0 : index
    %193 = vector.load %arg4[%c9, %c0_58] : memref<16x128xf32, #tpu.memory_space<vmem>>, vector<1x32xf32>
    %194 = arith.truncf %189 : vector<16x32xf32> to vector<16x32xbf16>
    %195 = arith.truncf %190 : vector<16x32xf32> to vector<16x32xbf16>
    %196 = arith.truncf %191 : vector<16x32xf32> to vector<16x32xbf16>
    %197 = vector.extract_strided_slice %194 {offsets = [0, 0], sizes = [16, 8], strides = [1, 1]} : vector<16x32xbf16> to vector<16x8xbf16>
    %198 = vector.extract_strided_slice %195 {offsets = [0, 0], sizes = [16, 8], strides = [1, 1]} : vector<16x32xbf16> to vector<16x8xbf16>
    %cst_59 = arith.constant dense<0.000000e+00> : vector<16x16xf32>
    %199 = tpu.matmul %197, %198, %cst_59 {dimension_numbers = #tpu.dot_dimension_numbers<[1], [1], [0], [0], [0, 0, 1, 0], [], []>} : vector<16x8xbf16>, vector<16x8xbf16>, vector<16x16xf32> -> vector<16x16xf32>
    %200 = arith.addf %199, %31 : vector<16x16xf32>
    %cst_60 = arith.constant dense<0xFF800000> : vector<16xf32>
    %201 = vector.multi_reduction <maximumf>, %200, %cst_60 [1] : vector<16x16xf32> to vector<16xf32>
    %202 = vector.shape_cast %201 : vector<16xf32> to vector<16x1xf32>
    %203 = vector.broadcast %202 : vector<16x1xf32> to vector<16x16xf32>
    %204 = arith.subf %200, %203 : vector<16x16xf32>
    %205 = math.exp %204 : vector<16x16xf32>
    %cst_61 = arith.constant dense<0.000000e+00> : vector<16xf32>
    %206 = vector.multi_reduction <add>, %205, %cst_61 [1] : vector<16x16xf32> to vector<16xf32>
    %207 = vector.shape_cast %206 : vector<16xf32> to vector<16x1xf32>
    %208 = tpu.reciprocal %207 {approx = true} : vector<16x1xf32> -> vector<16x1xf32>
    %209 = vector.broadcast %208 : vector<16x1xf32> to vector<16x16xf32>
    %210 = arith.mulf %205, %209 : vector<16x16xf32>
    %211 = arith.truncf %210 : vector<16x16xf32> to vector<16x16xbf16>
    %212 = vector.extract_strided_slice %196 {offsets = [0, 0], sizes = [16, 8], strides = [1, 1]} : vector<16x32xbf16> to vector<16x8xbf16>
    %cst_62 = arith.constant dense<0.000000e+00> : vector<16x8xf32>
    %213 = tpu.matmul %211, %212, %cst_62 {dimension_numbers = #tpu.dot_dimension_numbers<[1], [0], [0], [1], [0, 0, 1, 1], [], []>} : vector<16x16xbf16>, vector<16x8xbf16>, vector<16x8xf32> -> vector<16x8xf32>
    %214 = vector.extract_strided_slice %194 {offsets = [0, 8], sizes = [16, 8], strides = [1, 1]} : vector<16x32xbf16> to vector<16x8xbf16>
    %215 = vector.extract_strided_slice %195 {offsets = [0, 8], sizes = [16, 8], strides = [1, 1]} : vector<16x32xbf16> to vector<16x8xbf16>
    %cst_63 = arith.constant dense<0.000000e+00> : vector<16x16xf32>
    %216 = tpu.matmul %214, %215, %cst_63 {dimension_numbers = #tpu.dot_dimension_numbers<[1], [1], [0], [0], [0, 0, 1, 0], [], []>} : vector<16x8xbf16>, vector<16x8xbf16>, vector<16x16xf32> -> vector<16x16xf32>
    %217 = arith.addf %216, %31 : vector<16x16xf32>
    %cst_64 = arith.constant dense<0xFF800000> : vector<16xf32>
    %218 = vector.multi_reduction <maximumf>, %217, %cst_64 [1] : vector<16x16xf32> to vector<16xf32>
    %219 = vector.shape_cast %218 : vector<16xf32> to vector<16x1xf32>
    %220 = vector.broadcast %219 : vector<16x1xf32> to vector<16x16xf32>
    %221 = arith.subf %217, %220 : vector<16x16xf32>
    %222 = math.exp %221 : vector<16x16xf32>
    %cst_65 = arith.constant dense<0.000000e+00> : vector<16xf32>
    %223 = vector.multi_reduction <add>, %222, %cst_65 [1] : vector<16x16xf32> to vector<16xf32>
    %224 = vector.shape_cast %223 : vector<16xf32> to vector<16x1xf32>
    %225 = tpu.reciprocal %224 {approx = true} : vector<16x1xf32> -> vector<16x1xf32>
    %226 = vector.broadcast %225 : vector<16x1xf32> to vector<16x16xf32>
    %227 = arith.mulf %222, %226 : vector<16x16xf32>
    %228 = arith.truncf %227 : vector<16x16xf32> to vector<16x16xbf16>
    %229 = vector.extract_strided_slice %196 {offsets = [0, 8], sizes = [16, 8], strides = [1, 1]} : vector<16x32xbf16> to vector<16x8xbf16>
    %cst_66 = arith.constant dense<0.000000e+00> : vector<16x8xf32>
    %230 = tpu.matmul %228, %229, %cst_66 {dimension_numbers = #tpu.dot_dimension_numbers<[1], [0], [0], [1], [0, 0, 1, 1], [], []>} : vector<16x16xbf16>, vector<16x8xbf16>, vector<16x8xf32> -> vector<16x8xf32>
    %231 = vector.extract_strided_slice %194 {offsets = [0, 16], sizes = [16, 8], strides = [1, 1]} : vector<16x32xbf16> to vector<16x8xbf16>
    %232 = vector.extract_strided_slice %195 {offsets = [0, 16], sizes = [16, 8], strides = [1, 1]} : vector<16x32xbf16> to vector<16x8xbf16>
    %cst_67 = arith.constant dense<0.000000e+00> : vector<16x16xf32>
    %233 = tpu.matmul %231, %232, %cst_67 {dimension_numbers = #tpu.dot_dimension_numbers<[1], [1], [0], [0], [0, 0, 1, 0], [], []>} : vector<16x8xbf16>, vector<16x8xbf16>, vector<16x16xf32> -> vector<16x16xf32>
    %234 = arith.addf %233, %31 : vector<16x16xf32>
    %cst_68 = arith.constant dense<0xFF800000> : vector<16xf32>
    %235 = vector.multi_reduction <maximumf>, %234, %cst_68 [1] : vector<16x16xf32> to vector<16xf32>
    %236 = vector.shape_cast %235 : vector<16xf32> to vector<16x1xf32>
    %237 = vector.broadcast %236 : vector<16x1xf32> to vector<16x16xf32>
    %238 = arith.subf %234, %237 : vector<16x16xf32>
    %239 = math.exp %238 : vector<16x16xf32>
    %cst_69 = arith.constant dense<0.000000e+00> : vector<16xf32>
    %240 = vector.multi_reduction <add>, %239, %cst_69 [1] : vector<16x16xf32> to vector<16xf32>
    %241 = vector.shape_cast %240 : vector<16xf32> to vector<16x1xf32>
    %242 = tpu.reciprocal %241 {approx = true} : vector<16x1xf32> -> vector<16x1xf32>
    %243 = vector.broadcast %242 : vector<16x1xf32> to vector<16x16xf32>
    %244 = arith.mulf %239, %243 : vector<16x16xf32>
    %245 = arith.truncf %244 : vector<16x16xf32> to vector<16x16xbf16>
    %246 = vector.extract_strided_slice %196 {offsets = [0, 16], sizes = [16, 8], strides = [1, 1]} : vector<16x32xbf16> to vector<16x8xbf16>
    %cst_70 = arith.constant dense<0.000000e+00> : vector<16x8xf32>
    %247 = tpu.matmul %245, %246, %cst_70 {dimension_numbers = #tpu.dot_dimension_numbers<[1], [0], [0], [1], [0, 0, 1, 1], [], []>} : vector<16x16xbf16>, vector<16x8xbf16>, vector<16x8xf32> -> vector<16x8xf32>
    %248 = vector.extract_strided_slice %194 {offsets = [0, 24], sizes = [16, 8], strides = [1, 1]} : vector<16x32xbf16> to vector<16x8xbf16>
    %249 = vector.extract_strided_slice %195 {offsets = [0, 24], sizes = [16, 8], strides = [1, 1]} : vector<16x32xbf16> to vector<16x8xbf16>
    %cst_71 = arith.constant dense<0.000000e+00> : vector<16x16xf32>
    %250 = tpu.matmul %248, %249, %cst_71 {dimension_numbers = #tpu.dot_dimension_numbers<[1], [1], [0], [0], [0, 0, 1, 0], [], []>} : vector<16x8xbf16>, vector<16x8xbf16>, vector<16x16xf32> -> vector<16x16xf32>
    %251 = arith.addf %250, %31 : vector<16x16xf32>
    %cst_72 = arith.constant dense<0xFF800000> : vector<16xf32>
    %252 = vector.multi_reduction <maximumf>, %251, %cst_72 [1] : vector<16x16xf32> to vector<16xf32>
    %253 = vector.shape_cast %252 : vector<16xf32> to vector<16x1xf32>
    %254 = vector.broadcast %253 : vector<16x1xf32> to vector<16x16xf32>
    %255 = arith.subf %251, %254 : vector<16x16xf32>
    %256 = math.exp %255 : vector<16x16xf32>
    %cst_73 = arith.constant dense<0.000000e+00> : vector<16xf32>
    %257 = vector.multi_reduction <add>, %256, %cst_73 [1] : vector<16x16xf32> to vector<16xf32>
    %258 = vector.shape_cast %257 : vector<16xf32> to vector<16x1xf32>
    %259 = tpu.reciprocal %258 {approx = true} : vector<16x1xf32> -> vector<16x1xf32>
    %260 = vector.broadcast %259 : vector<16x1xf32> to vector<16x16xf32>
    %261 = arith.mulf %256, %260 : vector<16x16xf32>
    %262 = arith.truncf %261 : vector<16x16xf32> to vector<16x16xbf16>
    %263 = vector.extract_strided_slice %196 {offsets = [0, 24], sizes = [16, 8], strides = [1, 1]} : vector<16x32xbf16> to vector<16x8xbf16>
    %cst_74 = arith.constant dense<0.000000e+00> : vector<16x8xf32>
    %264 = tpu.matmul %262, %263, %cst_74 {dimension_numbers = #tpu.dot_dimension_numbers<[1], [0], [0], [1], [0, 0, 1, 1], [], []>} : vector<16x16xbf16>, vector<16x8xbf16>, vector<16x8xf32> -> vector<16x8xf32>
    %265 = tpu.concatenate %213, %230, %247, %264 in 1 : vector<16x8xf32>, vector<16x8xf32>, vector<16x8xf32>, vector<16x8xf32> -> vector<16x32xf32>
    %266 = arith.truncf %265 : vector<16x32xf32> to vector<16x32xbf16>
    %cst_75 = arith.constant dense<0.000000e+00> : vector<16x32xf32>
    %267 = tpu.matmul %266, %192, %cst_75 {dimension_numbers = #tpu.dot_dimension_numbers<[1], [0], [0], [1], [0, 0, 1, 1], [], []>} : vector<16x32xbf16>, vector<32x32xbf16>, vector<16x32xf32> -> vector<16x32xf32>
    %268 = vector.broadcast %193 : vector<1x32xf32> to vector<16x32xf32>
    %269 = arith.addf %267, %268 : vector<16x32xf32>
    %c10 = arith.constant 10 : index
    %c0_76 = arith.constant 0 : index
    %270 = vector.load %arg4[%c10, %c0_76] : memref<16x128xf32, #tpu.memory_space<vmem>>, vector<1x32xf32>
    %c11 = arith.constant 11 : index
    %c0_77 = arith.constant 0 : index
    %271 = vector.load %arg4[%c11, %c0_77] : memref<16x128xf32, #tpu.memory_space<vmem>>, vector<1x32xf32>
    %272 = arith.addf %182, %269 : vector<16x32xf32>
    %cst_78 = arith.constant dense<0.000000e+00> : vector<16xf32>
    %273 = vector.multi_reduction <add>, %272, %cst_78 [1] : vector<16x32xf32> to vector<16xf32>
    %274 = vector.shape_cast %273 : vector<16xf32> to vector<16x1xf32>
    %cst_79 = arith.constant 3.200000e+01 : f32
    %275 = vector.broadcast %cst_79 : f32 to vector<16x1xf32>
    %276 = arith.divf %274, %275 : vector<16x1xf32>
    %277 = vector.broadcast %276 : vector<16x1xf32> to vector<16x32xf32>
    %278 = arith.subf %272, %277 : vector<16x32xf32>
    %279 = arith.mulf %278, %278 : vector<16x32xf32>
    %cst_80 = arith.constant dense<0.000000e+00> : vector<16xf32>
    %280 = vector.multi_reduction <add>, %279, %cst_80 [1] : vector<16x32xf32> to vector<16xf32>
    %281 = vector.shape_cast %280 : vector<16xf32> to vector<16x1xf32>
    %cst_81 = arith.constant 3.200000e+01 : f32
    %282 = vector.broadcast %cst_81 : f32 to vector<16x1xf32>
    %283 = arith.divf %281, %282 : vector<16x1xf32>
    %284 = vector.broadcast %276 : vector<16x1xf32> to vector<16x32xf32>
    %285 = arith.subf %272, %284 : vector<16x32xf32>
    %cst_82 = arith.constant 9.99999997E-7 : f32
    %286 = vector.broadcast %cst_82 : f32 to vector<16x1xf32>
    %287 = arith.addf %283, %286 : vector<16x1xf32>
    %288 = math.rsqrt %287 : vector<16x1xf32>
    %289 = vector.broadcast %288 : vector<16x1xf32> to vector<16x32xf32>
    %290 = arith.mulf %285, %289 : vector<16x32xf32>
    %291 = vector.broadcast %270 : vector<1x32xf32> to vector<16x32xf32>
    %292 = arith.mulf %290, %291 : vector<16x32xf32>
    %293 = vector.broadcast %271 : vector<1x32xf32> to vector<16x32xf32>
    %294 = arith.addf %292, %293 : vector<16x32xf32>
    %c224 = arith.constant 224 : index
    %c0_83 = arith.constant 0 : index
    %295 = vector.load %arg3[%c224, %c0_83] : memref<320x128xbf16, #tpu.memory_space<vmem>>, vector<32x64xbf16>
    %c12 = arith.constant 12 : index
    %c0_84 = arith.constant 0 : index
    %296 = vector.load %arg4[%c12, %c0_84] : memref<16x128xf32, #tpu.memory_space<vmem>>, vector<1x64xf32>
    %c256 = arith.constant 256 : index
    %c0_85 = arith.constant 0 : index
    %297 = vector.load %arg3[%c256, %c0_85] : memref<320x128xbf16, #tpu.memory_space<vmem>>, vector<64x32xbf16>
    %c13 = arith.constant 13 : index
    %c0_86 = arith.constant 0 : index
    %298 = vector.load %arg4[%c13, %c0_86] : memref<16x128xf32, #tpu.memory_space<vmem>>, vector<1x32xf32>
    %299 = arith.truncf %294 : vector<16x32xf32> to vector<16x32xbf16>
    %cst_87 = arith.constant dense<0.000000e+00> : vector<16x64xf32>
    %300 = tpu.matmul %299, %295, %cst_87 {dimension_numbers = #tpu.dot_dimension_numbers<[1], [0], [0], [1], [0, 0, 1, 1], [], []>} : vector<16x32xbf16>, vector<32x64xbf16>, vector<16x64xf32> -> vector<16x64xf32>
    %301 = vector.broadcast %296 : vector<1x64xf32> to vector<16x64xf32>
    %302 = arith.addf %300, %301 : vector<16x64xf32>
    %cst_88 = arith.constant 0.000000e+00 : f32
    %303 = vector.broadcast %cst_88 : f32 to vector<16x64xf32>
    %304 = arith.maximumf %302, %303 : vector<16x64xf32>
    %305 = arith.truncf %304 : vector<16x64xf32> to vector<16x64xbf16>
    %cst_89 = arith.constant dense<0.000000e+00> : vector<16x32xf32>
    %306 = tpu.matmul %305, %297, %cst_89 {dimension_numbers = #tpu.dot_dimension_numbers<[1], [0], [0], [1], [0, 0, 1, 1], [], []>} : vector<16x64xbf16>, vector<64x32xbf16>, vector<16x32xf32> -> vector<16x32xf32>
    %307 = vector.broadcast %298 : vector<1x32xf32> to vector<16x32xf32>
    %308 = arith.addf %306, %307 : vector<16x32xf32>
    %c14 = arith.constant 14 : index
    %c0_90 = arith.constant 0 : index
    %309 = vector.load %arg4[%c14, %c0_90] : memref<16x128xf32, #tpu.memory_space<vmem>>, vector<1x32xf32>
    %c15 = arith.constant 15 : index
    %c0_91 = arith.constant 0 : index
    %310 = vector.load %arg4[%c15, %c0_91] : memref<16x128xf32, #tpu.memory_space<vmem>>, vector<1x32xf32>
    %311 = arith.addf %294, %308 : vector<16x32xf32>
    %cst_92 = arith.constant dense<0.000000e+00> : vector<16xf32>
    %312 = vector.multi_reduction <add>, %311, %cst_92 [1] : vector<16x32xf32> to vector<16xf32>
    %313 = vector.shape_cast %312 : vector<16xf32> to vector<16x1xf32>
    %cst_93 = arith.constant 3.200000e+01 : f32
    %314 = vector.broadcast %cst_93 : f32 to vector<16x1xf32>
    %315 = arith.divf %313, %314 : vector<16x1xf32>
    %316 = vector.broadcast %315 : vector<16x1xf32> to vector<16x32xf32>
    %317 = arith.subf %311, %316 : vector<16x32xf32>
    %318 = arith.mulf %317, %317 : vector<16x32xf32>
    %cst_94 = arith.constant dense<0.000000e+00> : vector<16xf32>
    %319 = vector.multi_reduction <add>, %318, %cst_94 [1] : vector<16x32xf32> to vector<16xf32>
    %320 = vector.shape_cast %319 : vector<16xf32> to vector<16x1xf32>
    %cst_95 = arith.constant 3.200000e+01 : f32
    %321 = vector.broadcast %cst_95 : f32 to vector<16x1xf32>
    %322 = arith.divf %320, %321 : vector<16x1xf32>
    %323 = vector.broadcast %315 : vector<16x1xf32> to vector<16x32xf32>
    %324 = arith.subf %311, %323 : vector<16x32xf32>
    %cst_96 = arith.constant 9.99999997E-7 : f32
    %325 = vector.broadcast %cst_96 : f32 to vector<16x1xf32>
    %326 = arith.addf %322, %325 : vector<16x1xf32>
    %327 = math.rsqrt %326 : vector<16x1xf32>
    %328 = vector.broadcast %327 : vector<16x1xf32> to vector<16x32xf32>
    %329 = arith.mulf %324, %328 : vector<16x32xf32>
    %330 = vector.broadcast %309 : vector<1x32xf32> to vector<16x32xf32>
    %331 = arith.mulf %329, %330 : vector<16x32xf32>
    %332 = vector.broadcast %310 : vector<1x32xf32> to vector<16x32xf32>
    %333 = arith.addf %331, %332 : vector<16x32xf32>
    %cst_97 = arith.constant 0.000000e+00 : f32
    %334 = vector.broadcast %cst_97 : f32 to vector<16x96xf32>
    %335 = tpu.concatenate %333, %334 in 1 : vector<16x32xf32>, vector<16x96xf32> -> vector<16x128xf32>
    %c0_98 = arith.constant 0 : index
    %c0_99 = arith.constant 0 : index
    %336 = vector.load %arg5[%c0_98, %c0_99] : memref<16x128xf32, #tpu.memory_space<vmem>>, vector<16x128xf32>
    tpu.vector_store %arg5[%c0_98, %c0_99], %335 {strides = array<i32>} : memref<16x128xf32, #tpu.memory_space<vmem>>, vector<16x128xf32>,
    return
  }
  func.func @transform_0(%arg0: i32) -> (i32, i32) {
    %c0_i32 = arith.constant 0 : i32
    %c0_i32_0 = arith.constant 0 : i32
    %c0_i32_1 = arith.constant 0 : i32
    return %c0_i32, %c0_i32_0 : i32, i32
  }
  func.func @transform_1(%arg0: i32) -> (i32, i32) {
    %c0_i32 = arith.constant 0 : i32
    %c0_i32_0 = arith.constant 0 : i32
    %c0_i32_1 = arith.constant 0 : i32
    return %c0_i32, %c0_i32_0 : i32, i32
  }
  func.func @transform_2(%arg0: i32) -> (i32, i32) {
    %c0_i32 = arith.constant 0 : i32
    %c0_i32_0 = arith.constant 0 : i32
    %c0_i32_1 = arith.constant 0 : i32
    return %c0_i32, %c0_i32_0 : i32, i32
  }
  func.func @transform_3(%arg0: i32) -> (i32, i32) {
    %c0_i32 = arith.constant 0 : i32
    %c0_i32_0 = arith.constant 0 : i32
    %c0_i32_1 = arith.constant 0 : i32
    return %c0_i32, %c0_i32_0 : i32, i32
  }
  func.func @transform_4(%arg0: i32) -> (i32, i32) {
    %c0_i32 = arith.constant 0 : i32
    %c0_i32_0 = arith.constant 0 : i32
    %c0_i32_1 = arith.constant 0 : i32
    return %c0_i32, %c0_i32_0 : i32, i32
  }
}

module attributes {stable_mosaic.version = 11 : i64} {
  func.func @kernel(%arg0: i32, %arg1: memref<16x32xf32, #tpu.memory_space<vmem>>, %arg2: memref<16x128xf32, #tpu.memory_space<vmem>>, %arg3: memref<1x16xf32, #tpu.memory_space<vmem>>, %arg4: memref<1x16xf32, #tpu.memory_space<vmem>>, %arg5: memref<544x128xbf16, #tpu.memory_space<vmem>>, %arg6: memref<26x128xf32, #tpu.memory_space<vmem>>, %arg7: memref<16x128xf32, #tpu.memory_space<vmem>>) attributes {dimension_semantics = [#tpu.dimension_semantics<arbitrary>], iteration_bounds = array<i64: 1>, scalar_prefetch = 0 : i64, scratch_operands = 0 : i64, tpu.core_type = #tpu.core_type<tc>, window_params = [{pipeline_mode = #tpu.pipeline_mode<synchronous>, transform_indices = @transform_0, window_bounds = array<i64: 16, 32>}, {pipeline_mode = #tpu.pipeline_mode<synchronous>, transform_indices = @transform_1, window_bounds = array<i64: 16, 128>}, {pipeline_mode = #tpu.pipeline_mode<synchronous>, transform_indices = @transform_2, window_bounds = array<i64: 1, 16>}, {pipeline_mode = #tpu.pipeline_mode<synchronous>, transform_indices = @transform_3, window_bounds = array<i64: 1, 16>}, {pipeline_mode = #tpu.pipeline_mode<synchronous>, transform_indices = @transform_4, window_bounds = array<i64: 544, 128>}, {pipeline_mode = #tpu.pipeline_mode<synchronous>, transform_indices = @transform_5, window_bounds = array<i64: 26, 128>}, {pipeline_mode = #tpu.pipeline_mode<synchronous>, transform_indices = @transform_6, window_bounds = array<i64: 16, 128>}]} {
    %c0 = arith.constant 0 : index
    %c0_0 = arith.constant 0 : index
    %0 = vector.load %arg1[%c0, %c0_0] : memref<16x32xf32, #tpu.memory_space<vmem>>, vector<16x32xf32>
    %c0_1 = arith.constant 0 : index
    %c0_2 = arith.constant 0 : index
    %1 = vector.load %arg2[%c0_1, %c0_2] : memref<16x128xf32, #tpu.memory_space<vmem>>, vector<16x32xf32>
    %2 = tpu.iota {dimensions = array<i32: 0>} : vector<16x16xi32>
    %3 = tpu.iota {dimensions = array<i32: 1>} : vector<16x16xi32>
    %c0_i32 = arith.constant 0 : i32
    %4 = vector.broadcast %c0_i32 : i32 to vector<16x16xi32>
    %5 = arith.cmpi sge, %2, %4 : vector<16x16xi32>
    %c8_i32 = arith.constant 8 : i32
    %6 = vector.broadcast %c8_i32 : i32 to vector<16x16xi32>
    %7 = arith.cmpi slt, %2, %6 : vector<16x16xi32>
    %8 = arith.andi %5, %7 : vector<16x16xi1>
    %c0_i32_3 = arith.constant 0 : i32
    %9 = vector.broadcast %c0_i32_3 : i32 to vector<16x16xi32>
    %10 = arith.cmpi sge, %3, %9 : vector<16x16xi32>
    %11 = arith.andi %8, %10 : vector<16x16xi1>
    %c8_i32_4 = arith.constant 8 : i32
    %12 = vector.broadcast %c8_i32_4 : i32 to vector<16x16xi32>
    %13 = arith.cmpi slt, %3, %12 : vector<16x16xi32>
    %14 = arith.andi %11, %13 : vector<16x16xi1>
    %c8_i32_5 = arith.constant 8 : i32
    %15 = vector.broadcast %c8_i32_5 : i32 to vector<16x16xi32>
    %16 = arith.cmpi sge, %2, %15 : vector<16x16xi32>
    %c16_i32 = arith.constant 16 : i32
    %17 = vector.broadcast %c16_i32 : i32 to vector<16x16xi32>
    %18 = arith.cmpi slt, %2, %17 : vector<16x16xi32>
    %19 = arith.andi %16, %18 : vector<16x16xi1>
    %c8_i32_6 = arith.constant 8 : i32
    %20 = vector.broadcast %c8_i32_6 : i32 to vector<16x16xi32>
    %21 = arith.cmpi sge, %3, %20 : vector<16x16xi32>
    %22 = arith.andi %19, %21 : vector<16x16xi1>
    %c16_i32_7 = arith.constant 16 : i32
    %23 = vector.broadcast %c16_i32_7 : i32 to vector<16x16xi32>
    %24 = arith.cmpi slt, %3, %23 : vector<16x16xi32>
    %25 = arith.andi %22, %24 : vector<16x16xi1>
    %26 = arith.ori %14, %25 : vector<16x16xi1>
    %27 = arith.cmpi sge, %2, %3 : vector<16x16xi32>
    %28 = arith.andi %26, %27 : vector<16x16xi1>
    %cst = arith.constant 0.000000e+00 : f32
    %cst_8 = arith.constant -1.000000e+09 : f32
    %29 = vector.broadcast %cst : f32 to vector<16x16xf32>
    %30 = vector.broadcast %cst_8 : f32 to vector<16x16xf32>
    %31 = arith.select %28, %29, %30 : vector<16x16xi1>, vector<16x16xf32>
    %c0_9 = arith.constant 0 : index
    %c0_10 = arith.constant 0 : index
    %32 = vector.load %arg4[%c0_9, %c0_10] : memref<1x16xf32, #tpu.memory_space<vmem>>, vector<1x16xf32>
    %33 = vector.broadcast %32 : vector<1x16xf32> to vector<16x16xf32>
    %34 = arith.addf %31, %33 : vector<16x16xf32>
    %35 = tpu.iota {dimensions = array<i32: 0>} : vector<16x16xi32>
    %36 = tpu.iota {dimensions = array<i32: 1>} : vector<16x16xi32>
    %c0_i32_11 = arith.constant 0 : i32
    %37 = vector.broadcast %c0_i32_11 : i32 to vector<16x16xi32>
    %38 = arith.cmpi sge, %35, %37 : vector<16x16xi32>
    %c8_i32_12 = arith.constant 8 : i32
    %39 = vector.broadcast %c8_i32_12 : i32 to vector<16x16xi32>
    %40 = arith.cmpi slt, %35, %39 : vector<16x16xi32>
    %41 = arith.andi %38, %40 : vector<16x16xi1>
    %c0_i32_13 = arith.constant 0 : i32
    %42 = vector.broadcast %c0_i32_13 : i32 to vector<16x16xi32>
    %43 = arith.cmpi sge, %36, %42 : vector<16x16xi32>
    %44 = arith.andi %41, %43 : vector<16x16xi1>
    %c8_i32_14 = arith.constant 8 : i32
    %45 = vector.broadcast %c8_i32_14 : i32 to vector<16x16xi32>
    %46 = arith.cmpi slt, %36, %45 : vector<16x16xi32>
    %47 = arith.andi %44, %46 : vector<16x16xi1>
    %c8_i32_15 = arith.constant 8 : i32
    %48 = vector.broadcast %c8_i32_15 : i32 to vector<16x16xi32>
    %49 = arith.cmpi sge, %35, %48 : vector<16x16xi32>
    %c16_i32_16 = arith.constant 16 : i32
    %50 = vector.broadcast %c16_i32_16 : i32 to vector<16x16xi32>
    %51 = arith.cmpi slt, %35, %50 : vector<16x16xi32>
    %52 = arith.andi %49, %51 : vector<16x16xi1>
    %c8_i32_17 = arith.constant 8 : i32
    %53 = vector.broadcast %c8_i32_17 : i32 to vector<16x16xi32>
    %54 = arith.cmpi sge, %36, %53 : vector<16x16xi32>
    %55 = arith.andi %52, %54 : vector<16x16xi1>
    %c16_i32_18 = arith.constant 16 : i32
    %56 = vector.broadcast %c16_i32_18 : i32 to vector<16x16xi32>
    %57 = arith.cmpi slt, %36, %56 : vector<16x16xi32>
    %58 = arith.andi %55, %57 : vector<16x16xi1>
    %59 = arith.ori %47, %58 : vector<16x16xi1>
    %cst_19 = arith.constant 0.000000e+00 : f32
    %cst_20 = arith.constant -1.000000e+09 : f32
    %60 = vector.broadcast %cst_19 : f32 to vector<16x16xf32>
    %61 = vector.broadcast %cst_20 : f32 to vector<16x16xf32>
    %62 = arith.select %59, %60, %61 : vector<16x16xi1>, vector<16x16xf32>
    %c0_21 = arith.constant 0 : index
    %c0_22 = arith.constant 0 : index
    %63 = vector.load %arg3[%c0_21, %c0_22] : memref<1x16xf32, #tpu.memory_space<vmem>>, vector<1x16xf32>
    %64 = vector.broadcast %63 : vector<1x16xf32> to vector<16x16xf32>
    %65 = arith.addf %62, %64 : vector<16x16xf32>
    %66 = arith.truncf %0 : vector<16x32xf32> to vector<16x32xbf16>
    %c0_23 = arith.constant 0 : index
    %c0_24 = arith.constant 0 : index
    %67 = vector.load %arg5[%c0_23, %c0_24] : memref<544x128xbf16, #tpu.memory_space<vmem>>, vector<32x96xbf16>
    %cst_25 = arith.constant dense<0.000000e+00> : vector<16x96xf32>
    %68 = tpu.matmul %66, %67, %cst_25 {dimension_numbers = #tpu.dot_dimension_numbers<[1], [0], [0], [1], [0, 0, 1, 1], [], []>} : vector<16x32xbf16>, vector<32x96xbf16>, vector<16x96xf32> -> vector<16x96xf32>
    %c0_26 = arith.constant 0 : index
    %c0_27 = arith.constant 0 : index
    %69 = vector.load %arg6[%c0_26, %c0_27] : memref<26x128xf32, #tpu.memory_space<vmem>>, vector<1x96xf32>
    %70 = vector.broadcast %69 : vector<1x96xf32> to vector<16x96xf32>
    %71 = arith.addf %68, %70 : vector<16x96xf32>
    %72 = vector.extract_strided_slice %71 {offsets = [0, 0], sizes = [16, 32], strides = [1, 1]} : vector<16x96xf32> to vector<16x32xf32>
    %73 = vector.extract_strided_slice %71 {offsets = [0, 32], sizes = [16, 32], strides = [1, 1]} : vector<16x96xf32> to vector<16x32xf32>
    %74 = vector.extract_strided_slice %71 {offsets = [0, 64], sizes = [16, 32], strides = [1, 1]} : vector<16x96xf32> to vector<16x32xf32>
    %c32 = arith.constant 32 : index
    %c0_28 = arith.constant 0 : index
    %75 = vector.load %arg5[%c32, %c0_28] : memref<544x128xbf16, #tpu.memory_space<vmem>>, vector<32x32xbf16>
    %c1 = arith.constant 1 : index
    %c0_29 = arith.constant 0 : index
    %76 = vector.load %arg6[%c1, %c0_29] : memref<26x128xf32, #tpu.memory_space<vmem>>, vector<1x32xf32>
    %77 = arith.truncf %72 : vector<16x32xf32> to vector<16x32xbf16>
    %78 = arith.truncf %73 : vector<16x32xf32> to vector<16x32xbf16>
    %79 = arith.truncf %74 : vector<16x32xf32> to vector<16x32xbf16>
    %80 = vector.extract_strided_slice %77 {offsets = [0, 0], sizes = [16, 8], strides = [1, 1]} : vector<16x32xbf16> to vector<16x8xbf16>
    %81 = vector.extract_strided_slice %78 {offsets = [0, 0], sizes = [16, 8], strides = [1, 1]} : vector<16x32xbf16> to vector<16x8xbf16>
    %cst_30 = arith.constant dense<0.000000e+00> : vector<16x16xf32>
    %82 = tpu.matmul %80, %81, %cst_30 {dimension_numbers = #tpu.dot_dimension_numbers<[1], [1], [0], [0], [0, 0, 1, 0], [], []>} : vector<16x8xbf16>, vector<16x8xbf16>, vector<16x16xf32> -> vector<16x16xf32>
    %83 = arith.addf %82, %34 : vector<16x16xf32>
    %cst_31 = arith.constant dense<0xFF800000> : vector<16xf32>
    %84 = vector.multi_reduction <maximumf>, %83, %cst_31 [1] : vector<16x16xf32> to vector<16xf32>
    %85 = vector.shape_cast %84 : vector<16xf32> to vector<16x1xf32>
    %86 = vector.broadcast %85 : vector<16x1xf32> to vector<16x16xf32>
    %87 = arith.subf %83, %86 : vector<16x16xf32>
    %88 = math.exp %87 : vector<16x16xf32>
    %cst_32 = arith.constant dense<0.000000e+00> : vector<16xf32>
    %89 = vector.multi_reduction <add>, %88, %cst_32 [1] : vector<16x16xf32> to vector<16xf32>
    %90 = vector.shape_cast %89 : vector<16xf32> to vector<16x1xf32>
    %91 = tpu.reciprocal %90 {approx = true} : vector<16x1xf32> -> vector<16x1xf32>
    %92 = vector.broadcast %91 : vector<16x1xf32> to vector<16x16xf32>
    %93 = arith.mulf %88, %92 : vector<16x16xf32>
    %94 = arith.truncf %93 : vector<16x16xf32> to vector<16x16xbf16>
    %95 = vector.extract_strided_slice %79 {offsets = [0, 0], sizes = [16, 8], strides = [1, 1]} : vector<16x32xbf16> to vector<16x8xbf16>
    %cst_33 = arith.constant dense<0.000000e+00> : vector<16x8xf32>
    %96 = tpu.matmul %94, %95, %cst_33 {dimension_numbers = #tpu.dot_dimension_numbers<[1], [0], [0], [1], [0, 0, 1, 1], [], []>} : vector<16x16xbf16>, vector<16x8xbf16>, vector<16x8xf32> -> vector<16x8xf32>
    %97 = vector.extract_strided_slice %77 {offsets = [0, 8], sizes = [16, 8], strides = [1, 1]} : vector<16x32xbf16> to vector<16x8xbf16>
    %98 = vector.extract_strided_slice %78 {offsets = [0, 8], sizes = [16, 8], strides = [1, 1]} : vector<16x32xbf16> to vector<16x8xbf16>
    %cst_34 = arith.constant dense<0.000000e+00> : vector<16x16xf32>
    %99 = tpu.matmul %97, %98, %cst_34 {dimension_numbers = #tpu.dot_dimension_numbers<[1], [1], [0], [0], [0, 0, 1, 0], [], []>} : vector<16x8xbf16>, vector<16x8xbf16>, vector<16x16xf32> -> vector<16x16xf32>
    %100 = arith.addf %99, %34 : vector<16x16xf32>
    %cst_35 = arith.constant dense<0xFF800000> : vector<16xf32>
    %101 = vector.multi_reduction <maximumf>, %100, %cst_35 [1] : vector<16x16xf32> to vector<16xf32>
    %102 = vector.shape_cast %101 : vector<16xf32> to vector<16x1xf32>
    %103 = vector.broadcast %102 : vector<16x1xf32> to vector<16x16xf32>
    %104 = arith.subf %100, %103 : vector<16x16xf32>
    %105 = math.exp %104 : vector<16x16xf32>
    %cst_36 = arith.constant dense<0.000000e+00> : vector<16xf32>
    %106 = vector.multi_reduction <add>, %105, %cst_36 [1] : vector<16x16xf32> to vector<16xf32>
    %107 = vector.shape_cast %106 : vector<16xf32> to vector<16x1xf32>
    %108 = tpu.reciprocal %107 {approx = true} : vector<16x1xf32> -> vector<16x1xf32>
    %109 = vector.broadcast %108 : vector<16x1xf32> to vector<16x16xf32>
    %110 = arith.mulf %105, %109 : vector<16x16xf32>
    %111 = arith.truncf %110 : vector<16x16xf32> to vector<16x16xbf16>
    %112 = vector.extract_strided_slice %79 {offsets = [0, 8], sizes = [16, 8], strides = [1, 1]} : vector<16x32xbf16> to vector<16x8xbf16>
    %cst_37 = arith.constant dense<0.000000e+00> : vector<16x8xf32>
    %113 = tpu.matmul %111, %112, %cst_37 {dimension_numbers = #tpu.dot_dimension_numbers<[1], [0], [0], [1], [0, 0, 1, 1], [], []>} : vector<16x16xbf16>, vector<16x8xbf16>, vector<16x8xf32> -> vector<16x8xf32>
    %114 = vector.extract_strided_slice %77 {offsets = [0, 16], sizes = [16, 8], strides = [1, 1]} : vector<16x32xbf16> to vector<16x8xbf16>
    %115 = vector.extract_strided_slice %78 {offsets = [0, 16], sizes = [16, 8], strides = [1, 1]} : vector<16x32xbf16> to vector<16x8xbf16>
    %cst_38 = arith.constant dense<0.000000e+00> : vector<16x16xf32>
    %116 = tpu.matmul %114, %115, %cst_38 {dimension_numbers = #tpu.dot_dimension_numbers<[1], [1], [0], [0], [0, 0, 1, 0], [], []>} : vector<16x8xbf16>, vector<16x8xbf16>, vector<16x16xf32> -> vector<16x16xf32>
    %117 = arith.addf %116, %34 : vector<16x16xf32>
    %cst_39 = arith.constant dense<0xFF800000> : vector<16xf32>
    %118 = vector.multi_reduction <maximumf>, %117, %cst_39 [1] : vector<16x16xf32> to vector<16xf32>
    %119 = vector.shape_cast %118 : vector<16xf32> to vector<16x1xf32>
    %120 = vector.broadcast %119 : vector<16x1xf32> to vector<16x16xf32>
    %121 = arith.subf %117, %120 : vector<16x16xf32>
    %122 = math.exp %121 : vector<16x16xf32>
    %cst_40 = arith.constant dense<0.000000e+00> : vector<16xf32>
    %123 = vector.multi_reduction <add>, %122, %cst_40 [1] : vector<16x16xf32> to vector<16xf32>
    %124 = vector.shape_cast %123 : vector<16xf32> to vector<16x1xf32>
    %125 = tpu.reciprocal %124 {approx = true} : vector<16x1xf32> -> vector<16x1xf32>
    %126 = vector.broadcast %125 : vector<16x1xf32> to vector<16x16xf32>
    %127 = arith.mulf %122, %126 : vector<16x16xf32>
    %128 = arith.truncf %127 : vector<16x16xf32> to vector<16x16xbf16>
    %129 = vector.extract_strided_slice %79 {offsets = [0, 16], sizes = [16, 8], strides = [1, 1]} : vector<16x32xbf16> to vector<16x8xbf16>
    %cst_41 = arith.constant dense<0.000000e+00> : vector<16x8xf32>
    %130 = tpu.matmul %128, %129, %cst_41 {dimension_numbers = #tpu.dot_dimension_numbers<[1], [0], [0], [1], [0, 0, 1, 1], [], []>} : vector<16x16xbf16>, vector<16x8xbf16>, vector<16x8xf32> -> vector<16x8xf32>
    %131 = vector.extract_strided_slice %77 {offsets = [0, 24], sizes = [16, 8], strides = [1, 1]} : vector<16x32xbf16> to vector<16x8xbf16>
    %132 = vector.extract_strided_slice %78 {offsets = [0, 24], sizes = [16, 8], strides = [1, 1]} : vector<16x32xbf16> to vector<16x8xbf16>
    %cst_42 = arith.constant dense<0.000000e+00> : vector<16x16xf32>
    %133 = tpu.matmul %131, %132, %cst_42 {dimension_numbers = #tpu.dot_dimension_numbers<[1], [1], [0], [0], [0, 0, 1, 0], [], []>} : vector<16x8xbf16>, vector<16x8xbf16>, vector<16x16xf32> -> vector<16x16xf32>
    %134 = arith.addf %133, %34 : vector<16x16xf32>
    %cst_43 = arith.constant dense<0xFF800000> : vector<16xf32>
    %135 = vector.multi_reduction <maximumf>, %134, %cst_43 [1] : vector<16x16xf32> to vector<16xf32>
    %136 = vector.shape_cast %135 : vector<16xf32> to vector<16x1xf32>
    %137 = vector.broadcast %136 : vector<16x1xf32> to vector<16x16xf32>
    %138 = arith.subf %134, %137 : vector<16x16xf32>
    %139 = math.exp %138 : vector<16x16xf32>
    %cst_44 = arith.constant dense<0.000000e+00> : vector<16xf32>
    %140 = vector.multi_reduction <add>, %139, %cst_44 [1] : vector<16x16xf32> to vector<16xf32>
    %141 = vector.shape_cast %140 : vector<16xf32> to vector<16x1xf32>
    %142 = tpu.reciprocal %141 {approx = true} : vector<16x1xf32> -> vector<16x1xf32>
    %143 = vector.broadcast %142 : vector<16x1xf32> to vector<16x16xf32>
    %144 = arith.mulf %139, %143 : vector<16x16xf32>
    %145 = arith.truncf %144 : vector<16x16xf32> to vector<16x16xbf16>
    %146 = vector.extract_strided_slice %79 {offsets = [0, 24], sizes = [16, 8], strides = [1, 1]} : vector<16x32xbf16> to vector<16x8xbf16>
    %cst_45 = arith.constant dense<0.000000e+00> : vector<16x8xf32>
    %147 = tpu.matmul %145, %146, %cst_45 {dimension_numbers = #tpu.dot_dimension_numbers<[1], [0], [0], [1], [0, 0, 1, 1], [], []>} : vector<16x16xbf16>, vector<16x8xbf16>, vector<16x8xf32> -> vector<16x8xf32>
    %148 = tpu.concatenate %96, %113, %130, %147 in 1 : vector<16x8xf32>, vector<16x8xf32>, vector<16x8xf32>, vector<16x8xf32> -> vector<16x32xf32>
    %149 = arith.truncf %148 : vector<16x32xf32> to vector<16x32xbf16>
    %cst_46 = arith.constant dense<0.000000e+00> : vector<16x32xf32>
    %150 = tpu.matmul %149, %75, %cst_46 {dimension_numbers = #tpu.dot_dimension_numbers<[1], [0], [0], [1], [0, 0, 1, 1], [], []>} : vector<16x32xbf16>, vector<32x32xbf16>, vector<16x32xf32> -> vector<16x32xf32>
    %151 = vector.broadcast %76 : vector<1x32xf32> to vector<16x32xf32>
    %152 = arith.addf %150, %151 : vector<16x32xf32>
    %c2 = arith.constant 2 : index
    %c0_47 = arith.constant 0 : index
    %153 = vector.load %arg6[%c2, %c0_47] : memref<26x128xf32, #tpu.memory_space<vmem>>, vector<1x32xf32>
    %c3 = arith.constant 3 : index
    %c0_48 = arith.constant 0 : index
    %154 = vector.load %arg6[%c3, %c0_48] : memref<26x128xf32, #tpu.memory_space<vmem>>, vector<1x32xf32>
    %155 = arith.addf %0, %152 : vector<16x32xf32>
    %cst_49 = arith.constant dense<0.000000e+00> : vector<16xf32>
    %156 = vector.multi_reduction <add>, %155, %cst_49 [1] : vector<16x32xf32> to vector<16xf32>
    %157 = vector.shape_cast %156 : vector<16xf32> to vector<16x1xf32>
    %cst_50 = arith.constant 3.200000e+01 : f32
    %158 = vector.broadcast %cst_50 : f32 to vector<16x1xf32>
    %159 = arith.divf %157, %158 : vector<16x1xf32>
    %160 = vector.broadcast %159 : vector<16x1xf32> to vector<16x32xf32>
    %161 = arith.subf %155, %160 : vector<16x32xf32>
    %162 = arith.mulf %161, %161 : vector<16x32xf32>
    %cst_51 = arith.constant dense<0.000000e+00> : vector<16xf32>
    %163 = vector.multi_reduction <add>, %162, %cst_51 [1] : vector<16x32xf32> to vector<16xf32>
    %164 = vector.shape_cast %163 : vector<16xf32> to vector<16x1xf32>
    %cst_52 = arith.constant 3.200000e+01 : f32
    %165 = vector.broadcast %cst_52 : f32 to vector<16x1xf32>
    %166 = arith.divf %164, %165 : vector<16x1xf32>
    %167 = vector.broadcast %159 : vector<16x1xf32> to vector<16x32xf32>
    %168 = arith.subf %155, %167 : vector<16x32xf32>
    %cst_53 = arith.constant 9.99999997E-7 : f32
    %169 = vector.broadcast %cst_53 : f32 to vector<16x1xf32>
    %170 = arith.addf %166, %169 : vector<16x1xf32>
    %171 = math.rsqrt %170 : vector<16x1xf32>
    %172 = vector.broadcast %171 : vector<16x1xf32> to vector<16x32xf32>
    %173 = arith.mulf %168, %172 : vector<16x32xf32>
    %174 = vector.broadcast %153 : vector<1x32xf32> to vector<16x32xf32>
    %175 = arith.mulf %173, %174 : vector<16x32xf32>
    %176 = vector.broadcast %154 : vector<1x32xf32> to vector<16x32xf32>
    %177 = arith.addf %175, %176 : vector<16x32xf32>
    %178 = arith.truncf %177 : vector<16x32xf32> to vector<16x32xbf16>
    %c64 = arith.constant 64 : index
    %c0_54 = arith.constant 0 : index
    %179 = vector.load %arg5[%c64, %c0_54] : memref<544x128xbf16, #tpu.memory_space<vmem>>, vector<32x32xbf16>
    %cst_55 = arith.constant dense<0.000000e+00> : vector<16x32xf32>
    %180 = tpu.matmul %178, %179, %cst_55 {dimension_numbers = #tpu.dot_dimension_numbers<[1], [0], [0], [1], [0, 0, 1, 1], [], []>} : vector<16x32xbf16>, vector<32x32xbf16>, vector<16x32xf32> -> vector<16x32xf32>
    %c4 = arith.constant 4 : index
    %c0_56 = arith.constant 0 : index
    %181 = vector.load %arg6[%c4, %c0_56] : memref<26x128xf32, #tpu.memory_space<vmem>>, vector<1x32xf32>
    %182 = vector.broadcast %181 : vector<1x32xf32> to vector<16x32xf32>
    %183 = arith.addf %180, %182 : vector<16x32xf32>
    %184 = arith.truncf %1 : vector<16x32xf32> to vector<16x32xbf16>
    %c96 = arith.constant 96 : index
    %c0_57 = arith.constant 0 : index
    %185 = vector.load %arg5[%c96, %c0_57] : memref<544x128xbf16, #tpu.memory_space<vmem>>, vector<32x64xbf16>
    %cst_58 = arith.constant dense<0.000000e+00> : vector<16x64xf32>
    %186 = tpu.matmul %184, %185, %cst_58 {dimension_numbers = #tpu.dot_dimension_numbers<[1], [0], [0], [1], [0, 0, 1, 1], [], []>} : vector<16x32xbf16>, vector<32x64xbf16>, vector<16x64xf32> -> vector<16x64xf32>
    %c5 = arith.constant 5 : index
    %c0_59 = arith.constant 0 : index
    %187 = vector.load %arg6[%c5, %c0_59] : memref<26x128xf32, #tpu.memory_space<vmem>>, vector<1x64xf32>
    %188 = vector.broadcast %187 : vector<1x64xf32> to vector<16x64xf32>
    %189 = arith.addf %186, %188 : vector<16x64xf32>
    %190 = vector.extract_strided_slice %189 {offsets = [0, 0], sizes = [16, 32], strides = [1, 1]} : vector<16x64xf32> to vector<16x32xf32>
    %191 = vector.extract_strided_slice %189 {offsets = [0, 32], sizes = [16, 32], strides = [1, 1]} : vector<16x64xf32> to vector<16x32xf32>
    %c128 = arith.constant 128 : index
    %c0_60 = arith.constant 0 : index
    %192 = vector.load %arg5[%c128, %c0_60] : memref<544x128xbf16, #tpu.memory_space<vmem>>, vector<32x32xbf16>
    %c6 = arith.constant 6 : index
    %c0_61 = arith.constant 0 : index
    %193 = vector.load %arg6[%c6, %c0_61] : memref<26x128xf32, #tpu.memory_space<vmem>>, vector<1x32xf32>
    %194 = arith.truncf %183 : vector<16x32xf32> to vector<16x32xbf16>
    %195 = arith.truncf %190 : vector<16x32xf32> to vector<16x32xbf16>
    %196 = arith.truncf %191 : vector<16x32xf32> to vector<16x32xbf16>
    %197 = vector.extract_strided_slice %194 {offsets = [0, 0], sizes = [16, 8], strides = [1, 1]} : vector<16x32xbf16> to vector<16x8xbf16>
    %198 = vector.extract_strided_slice %195 {offsets = [0, 0], sizes = [16, 8], strides = [1, 1]} : vector<16x32xbf16> to vector<16x8xbf16>
    %cst_62 = arith.constant dense<0.000000e+00> : vector<16x16xf32>
    %199 = tpu.matmul %197, %198, %cst_62 {dimension_numbers = #tpu.dot_dimension_numbers<[1], [1], [0], [0], [0, 0, 1, 0], [], []>} : vector<16x8xbf16>, vector<16x8xbf16>, vector<16x16xf32> -> vector<16x16xf32>
    %200 = arith.addf %199, %65 : vector<16x16xf32>
    %cst_63 = arith.constant dense<0xFF800000> : vector<16xf32>
    %201 = vector.multi_reduction <maximumf>, %200, %cst_63 [1] : vector<16x16xf32> to vector<16xf32>
    %202 = vector.shape_cast %201 : vector<16xf32> to vector<16x1xf32>
    %203 = vector.broadcast %202 : vector<16x1xf32> to vector<16x16xf32>
    %204 = arith.subf %200, %203 : vector<16x16xf32>
    %205 = math.exp %204 : vector<16x16xf32>
    %cst_64 = arith.constant dense<0.000000e+00> : vector<16xf32>
    %206 = vector.multi_reduction <add>, %205, %cst_64 [1] : vector<16x16xf32> to vector<16xf32>
    %207 = vector.shape_cast %206 : vector<16xf32> to vector<16x1xf32>
    %208 = tpu.reciprocal %207 {approx = true} : vector<16x1xf32> -> vector<16x1xf32>
    %209 = vector.broadcast %208 : vector<16x1xf32> to vector<16x16xf32>
    %210 = arith.mulf %205, %209 : vector<16x16xf32>
    %211 = arith.truncf %210 : vector<16x16xf32> to vector<16x16xbf16>
    %212 = vector.extract_strided_slice %196 {offsets = [0, 0], sizes = [16, 8], strides = [1, 1]} : vector<16x32xbf16> to vector<16x8xbf16>
    %cst_65 = arith.constant dense<0.000000e+00> : vector<16x8xf32>
    %213 = tpu.matmul %211, %212, %cst_65 {dimension_numbers = #tpu.dot_dimension_numbers<[1], [0], [0], [1], [0, 0, 1, 1], [], []>} : vector<16x16xbf16>, vector<16x8xbf16>, vector<16x8xf32> -> vector<16x8xf32>
    %214 = vector.extract_strided_slice %194 {offsets = [0, 8], sizes = [16, 8], strides = [1, 1]} : vector<16x32xbf16> to vector<16x8xbf16>
    %215 = vector.extract_strided_slice %195 {offsets = [0, 8], sizes = [16, 8], strides = [1, 1]} : vector<16x32xbf16> to vector<16x8xbf16>
    %cst_66 = arith.constant dense<0.000000e+00> : vector<16x16xf32>
    %216 = tpu.matmul %214, %215, %cst_66 {dimension_numbers = #tpu.dot_dimension_numbers<[1], [1], [0], [0], [0, 0, 1, 0], [], []>} : vector<16x8xbf16>, vector<16x8xbf16>, vector<16x16xf32> -> vector<16x16xf32>
    %217 = arith.addf %216, %65 : vector<16x16xf32>
    %cst_67 = arith.constant dense<0xFF800000> : vector<16xf32>
    %218 = vector.multi_reduction <maximumf>, %217, %cst_67 [1] : vector<16x16xf32> to vector<16xf32>
    %219 = vector.shape_cast %218 : vector<16xf32> to vector<16x1xf32>
    %220 = vector.broadcast %219 : vector<16x1xf32> to vector<16x16xf32>
    %221 = arith.subf %217, %220 : vector<16x16xf32>
    %222 = math.exp %221 : vector<16x16xf32>
    %cst_68 = arith.constant dense<0.000000e+00> : vector<16xf32>
    %223 = vector.multi_reduction <add>, %222, %cst_68 [1] : vector<16x16xf32> to vector<16xf32>
    %224 = vector.shape_cast %223 : vector<16xf32> to vector<16x1xf32>
    %225 = tpu.reciprocal %224 {approx = true} : vector<16x1xf32> -> vector<16x1xf32>
    %226 = vector.broadcast %225 : vector<16x1xf32> to vector<16x16xf32>
    %227 = arith.mulf %222, %226 : vector<16x16xf32>
    %228 = arith.truncf %227 : vector<16x16xf32> to vector<16x16xbf16>
    %229 = vector.extract_strided_slice %196 {offsets = [0, 8], sizes = [16, 8], strides = [1, 1]} : vector<16x32xbf16> to vector<16x8xbf16>
    %cst_69 = arith.constant dense<0.000000e+00> : vector<16x8xf32>
    %230 = tpu.matmul %228, %229, %cst_69 {dimension_numbers = #tpu.dot_dimension_numbers<[1], [0], [0], [1], [0, 0, 1, 1], [], []>} : vector<16x16xbf16>, vector<16x8xbf16>, vector<16x8xf32> -> vector<16x8xf32>
    %231 = vector.extract_strided_slice %194 {offsets = [0, 16], sizes = [16, 8], strides = [1, 1]} : vector<16x32xbf16> to vector<16x8xbf16>
    %232 = vector.extract_strided_slice %195 {offsets = [0, 16], sizes = [16, 8], strides = [1, 1]} : vector<16x32xbf16> to vector<16x8xbf16>
    %cst_70 = arith.constant dense<0.000000e+00> : vector<16x16xf32>
    %233 = tpu.matmul %231, %232, %cst_70 {dimension_numbers = #tpu.dot_dimension_numbers<[1], [1], [0], [0], [0, 0, 1, 0], [], []>} : vector<16x8xbf16>, vector<16x8xbf16>, vector<16x16xf32> -> vector<16x16xf32>
    %234 = arith.addf %233, %65 : vector<16x16xf32>
    %cst_71 = arith.constant dense<0xFF800000> : vector<16xf32>
    %235 = vector.multi_reduction <maximumf>, %234, %cst_71 [1] : vector<16x16xf32> to vector<16xf32>
    %236 = vector.shape_cast %235 : vector<16xf32> to vector<16x1xf32>
    %237 = vector.broadcast %236 : vector<16x1xf32> to vector<16x16xf32>
    %238 = arith.subf %234, %237 : vector<16x16xf32>
    %239 = math.exp %238 : vector<16x16xf32>
    %cst_72 = arith.constant dense<0.000000e+00> : vector<16xf32>
    %240 = vector.multi_reduction <add>, %239, %cst_72 [1] : vector<16x16xf32> to vector<16xf32>
    %241 = vector.shape_cast %240 : vector<16xf32> to vector<16x1xf32>
    %242 = tpu.reciprocal %241 {approx = true} : vector<16x1xf32> -> vector<16x1xf32>
    %243 = vector.broadcast %242 : vector<16x1xf32> to vector<16x16xf32>
    %244 = arith.mulf %239, %243 : vector<16x16xf32>
    %245 = arith.truncf %244 : vector<16x16xf32> to vector<16x16xbf16>
    %246 = vector.extract_strided_slice %196 {offsets = [0, 16], sizes = [16, 8], strides = [1, 1]} : vector<16x32xbf16> to vector<16x8xbf16>
    %cst_73 = arith.constant dense<0.000000e+00> : vector<16x8xf32>
    %247 = tpu.matmul %245, %246, %cst_73 {dimension_numbers = #tpu.dot_dimension_numbers<[1], [0], [0], [1], [0, 0, 1, 1], [], []>} : vector<16x16xbf16>, vector<16x8xbf16>, vector<16x8xf32> -> vector<16x8xf32>
    %248 = vector.extract_strided_slice %194 {offsets = [0, 24], sizes = [16, 8], strides = [1, 1]} : vector<16x32xbf16> to vector<16x8xbf16>
    %249 = vector.extract_strided_slice %195 {offsets = [0, 24], sizes = [16, 8], strides = [1, 1]} : vector<16x32xbf16> to vector<16x8xbf16>
    %cst_74 = arith.constant dense<0.000000e+00> : vector<16x16xf32>
    %250 = tpu.matmul %248, %249, %cst_74 {dimension_numbers = #tpu.dot_dimension_numbers<[1], [1], [0], [0], [0, 0, 1, 0], [], []>} : vector<16x8xbf16>, vector<16x8xbf16>, vector<16x16xf32> -> vector<16x16xf32>
    %251 = arith.addf %250, %65 : vector<16x16xf32>
    %cst_75 = arith.constant dense<0xFF800000> : vector<16xf32>
    %252 = vector.multi_reduction <maximumf>, %251, %cst_75 [1] : vector<16x16xf32> to vector<16xf32>
    %253 = vector.shape_cast %252 : vector<16xf32> to vector<16x1xf32>
    %254 = vector.broadcast %253 : vector<16x1xf32> to vector<16x16xf32>
    %255 = arith.subf %251, %254 : vector<16x16xf32>
    %256 = math.exp %255 : vector<16x16xf32>
    %cst_76 = arith.constant dense<0.000000e+00> : vector<16xf32>
    %257 = vector.multi_reduction <add>, %256, %cst_76 [1] : vector<16x16xf32> to vector<16xf32>
    %258 = vector.shape_cast %257 : vector<16xf32> to vector<16x1xf32>
    %259 = tpu.reciprocal %258 {approx = true} : vector<16x1xf32> -> vector<16x1xf32>
    %260 = vector.broadcast %259 : vector<16x1xf32> to vector<16x16xf32>
    %261 = arith.mulf %256, %260 : vector<16x16xf32>
    %262 = arith.truncf %261 : vector<16x16xf32> to vector<16x16xbf16>
    %263 = vector.extract_strided_slice %196 {offsets = [0, 24], sizes = [16, 8], strides = [1, 1]} : vector<16x32xbf16> to vector<16x8xbf16>
    %cst_77 = arith.constant dense<0.000000e+00> : vector<16x8xf32>
    %264 = tpu.matmul %262, %263, %cst_77 {dimension_numbers = #tpu.dot_dimension_numbers<[1], [0], [0], [1], [0, 0, 1, 1], [], []>} : vector<16x16xbf16>, vector<16x8xbf16>, vector<16x8xf32> -> vector<16x8xf32>
    %265 = tpu.concatenate %213, %230, %247, %264 in 1 : vector<16x8xf32>, vector<16x8xf32>, vector<16x8xf32>, vector<16x8xf32> -> vector<16x32xf32>
    %266 = arith.truncf %265 : vector<16x32xf32> to vector<16x32xbf16>
    %cst_78 = arith.constant dense<0.000000e+00> : vector<16x32xf32>
    %267 = tpu.matmul %266, %192, %cst_78 {dimension_numbers = #tpu.dot_dimension_numbers<[1], [0], [0], [1], [0, 0, 1, 1], [], []>} : vector<16x32xbf16>, vector<32x32xbf16>, vector<16x32xf32> -> vector<16x32xf32>
    %268 = vector.broadcast %193 : vector<1x32xf32> to vector<16x32xf32>
    %269 = arith.addf %267, %268 : vector<16x32xf32>
    %c7 = arith.constant 7 : index
    %c0_79 = arith.constant 0 : index
    %270 = vector.load %arg6[%c7, %c0_79] : memref<26x128xf32, #tpu.memory_space<vmem>>, vector<1x32xf32>
    %c8 = arith.constant 8 : index
    %c0_80 = arith.constant 0 : index
    %271 = vector.load %arg6[%c8, %c0_80] : memref<26x128xf32, #tpu.memory_space<vmem>>, vector<1x32xf32>
    %272 = arith.addf %177, %269 : vector<16x32xf32>
    %cst_81 = arith.constant dense<0.000000e+00> : vector<16xf32>
    %273 = vector.multi_reduction <add>, %272, %cst_81 [1] : vector<16x32xf32> to vector<16xf32>
    %274 = vector.shape_cast %273 : vector<16xf32> to vector<16x1xf32>
    %cst_82 = arith.constant 3.200000e+01 : f32
    %275 = vector.broadcast %cst_82 : f32 to vector<16x1xf32>
    %276 = arith.divf %274, %275 : vector<16x1xf32>
    %277 = vector.broadcast %276 : vector<16x1xf32> to vector<16x32xf32>
    %278 = arith.subf %272, %277 : vector<16x32xf32>
    %279 = arith.mulf %278, %278 : vector<16x32xf32>
    %cst_83 = arith.constant dense<0.000000e+00> : vector<16xf32>
    %280 = vector.multi_reduction <add>, %279, %cst_83 [1] : vector<16x32xf32> to vector<16xf32>
    %281 = vector.shape_cast %280 : vector<16xf32> to vector<16x1xf32>
    %cst_84 = arith.constant 3.200000e+01 : f32
    %282 = vector.broadcast %cst_84 : f32 to vector<16x1xf32>
    %283 = arith.divf %281, %282 : vector<16x1xf32>
    %284 = vector.broadcast %276 : vector<16x1xf32> to vector<16x32xf32>
    %285 = arith.subf %272, %284 : vector<16x32xf32>
    %cst_85 = arith.constant 9.99999997E-7 : f32
    %286 = vector.broadcast %cst_85 : f32 to vector<16x1xf32>
    %287 = arith.addf %283, %286 : vector<16x1xf32>
    %288 = math.rsqrt %287 : vector<16x1xf32>
    %289 = vector.broadcast %288 : vector<16x1xf32> to vector<16x32xf32>
    %290 = arith.mulf %285, %289 : vector<16x32xf32>
    %291 = vector.broadcast %270 : vector<1x32xf32> to vector<16x32xf32>
    %292 = arith.mulf %290, %291 : vector<16x32xf32>
    %293 = vector.broadcast %271 : vector<1x32xf32> to vector<16x32xf32>
    %294 = arith.addf %292, %293 : vector<16x32xf32>
    %c160 = arith.constant 160 : index
    %c0_86 = arith.constant 0 : index
    %295 = vector.load %arg5[%c160, %c0_86] : memref<544x128xbf16, #tpu.memory_space<vmem>>, vector<32x64xbf16>
    %c9 = arith.constant 9 : index
    %c0_87 = arith.constant 0 : index
    %296 = vector.load %arg6[%c9, %c0_87] : memref<26x128xf32, #tpu.memory_space<vmem>>, vector<1x64xf32>
    %c192 = arith.constant 192 : index
    %c0_88 = arith.constant 0 : index
    %297 = vector.load %arg5[%c192, %c0_88] : memref<544x128xbf16, #tpu.memory_space<vmem>>, vector<64x32xbf16>
    %c10 = arith.constant 10 : index
    %c0_89 = arith.constant 0 : index
    %298 = vector.load %arg6[%c10, %c0_89] : memref<26x128xf32, #tpu.memory_space<vmem>>, vector<1x32xf32>
    %299 = arith.truncf %294 : vector<16x32xf32> to vector<16x32xbf16>
    %cst_90 = arith.constant dense<0.000000e+00> : vector<16x64xf32>
    %300 = tpu.matmul %299, %295, %cst_90 {dimension_numbers = #tpu.dot_dimension_numbers<[1], [0], [0], [1], [0, 0, 1, 1], [], []>} : vector<16x32xbf16>, vector<32x64xbf16>, vector<16x64xf32> -> vector<16x64xf32>
    %301 = vector.broadcast %296 : vector<1x64xf32> to vector<16x64xf32>
    %302 = arith.addf %300, %301 : vector<16x64xf32>
    %cst_91 = arith.constant 0.000000e+00 : f32
    %303 = vector.broadcast %cst_91 : f32 to vector<16x64xf32>
    %304 = arith.maximumf %302, %303 : vector<16x64xf32>
    %305 = arith.truncf %304 : vector<16x64xf32> to vector<16x64xbf16>
    %cst_92 = arith.constant dense<0.000000e+00> : vector<16x32xf32>
    %306 = tpu.matmul %305, %297, %cst_92 {dimension_numbers = #tpu.dot_dimension_numbers<[1], [0], [0], [1], [0, 0, 1, 1], [], []>} : vector<16x64xbf16>, vector<64x32xbf16>, vector<16x32xf32> -> vector<16x32xf32>
    %307 = vector.broadcast %298 : vector<1x32xf32> to vector<16x32xf32>
    %308 = arith.addf %306, %307 : vector<16x32xf32>
    %c11 = arith.constant 11 : index
    %c0_93 = arith.constant 0 : index
    %309 = vector.load %arg6[%c11, %c0_93] : memref<26x128xf32, #tpu.memory_space<vmem>>, vector<1x32xf32>
    %c12 = arith.constant 12 : index
    %c0_94 = arith.constant 0 : index
    %310 = vector.load %arg6[%c12, %c0_94] : memref<26x128xf32, #tpu.memory_space<vmem>>, vector<1x32xf32>
    %311 = arith.addf %294, %308 : vector<16x32xf32>
    %cst_95 = arith.constant dense<0.000000e+00> : vector<16xf32>
    %312 = vector.multi_reduction <add>, %311, %cst_95 [1] : vector<16x32xf32> to vector<16xf32>
    %313 = vector.shape_cast %312 : vector<16xf32> to vector<16x1xf32>
    %cst_96 = arith.constant 3.200000e+01 : f32
    %314 = vector.broadcast %cst_96 : f32 to vector<16x1xf32>
    %315 = arith.divf %313, %314 : vector<16x1xf32>
    %316 = vector.broadcast %315 : vector<16x1xf32> to vector<16x32xf32>
    %317 = arith.subf %311, %316 : vector<16x32xf32>
    %318 = arith.mulf %317, %317 : vector<16x32xf32>
    %cst_97 = arith.constant dense<0.000000e+00> : vector<16xf32>
    %319 = vector.multi_reduction <add>, %318, %cst_97 [1] : vector<16x32xf32> to vector<16xf32>
    %320 = vector.shape_cast %319 : vector<16xf32> to vector<16x1xf32>
    %cst_98 = arith.constant 3.200000e+01 : f32
    %321 = vector.broadcast %cst_98 : f32 to vector<16x1xf32>
    %322 = arith.divf %320, %321 : vector<16x1xf32>
    %323 = vector.broadcast %315 : vector<16x1xf32> to vector<16x32xf32>
    %324 = arith.subf %311, %323 : vector<16x32xf32>
    %cst_99 = arith.constant 9.99999997E-7 : f32
    %325 = vector.broadcast %cst_99 : f32 to vector<16x1xf32>
    %326 = arith.addf %322, %325 : vector<16x1xf32>
    %327 = math.rsqrt %326 : vector<16x1xf32>
    %328 = vector.broadcast %327 : vector<16x1xf32> to vector<16x32xf32>
    %329 = arith.mulf %324, %328 : vector<16x32xf32>
    %330 = vector.broadcast %309 : vector<1x32xf32> to vector<16x32xf32>
    %331 = arith.mulf %329, %330 : vector<16x32xf32>
    %332 = vector.broadcast %310 : vector<1x32xf32> to vector<16x32xf32>
    %333 = arith.addf %331, %332 : vector<16x32xf32>
    %334 = arith.truncf %333 : vector<16x32xf32> to vector<16x32xbf16>
    %c256 = arith.constant 256 : index
    %c0_100 = arith.constant 0 : index
    %335 = vector.load %arg5[%c256, %c0_100] : memref<544x128xbf16, #tpu.memory_space<vmem>>, vector<32x96xbf16>
    %cst_101 = arith.constant dense<0.000000e+00> : vector<16x96xf32>
    %336 = tpu.matmul %334, %335, %cst_101 {dimension_numbers = #tpu.dot_dimension_numbers<[1], [0], [0], [1], [0, 0, 1, 1], [], []>} : vector<16x32xbf16>, vector<32x96xbf16>, vector<16x96xf32> -> vector<16x96xf32>
    %c13 = arith.constant 13 : index
    %c0_102 = arith.constant 0 : index
    %337 = vector.load %arg6[%c13, %c0_102] : memref<26x128xf32, #tpu.memory_space<vmem>>, vector<1x96xf32>
    %338 = vector.broadcast %337 : vector<1x96xf32> to vector<16x96xf32>
    %339 = arith.addf %336, %338 : vector<16x96xf32>
    %340 = vector.extract_strided_slice %339 {offsets = [0, 0], sizes = [16, 32], strides = [1, 1]} : vector<16x96xf32> to vector<16x32xf32>
    %341 = vector.extract_strided_slice %339 {offsets = [0, 32], sizes = [16, 32], strides = [1, 1]} : vector<16x96xf32> to vector<16x32xf32>
    %342 = vector.extract_strided_slice %339 {offsets = [0, 64], sizes = [16, 32], strides = [1, 1]} : vector<16x96xf32> to vector<16x32xf32>
    %c288 = arith.constant 288 : index
    %c0_103 = arith.constant 0 : index
    %343 = vector.load %arg5[%c288, %c0_103] : memref<544x128xbf16, #tpu.memory_space<vmem>>, vector<32x32xbf16>
    %c14 = arith.constant 14 : index
    %c0_104 = arith.constant 0 : index
    %344 = vector.load %arg6[%c14, %c0_104] : memref<26x128xf32, #tpu.memory_space<vmem>>, vector<1x32xf32>
    %345 = arith.truncf %340 : vector<16x32xf32> to vector<16x32xbf16>
    %346 = arith.truncf %341 : vector<16x32xf32> to vector<16x32xbf16>
    %347 = arith.truncf %342 : vector<16x32xf32> to vector<16x32xbf16>
    %348 = vector.extract_strided_slice %345 {offsets = [0, 0], sizes = [16, 8], strides = [1, 1]} : vector<16x32xbf16> to vector<16x8xbf16>
    %349 = vector.extract_strided_slice %346 {offsets = [0, 0], sizes = [16, 8], strides = [1, 1]} : vector<16x32xbf16> to vector<16x8xbf16>
    %cst_105 = arith.constant dense<0.000000e+00> : vector<16x16xf32>
    %350 = tpu.matmul %348, %349, %cst_105 {dimension_numbers = #tpu.dot_dimension_numbers<[1], [1], [0], [0], [0, 0, 1, 0], [], []>} : vector<16x8xbf16>, vector<16x8xbf16>, vector<16x16xf32> -> vector<16x16xf32>
    %351 = arith.addf %350, %34 : vector<16x16xf32>
    %cst_106 = arith.constant dense<0xFF800000> : vector<16xf32>
    %352 = vector.multi_reduction <maximumf>, %351, %cst_106 [1] : vector<16x16xf32> to vector<16xf32>
    %353 = vector.shape_cast %352 : vector<16xf32> to vector<16x1xf32>
    %354 = vector.broadcast %353 : vector<16x1xf32> to vector<16x16xf32>
    %355 = arith.subf %351, %354 : vector<16x16xf32>
    %356 = math.exp %355 : vector<16x16xf32>
    %cst_107 = arith.constant dense<0.000000e+00> : vector<16xf32>
    %357 = vector.multi_reduction <add>, %356, %cst_107 [1] : vector<16x16xf32> to vector<16xf32>
    %358 = vector.shape_cast %357 : vector<16xf32> to vector<16x1xf32>
    %359 = tpu.reciprocal %358 {approx = true} : vector<16x1xf32> -> vector<16x1xf32>
    %360 = vector.broadcast %359 : vector<16x1xf32> to vector<16x16xf32>
    %361 = arith.mulf %356, %360 : vector<16x16xf32>
    %362 = arith.truncf %361 : vector<16x16xf32> to vector<16x16xbf16>
    %363 = vector.extract_strided_slice %347 {offsets = [0, 0], sizes = [16, 8], strides = [1, 1]} : vector<16x32xbf16> to vector<16x8xbf16>
    %cst_108 = arith.constant dense<0.000000e+00> : vector<16x8xf32>
    %364 = tpu.matmul %362, %363, %cst_108 {dimension_numbers = #tpu.dot_dimension_numbers<[1], [0], [0], [1], [0, 0, 1, 1], [], []>} : vector<16x16xbf16>, vector<16x8xbf16>, vector<16x8xf32> -> vector<16x8xf32>
    %365 = vector.extract_strided_slice %345 {offsets = [0, 8], sizes = [16, 8], strides = [1, 1]} : vector<16x32xbf16> to vector<16x8xbf16>
    %366 = vector.extract_strided_slice %346 {offsets = [0, 8], sizes = [16, 8], strides = [1, 1]} : vector<16x32xbf16> to vector<16x8xbf16>
    %cst_109 = arith.constant dense<0.000000e+00> : vector<16x16xf32>
    %367 = tpu.matmul %365, %366, %cst_109 {dimension_numbers = #tpu.dot_dimension_numbers<[1], [1], [0], [0], [0, 0, 1, 0], [], []>} : vector<16x8xbf16>, vector<16x8xbf16>, vector<16x16xf32> -> vector<16x16xf32>
    %368 = arith.addf %367, %34 : vector<16x16xf32>
    %cst_110 = arith.constant dense<0xFF800000> : vector<16xf32>
    %369 = vector.multi_reduction <maximumf>, %368, %cst_110 [1] : vector<16x16xf32> to vector<16xf32>
    %370 = vector.shape_cast %369 : vector<16xf32> to vector<16x1xf32>
    %371 = vector.broadcast %370 : vector<16x1xf32> to vector<16x16xf32>
    %372 = arith.subf %368, %371 : vector<16x16xf32>
    %373 = math.exp %372 : vector<16x16xf32>
    %cst_111 = arith.constant dense<0.000000e+00> : vector<16xf32>
    %374 = vector.multi_reduction <add>, %373, %cst_111 [1] : vector<16x16xf32> to vector<16xf32>
    %375 = vector.shape_cast %374 : vector<16xf32> to vector<16x1xf32>
    %376 = tpu.reciprocal %375 {approx = true} : vector<16x1xf32> -> vector<16x1xf32>
    %377 = vector.broadcast %376 : vector<16x1xf32> to vector<16x16xf32>
    %378 = arith.mulf %373, %377 : vector<16x16xf32>
    %379 = arith.truncf %378 : vector<16x16xf32> to vector<16x16xbf16>
    %380 = vector.extract_strided_slice %347 {offsets = [0, 8], sizes = [16, 8], strides = [1, 1]} : vector<16x32xbf16> to vector<16x8xbf16>
    %cst_112 = arith.constant dense<0.000000e+00> : vector<16x8xf32>
    %381 = tpu.matmul %379, %380, %cst_112 {dimension_numbers = #tpu.dot_dimension_numbers<[1], [0], [0], [1], [0, 0, 1, 1], [], []>} : vector<16x16xbf16>, vector<16x8xbf16>, vector<16x8xf32> -> vector<16x8xf32>
    %382 = vector.extract_strided_slice %345 {offsets = [0, 16], sizes = [16, 8], strides = [1, 1]} : vector<16x32xbf16> to vector<16x8xbf16>
    %383 = vector.extract_strided_slice %346 {offsets = [0, 16], sizes = [16, 8], strides = [1, 1]} : vector<16x32xbf16> to vector<16x8xbf16>
    %cst_113 = arith.constant dense<0.000000e+00> : vector<16x16xf32>
    %384 = tpu.matmul %382, %383, %cst_113 {dimension_numbers = #tpu.dot_dimension_numbers<[1], [1], [0], [0], [0, 0, 1, 0], [], []>} : vector<16x8xbf16>, vector<16x8xbf16>, vector<16x16xf32> -> vector<16x16xf32>
    %385 = arith.addf %384, %34 : vector<16x16xf32>
    %cst_114 = arith.constant dense<0xFF800000> : vector<16xf32>
    %386 = vector.multi_reduction <maximumf>, %385, %cst_114 [1] : vector<16x16xf32> to vector<16xf32>
    %387 = vector.shape_cast %386 : vector<16xf32> to vector<16x1xf32>
    %388 = vector.broadcast %387 : vector<16x1xf32> to vector<16x16xf32>
    %389 = arith.subf %385, %388 : vector<16x16xf32>
    %390 = math.exp %389 : vector<16x16xf32>
    %cst_115 = arith.constant dense<0.000000e+00> : vector<16xf32>
    %391 = vector.multi_reduction <add>, %390, %cst_115 [1] : vector<16x16xf32> to vector<16xf32>
    %392 = vector.shape_cast %391 : vector<16xf32> to vector<16x1xf32>
    %393 = tpu.reciprocal %392 {approx = true} : vector<16x1xf32> -> vector<16x1xf32>
    %394 = vector.broadcast %393 : vector<16x1xf32> to vector<16x16xf32>
    %395 = arith.mulf %390, %394 : vector<16x16xf32>
    %396 = arith.truncf %395 : vector<16x16xf32> to vector<16x16xbf16>
    %397 = vector.extract_strided_slice %347 {offsets = [0, 16], sizes = [16, 8], strides = [1, 1]} : vector<16x32xbf16> to vector<16x8xbf16>
    %cst_116 = arith.constant dense<0.000000e+00> : vector<16x8xf32>
    %398 = tpu.matmul %396, %397, %cst_116 {dimension_numbers = #tpu.dot_dimension_numbers<[1], [0], [0], [1], [0, 0, 1, 1], [], []>} : vector<16x16xbf16>, vector<16x8xbf16>, vector<16x8xf32> -> vector<16x8xf32>
    %399 = vector.extract_strided_slice %345 {offsets = [0, 24], sizes = [16, 8], strides = [1, 1]} : vector<16x32xbf16> to vector<16x8xbf16>
    %400 = vector.extract_strided_slice %346 {offsets = [0, 24], sizes = [16, 8], strides = [1, 1]} : vector<16x32xbf16> to vector<16x8xbf16>
    %cst_117 = arith.constant dense<0.000000e+00> : vector<16x16xf32>
    %401 = tpu.matmul %399, %400, %cst_117 {dimension_numbers = #tpu.dot_dimension_numbers<[1], [1], [0], [0], [0, 0, 1, 0], [], []>} : vector<16x8xbf16>, vector<16x8xbf16>, vector<16x16xf32> -> vector<16x16xf32>
    %402 = arith.addf %401, %34 : vector<16x16xf32>
    %cst_118 = arith.constant dense<0xFF800000> : vector<16xf32>
    %403 = vector.multi_reduction <maximumf>, %402, %cst_118 [1] : vector<16x16xf32> to vector<16xf32>
    %404 = vector.shape_cast %403 : vector<16xf32> to vector<16x1xf32>
    %405 = vector.broadcast %404 : vector<16x1xf32> to vector<16x16xf32>
    %406 = arith.subf %402, %405 : vector<16x16xf32>
    %407 = math.exp %406 : vector<16x16xf32>
    %cst_119 = arith.constant dense<0.000000e+00> : vector<16xf32>
    %408 = vector.multi_reduction <add>, %407, %cst_119 [1] : vector<16x16xf32> to vector<16xf32>
    %409 = vector.shape_cast %408 : vector<16xf32> to vector<16x1xf32>
    %410 = tpu.reciprocal %409 {approx = true} : vector<16x1xf32> -> vector<16x1xf32>
    %411 = vector.broadcast %410 : vector<16x1xf32> to vector<16x16xf32>
    %412 = arith.mulf %407, %411 : vector<16x16xf32>
    %413 = arith.truncf %412 : vector<16x16xf32> to vector<16x16xbf16>
    %414 = vector.extract_strided_slice %347 {offsets = [0, 24], sizes = [16, 8], strides = [1, 1]} : vector<16x32xbf16> to vector<16x8xbf16>
    %cst_120 = arith.constant dense<0.000000e+00> : vector<16x8xf32>
    %415 = tpu.matmul %413, %414, %cst_120 {dimension_numbers = #tpu.dot_dimension_numbers<[1], [0], [0], [1], [0, 0, 1, 1], [], []>} : vector<16x16xbf16>, vector<16x8xbf16>, vector<16x8xf32> -> vector<16x8xf32>
    %416 = tpu.concatenate %364, %381, %398, %415 in 1 : vector<16x8xf32>, vector<16x8xf32>, vector<16x8xf32>, vector<16x8xf32> -> vector<16x32xf32>
    %417 = arith.truncf %416 : vector<16x32xf32> to vector<16x32xbf16>
    %cst_121 = arith.constant dense<0.000000e+00> : vector<16x32xf32>
    %418 = tpu.matmul %417, %343, %cst_121 {dimension_numbers = #tpu.dot_dimension_numbers<[1], [0], [0], [1], [0, 0, 1, 1], [], []>} : vector<16x32xbf16>, vector<32x32xbf16>, vector<16x32xf32> -> vector<16x32xf32>
    %419 = vector.broadcast %344 : vector<1x32xf32> to vector<16x32xf32>
    %420 = arith.addf %418, %419 : vector<16x32xf32>
    %c15 = arith.constant 15 : index
    %c0_122 = arith.constant 0 : index
    %421 = vector.load %arg6[%c15, %c0_122] : memref<26x128xf32, #tpu.memory_space<vmem>>, vector<1x32xf32>
    %c16 = arith.constant 16 : index
    %c0_123 = arith.constant 0 : index
    %422 = vector.load %arg6[%c16, %c0_123] : memref<26x128xf32, #tpu.memory_space<vmem>>, vector<1x32xf32>
    %423 = arith.addf %333, %420 : vector<16x32xf32>
    %cst_124 = arith.constant dense<0.000000e+00> : vector<16xf32>
    %424 = vector.multi_reduction <add>, %423, %cst_124 [1] : vector<16x32xf32> to vector<16xf32>
    %425 = vector.shape_cast %424 : vector<16xf32> to vector<16x1xf32>
    %cst_125 = arith.constant 3.200000e+01 : f32
    %426 = vector.broadcast %cst_125 : f32 to vector<16x1xf32>
    %427 = arith.divf %425, %426 : vector<16x1xf32>
    %428 = vector.broadcast %427 : vector<16x1xf32> to vector<16x32xf32>
    %429 = arith.subf %423, %428 : vector<16x32xf32>
    %430 = arith.mulf %429, %429 : vector<16x32xf32>
    %cst_126 = arith.constant dense<0.000000e+00> : vector<16xf32>
    %431 = vector.multi_reduction <add>, %430, %cst_126 [1] : vector<16x32xf32> to vector<16xf32>
    %432 = vector.shape_cast %431 : vector<16xf32> to vector<16x1xf32>
    %cst_127 = arith.constant 3.200000e+01 : f32
    %433 = vector.broadcast %cst_127 : f32 to vector<16x1xf32>
    %434 = arith.divf %432, %433 : vector<16x1xf32>
    %435 = vector.broadcast %427 : vector<16x1xf32> to vector<16x32xf32>
    %436 = arith.subf %423, %435 : vector<16x32xf32>
    %cst_128 = arith.constant 9.99999997E-7 : f32
    %437 = vector.broadcast %cst_128 : f32 to vector<16x1xf32>
    %438 = arith.addf %434, %437 : vector<16x1xf32>
    %439 = math.rsqrt %438 : vector<16x1xf32>
    %440 = vector.broadcast %439 : vector<16x1xf32> to vector<16x32xf32>
    %441 = arith.mulf %436, %440 : vector<16x32xf32>
    %442 = vector.broadcast %421 : vector<1x32xf32> to vector<16x32xf32>
    %443 = arith.mulf %441, %442 : vector<16x32xf32>
    %444 = vector.broadcast %422 : vector<1x32xf32> to vector<16x32xf32>
    %445 = arith.addf %443, %444 : vector<16x32xf32>
    %446 = arith.truncf %445 : vector<16x32xf32> to vector<16x32xbf16>
    %c320 = arith.constant 320 : index
    %c0_129 = arith.constant 0 : index
    %447 = vector.load %arg5[%c320, %c0_129] : memref<544x128xbf16, #tpu.memory_space<vmem>>, vector<32x32xbf16>
    %cst_130 = arith.constant dense<0.000000e+00> : vector<16x32xf32>
    %448 = tpu.matmul %446, %447, %cst_130 {dimension_numbers = #tpu.dot_dimension_numbers<[1], [0], [0], [1], [0, 0, 1, 1], [], []>} : vector<16x32xbf16>, vector<32x32xbf16>, vector<16x32xf32> -> vector<16x32xf32>
    %c17 = arith.constant 17 : index
    %c0_131 = arith.constant 0 : index
    %449 = vector.load %arg6[%c17, %c0_131] : memref<26x128xf32, #tpu.memory_space<vmem>>, vector<1x32xf32>
    %450 = vector.broadcast %449 : vector<1x32xf32> to vector<16x32xf32>
    %451 = arith.addf %448, %450 : vector<16x32xf32>
    %452 = arith.truncf %1 : vector<16x32xf32> to vector<16x32xbf16>
    %c352 = arith.constant 352 : index
    %c0_132 = arith.constant 0 : index
    %453 = vector.load %arg5[%c352, %c0_132] : memref<544x128xbf16, #tpu.memory_space<vmem>>, vector<32x64xbf16>
    %cst_133 = arith.constant dense<0.000000e+00> : vector<16x64xf32>
    %454 = tpu.matmul %452, %453, %cst_133 {dimension_numbers = #tpu.dot_dimension_numbers<[1], [0], [0], [1], [0, 0, 1, 1], [], []>} : vector<16x32xbf16>, vector<32x64xbf16>, vector<16x64xf32> -> vector<16x64xf32>
    %c18 = arith.constant 18 : index
    %c0_134 = arith.constant 0 : index
    %455 = vector.load %arg6[%c18, %c0_134] : memref<26x128xf32, #tpu.memory_space<vmem>>, vector<1x64xf32>
    %456 = vector.broadcast %455 : vector<1x64xf32> to vector<16x64xf32>
    %457 = arith.addf %454, %456 : vector<16x64xf32>
    %458 = vector.extract_strided_slice %457 {offsets = [0, 0], sizes = [16, 32], strides = [1, 1]} : vector<16x64xf32> to vector<16x32xf32>
    %459 = vector.extract_strided_slice %457 {offsets = [0, 32], sizes = [16, 32], strides = [1, 1]} : vector<16x64xf32> to vector<16x32xf32>
    %c384 = arith.constant 384 : index
    %c0_135 = arith.constant 0 : index
    %460 = vector.load %arg5[%c384, %c0_135] : memref<544x128xbf16, #tpu.memory_space<vmem>>, vector<32x32xbf16>
    %c19 = arith.constant 19 : index
    %c0_136 = arith.constant 0 : index
    %461 = vector.load %arg6[%c19, %c0_136] : memref<26x128xf32, #tpu.memory_space<vmem>>, vector<1x32xf32>
    %462 = arith.truncf %451 : vector<16x32xf32> to vector<16x32xbf16>
    %463 = arith.truncf %458 : vector<16x32xf32> to vector<16x32xbf16>
    %464 = arith.truncf %459 : vector<16x32xf32> to vector<16x32xbf16>
    %465 = vector.extract_strided_slice %462 {offsets = [0, 0], sizes = [16, 8], strides = [1, 1]} : vector<16x32xbf16> to vector<16x8xbf16>
    %466 = vector.extract_strided_slice %463 {offsets = [0, 0], sizes = [16, 8], strides = [1, 1]} : vector<16x32xbf16> to vector<16x8xbf16>
    %cst_137 = arith.constant dense<0.000000e+00> : vector<16x16xf32>
    %467 = tpu.matmul %465, %466, %cst_137 {dimension_numbers = #tpu.dot_dimension_numbers<[1], [1], [0], [0], [0, 0, 1, 0], [], []>} : vector<16x8xbf16>, vector<16x8xbf16>, vector<16x16xf32> -> vector<16x16xf32>
    %468 = arith.addf %467, %65 : vector<16x16xf32>
    %cst_138 = arith.constant dense<0xFF800000> : vector<16xf32>
    %469 = vector.multi_reduction <maximumf>, %468, %cst_138 [1] : vector<16x16xf32> to vector<16xf32>
    %470 = vector.shape_cast %469 : vector<16xf32> to vector<16x1xf32>
    %471 = vector.broadcast %470 : vector<16x1xf32> to vector<16x16xf32>
    %472 = arith.subf %468, %471 : vector<16x16xf32>
    %473 = math.exp %472 : vector<16x16xf32>
    %cst_139 = arith.constant dense<0.000000e+00> : vector<16xf32>
    %474 = vector.multi_reduction <add>, %473, %cst_139 [1] : vector<16x16xf32> to vector<16xf32>
    %475 = vector.shape_cast %474 : vector<16xf32> to vector<16x1xf32>
    %476 = tpu.reciprocal %475 {approx = true} : vector<16x1xf32> -> vector<16x1xf32>
    %477 = vector.broadcast %476 : vector<16x1xf32> to vector<16x16xf32>
    %478 = arith.mulf %473, %477 : vector<16x16xf32>
    %479 = arith.truncf %478 : vector<16x16xf32> to vector<16x16xbf16>
    %480 = vector.extract_strided_slice %464 {offsets = [0, 0], sizes = [16, 8], strides = [1, 1]} : vector<16x32xbf16> to vector<16x8xbf16>
    %cst_140 = arith.constant dense<0.000000e+00> : vector<16x8xf32>
    %481 = tpu.matmul %479, %480, %cst_140 {dimension_numbers = #tpu.dot_dimension_numbers<[1], [0], [0], [1], [0, 0, 1, 1], [], []>} : vector<16x16xbf16>, vector<16x8xbf16>, vector<16x8xf32> -> vector<16x8xf32>
    %482 = vector.extract_strided_slice %462 {offsets = [0, 8], sizes = [16, 8], strides = [1, 1]} : vector<16x32xbf16> to vector<16x8xbf16>
    %483 = vector.extract_strided_slice %463 {offsets = [0, 8], sizes = [16, 8], strides = [1, 1]} : vector<16x32xbf16> to vector<16x8xbf16>
    %cst_141 = arith.constant dense<0.000000e+00> : vector<16x16xf32>
    %484 = tpu.matmul %482, %483, %cst_141 {dimension_numbers = #tpu.dot_dimension_numbers<[1], [1], [0], [0], [0, 0, 1, 0], [], []>} : vector<16x8xbf16>, vector<16x8xbf16>, vector<16x16xf32> -> vector<16x16xf32>
    %485 = arith.addf %484, %65 : vector<16x16xf32>
    %cst_142 = arith.constant dense<0xFF800000> : vector<16xf32>
    %486 = vector.multi_reduction <maximumf>, %485, %cst_142 [1] : vector<16x16xf32> to vector<16xf32>
    %487 = vector.shape_cast %486 : vector<16xf32> to vector<16x1xf32>
    %488 = vector.broadcast %487 : vector<16x1xf32> to vector<16x16xf32>
    %489 = arith.subf %485, %488 : vector<16x16xf32>
    %490 = math.exp %489 : vector<16x16xf32>
    %cst_143 = arith.constant dense<0.000000e+00> : vector<16xf32>
    %491 = vector.multi_reduction <add>, %490, %cst_143 [1] : vector<16x16xf32> to vector<16xf32>
    %492 = vector.shape_cast %491 : vector<16xf32> to vector<16x1xf32>
    %493 = tpu.reciprocal %492 {approx = true} : vector<16x1xf32> -> vector<16x1xf32>
    %494 = vector.broadcast %493 : vector<16x1xf32> to vector<16x16xf32>
    %495 = arith.mulf %490, %494 : vector<16x16xf32>
    %496 = arith.truncf %495 : vector<16x16xf32> to vector<16x16xbf16>
    %497 = vector.extract_strided_slice %464 {offsets = [0, 8], sizes = [16, 8], strides = [1, 1]} : vector<16x32xbf16> to vector<16x8xbf16>
    %cst_144 = arith.constant dense<0.000000e+00> : vector<16x8xf32>
    %498 = tpu.matmul %496, %497, %cst_144 {dimension_numbers = #tpu.dot_dimension_numbers<[1], [0], [0], [1], [0, 0, 1, 1], [], []>} : vector<16x16xbf16>, vector<16x8xbf16>, vector<16x8xf32> -> vector<16x8xf32>
    %499 = vector.extract_strided_slice %462 {offsets = [0, 16], sizes = [16, 8], strides = [1, 1]} : vector<16x32xbf16> to vector<16x8xbf16>
    %500 = vector.extract_strided_slice %463 {offsets = [0, 16], sizes = [16, 8], strides = [1, 1]} : vector<16x32xbf16> to vector<16x8xbf16>
    %cst_145 = arith.constant dense<0.000000e+00> : vector<16x16xf32>
    %501 = tpu.matmul %499, %500, %cst_145 {dimension_numbers = #tpu.dot_dimension_numbers<[1], [1], [0], [0], [0, 0, 1, 0], [], []>} : vector<16x8xbf16>, vector<16x8xbf16>, vector<16x16xf32> -> vector<16x16xf32>
    %502 = arith.addf %501, %65 : vector<16x16xf32>
    %cst_146 = arith.constant dense<0xFF800000> : vector<16xf32>
    %503 = vector.multi_reduction <maximumf>, %502, %cst_146 [1] : vector<16x16xf32> to vector<16xf32>
    %504 = vector.shape_cast %503 : vector<16xf32> to vector<16x1xf32>
    %505 = vector.broadcast %504 : vector<16x1xf32> to vector<16x16xf32>
    %506 = arith.subf %502, %505 : vector<16x16xf32>
    %507 = math.exp %506 : vector<16x16xf32>
    %cst_147 = arith.constant dense<0.000000e+00> : vector<16xf32>
    %508 = vector.multi_reduction <add>, %507, %cst_147 [1] : vector<16x16xf32> to vector<16xf32>
    %509 = vector.shape_cast %508 : vector<16xf32> to vector<16x1xf32>
    %510 = tpu.reciprocal %509 {approx = true} : vector<16x1xf32> -> vector<16x1xf32>
    %511 = vector.broadcast %510 : vector<16x1xf32> to vector<16x16xf32>
    %512 = arith.mulf %507, %511 : vector<16x16xf32>
    %513 = arith.truncf %512 : vector<16x16xf32> to vector<16x16xbf16>
    %514 = vector.extract_strided_slice %464 {offsets = [0, 16], sizes = [16, 8], strides = [1, 1]} : vector<16x32xbf16> to vector<16x8xbf16>
    %cst_148 = arith.constant dense<0.000000e+00> : vector<16x8xf32>
    %515 = tpu.matmul %513, %514, %cst_148 {dimension_numbers = #tpu.dot_dimension_numbers<[1], [0], [0], [1], [0, 0, 1, 1], [], []>} : vector<16x16xbf16>, vector<16x8xbf16>, vector<16x8xf32> -> vector<16x8xf32>
    %516 = vector.extract_strided_slice %462 {offsets = [0, 24], sizes = [16, 8], strides = [1, 1]} : vector<16x32xbf16> to vector<16x8xbf16>
    %517 = vector.extract_strided_slice %463 {offsets = [0, 24], sizes = [16, 8], strides = [1, 1]} : vector<16x32xbf16> to vector<16x8xbf16>
    %cst_149 = arith.constant dense<0.000000e+00> : vector<16x16xf32>
    %518 = tpu.matmul %516, %517, %cst_149 {dimension_numbers = #tpu.dot_dimension_numbers<[1], [1], [0], [0], [0, 0, 1, 0], [], []>} : vector<16x8xbf16>, vector<16x8xbf16>, vector<16x16xf32> -> vector<16x16xf32>
    %519 = arith.addf %518, %65 : vector<16x16xf32>
    %cst_150 = arith.constant dense<0xFF800000> : vector<16xf32>
    %520 = vector.multi_reduction <maximumf>, %519, %cst_150 [1] : vector<16x16xf32> to vector<16xf32>
    %521 = vector.shape_cast %520 : vector<16xf32> to vector<16x1xf32>
    %522 = vector.broadcast %521 : vector<16x1xf32> to vector<16x16xf32>
    %523 = arith.subf %519, %522 : vector<16x16xf32>
    %524 = math.exp %523 : vector<16x16xf32>
    %cst_151 = arith.constant dense<0.000000e+00> : vector<16xf32>
    %525 = vector.multi_reduction <add>, %524, %cst_151 [1] : vector<16x16xf32> to vector<16xf32>
    %526 = vector.shape_cast %525 : vector<16xf32> to vector<16x1xf32>
    %527 = tpu.reciprocal %526 {approx = true} : vector<16x1xf32> -> vector<16x1xf32>
    %528 = vector.broadcast %527 : vector<16x1xf32> to vector<16x16xf32>
    %529 = arith.mulf %524, %528 : vector<16x16xf32>
    %530 = arith.truncf %529 : vector<16x16xf32> to vector<16x16xbf16>
    %531 = vector.extract_strided_slice %464 {offsets = [0, 24], sizes = [16, 8], strides = [1, 1]} : vector<16x32xbf16> to vector<16x8xbf16>
    %cst_152 = arith.constant dense<0.000000e+00> : vector<16x8xf32>
    %532 = tpu.matmul %530, %531, %cst_152 {dimension_numbers = #tpu.dot_dimension_numbers<[1], [0], [0], [1], [0, 0, 1, 1], [], []>} : vector<16x16xbf16>, vector<16x8xbf16>, vector<16x8xf32> -> vector<16x8xf32>
    %533 = tpu.concatenate %481, %498, %515, %532 in 1 : vector<16x8xf32>, vector<16x8xf32>, vector<16x8xf32>, vector<16x8xf32> -> vector<16x32xf32>
    %534 = arith.truncf %533 : vector<16x32xf32> to vector<16x32xbf16>
    %cst_153 = arith.constant dense<0.000000e+00> : vector<16x32xf32>
    %535 = tpu.matmul %534, %460, %cst_153 {dimension_numbers = #tpu.dot_dimension_numbers<[1], [0], [0], [1], [0, 0, 1, 1], [], []>} : vector<16x32xbf16>, vector<32x32xbf16>, vector<16x32xf32> -> vector<16x32xf32>
    %536 = vector.broadcast %461 : vector<1x32xf32> to vector<16x32xf32>
    %537 = arith.addf %535, %536 : vector<16x32xf32>
    %c20 = arith.constant 20 : index
    %c0_154 = arith.constant 0 : index
    %538 = vector.load %arg6[%c20, %c0_154] : memref<26x128xf32, #tpu.memory_space<vmem>>, vector<1x32xf32>
    %c21 = arith.constant 21 : index
    %c0_155 = arith.constant 0 : index
    %539 = vector.load %arg6[%c21, %c0_155] : memref<26x128xf32, #tpu.memory_space<vmem>>, vector<1x32xf32>
    %540 = arith.addf %445, %537 : vector<16x32xf32>
    %cst_156 = arith.constant dense<0.000000e+00> : vector<16xf32>
    %541 = vector.multi_reduction <add>, %540, %cst_156 [1] : vector<16x32xf32> to vector<16xf32>
    %542 = vector.shape_cast %541 : vector<16xf32> to vector<16x1xf32>
    %cst_157 = arith.constant 3.200000e+01 : f32
    %543 = vector.broadcast %cst_157 : f32 to vector<16x1xf32>
    %544 = arith.divf %542, %543 : vector<16x1xf32>
    %545 = vector.broadcast %544 : vector<16x1xf32> to vector<16x32xf32>
    %546 = arith.subf %540, %545 : vector<16x32xf32>
    %547 = arith.mulf %546, %546 : vector<16x32xf32>
    %cst_158 = arith.constant dense<0.000000e+00> : vector<16xf32>
    %548 = vector.multi_reduction <add>, %547, %cst_158 [1] : vector<16x32xf32> to vector<16xf32>
    %549 = vector.shape_cast %548 : vector<16xf32> to vector<16x1xf32>
    %cst_159 = arith.constant 3.200000e+01 : f32
    %550 = vector.broadcast %cst_159 : f32 to vector<16x1xf32>
    %551 = arith.divf %549, %550 : vector<16x1xf32>
    %552 = vector.broadcast %544 : vector<16x1xf32> to vector<16x32xf32>
    %553 = arith.subf %540, %552 : vector<16x32xf32>
    %cst_160 = arith.constant 9.99999997E-7 : f32
    %554 = vector.broadcast %cst_160 : f32 to vector<16x1xf32>
    %555 = arith.addf %551, %554 : vector<16x1xf32>
    %556 = math.rsqrt %555 : vector<16x1xf32>
    %557 = vector.broadcast %556 : vector<16x1xf32> to vector<16x32xf32>
    %558 = arith.mulf %553, %557 : vector<16x32xf32>
    %559 = vector.broadcast %538 : vector<1x32xf32> to vector<16x32xf32>
    %560 = arith.mulf %558, %559 : vector<16x32xf32>
    %561 = vector.broadcast %539 : vector<1x32xf32> to vector<16x32xf32>
    %562 = arith.addf %560, %561 : vector<16x32xf32>
    %c416 = arith.constant 416 : index
    %c0_161 = arith.constant 0 : index
    %563 = vector.load %arg5[%c416, %c0_161] : memref<544x128xbf16, #tpu.memory_space<vmem>>, vector<32x64xbf16>
    %c22 = arith.constant 22 : index
    %c0_162 = arith.constant 0 : index
    %564 = vector.load %arg6[%c22, %c0_162] : memref<26x128xf32, #tpu.memory_space<vmem>>, vector<1x64xf32>
    %c448 = arith.constant 448 : index
    %c0_163 = arith.constant 0 : index
    %565 = vector.load %arg5[%c448, %c0_163] : memref<544x128xbf16, #tpu.memory_space<vmem>>, vector<64x32xbf16>
    %c23 = arith.constant 23 : index
    %c0_164 = arith.constant 0 : index
    %566 = vector.load %arg6[%c23, %c0_164] : memref<26x128xf32, #tpu.memory_space<vmem>>, vector<1x32xf32>
    %567 = arith.truncf %562 : vector<16x32xf32> to vector<16x32xbf16>
    %cst_165 = arith.constant dense<0.000000e+00> : vector<16x64xf32>
    %568 = tpu.matmul %567, %563, %cst_165 {dimension_numbers = #tpu.dot_dimension_numbers<[1], [0], [0], [1], [0, 0, 1, 1], [], []>} : vector<16x32xbf16>, vector<32x64xbf16>, vector<16x64xf32> -> vector<16x64xf32>
    %569 = vector.broadcast %564 : vector<1x64xf32> to vector<16x64xf32>
    %570 = arith.addf %568, %569 : vector<16x64xf32>
    %cst_166 = arith.constant 0.000000e+00 : f32
    %571 = vector.broadcast %cst_166 : f32 to vector<16x64xf32>
    %572 = arith.maximumf %570, %571 : vector<16x64xf32>
    %573 = arith.truncf %572 : vector<16x64xf32> to vector<16x64xbf16>
    %cst_167 = arith.constant dense<0.000000e+00> : vector<16x32xf32>
    %574 = tpu.matmul %573, %565, %cst_167 {dimension_numbers = #tpu.dot_dimension_numbers<[1], [0], [0], [1], [0, 0, 1, 1], [], []>} : vector<16x64xbf16>, vector<64x32xbf16>, vector<16x32xf32> -> vector<16x32xf32>
    %575 = vector.broadcast %566 : vector<1x32xf32> to vector<16x32xf32>
    %576 = arith.addf %574, %575 : vector<16x32xf32>
    %c24 = arith.constant 24 : index
    %c0_168 = arith.constant 0 : index
    %577 = vector.load %arg6[%c24, %c0_168] : memref<26x128xf32, #tpu.memory_space<vmem>>, vector<1x32xf32>
    %c25 = arith.constant 25 : index
    %c0_169 = arith.constant 0 : index
    %578 = vector.load %arg6[%c25, %c0_169] : memref<26x128xf32, #tpu.memory_space<vmem>>, vector<1x32xf32>
    %579 = arith.addf %562, %576 : vector<16x32xf32>
    %cst_170 = arith.constant dense<0.000000e+00> : vector<16xf32>
    %580 = vector.multi_reduction <add>, %579, %cst_170 [1] : vector<16x32xf32> to vector<16xf32>
    %581 = vector.shape_cast %580 : vector<16xf32> to vector<16x1xf32>
    %cst_171 = arith.constant 3.200000e+01 : f32
    %582 = vector.broadcast %cst_171 : f32 to vector<16x1xf32>
    %583 = arith.divf %581, %582 : vector<16x1xf32>
    %584 = vector.broadcast %583 : vector<16x1xf32> to vector<16x32xf32>
    %585 = arith.subf %579, %584 : vector<16x32xf32>
    %586 = arith.mulf %585, %585 : vector<16x32xf32>
    %cst_172 = arith.constant dense<0.000000e+00> : vector<16xf32>
    %587 = vector.multi_reduction <add>, %586, %cst_172 [1] : vector<16x32xf32> to vector<16xf32>
    %588 = vector.shape_cast %587 : vector<16xf32> to vector<16x1xf32>
    %cst_173 = arith.constant 3.200000e+01 : f32
    %589 = vector.broadcast %cst_173 : f32 to vector<16x1xf32>
    %590 = arith.divf %588, %589 : vector<16x1xf32>
    %591 = vector.broadcast %583 : vector<16x1xf32> to vector<16x32xf32>
    %592 = arith.subf %579, %591 : vector<16x32xf32>
    %cst_174 = arith.constant 9.99999997E-7 : f32
    %593 = vector.broadcast %cst_174 : f32 to vector<16x1xf32>
    %594 = arith.addf %590, %593 : vector<16x1xf32>
    %595 = math.rsqrt %594 : vector<16x1xf32>
    %596 = vector.broadcast %595 : vector<16x1xf32> to vector<16x32xf32>
    %597 = arith.mulf %592, %596 : vector<16x32xf32>
    %598 = vector.broadcast %577 : vector<1x32xf32> to vector<16x32xf32>
    %599 = arith.mulf %597, %598 : vector<16x32xf32>
    %600 = vector.broadcast %578 : vector<1x32xf32> to vector<16x32xf32>
    %601 = arith.addf %599, %600 : vector<16x32xf32>
    %602 = arith.truncf %601 : vector<16x32xf32> to vector<16x32xbf16>
    %c512 = arith.constant 512 : index
    %c0_175 = arith.constant 0 : index
    %603 = vector.load %arg5[%c512, %c0_175] : memref<544x128xbf16, #tpu.memory_space<vmem>>, vector<32x128xbf16>
    %cst_176 = arith.constant dense<0.000000e+00> : vector<16x128xf32>
    %604 = tpu.matmul %602, %603, %cst_176 {dimension_numbers = #tpu.dot_dimension_numbers<[1], [0], [0], [1], [0, 0, 1, 1], [], []>} : vector<16x32xbf16>, vector<32x128xbf16>, vector<16x128xf32> -> vector<16x128xf32>
    %c0_177 = arith.constant 0 : index
    %c0_178 = arith.constant 0 : index
    %605 = vector.load %arg7[%c0_177, %c0_178] : memref<16x128xf32, #tpu.memory_space<vmem>>, vector<16x128xf32>
    tpu.vector_store %arg7[%c0_177, %c0_178], %604 {strides = array<i32>} : memref<16x128xf32, #tpu.memory_space<vmem>>, vector<16x128xf32>,
    return
  }
  func.func @transform_0(%arg0: i32) -> (i32, i32) {
    %c0_i32 = arith.constant 0 : i32
    %c0_i32_0 = arith.constant 0 : i32
    %c0_i32_1 = arith.constant 0 : i32
    return %c0_i32, %c0_i32_0 : i32, i32
  }
  func.func @transform_1(%arg0: i32) -> (i32, i32) {
    %c0_i32 = arith.constant 0 : i32
    %c0_i32_0 = arith.constant 0 : i32
    %c0_i32_1 = arith.constant 0 : i32
    return %c0_i32, %c0_i32_0 : i32, i32
  }
  func.func @transform_2(%arg0: i32) -> (i32, i32) {
    %c0_i32 = arith.constant 0 : i32
    %c0_i32_0 = arith.constant 0 : i32
    %c0_i32_1 = arith.constant 0 : i32
    return %c0_i32, %c0_i32_0 : i32, i32
  }
  func.func @transform_3(%arg0: i32) -> (i32, i32) {
    %c0_i32 = arith.constant 0 : i32
    %c0_i32_0 = arith.constant 0 : i32
    %c0_i32_1 = arith.constant 0 : i32
    return %c0_i32, %c0_i32_0 : i32, i32
  }
  func.func @transform_4(%arg0: i32) -> (i32, i32) {
    %c0_i32 = arith.constant 0 : i32
    %c0_i32_0 = arith.constant 0 : i32
    %c0_i32_1 = arith.constant 0 : i32
    return %c0_i32, %c0_i32_0 : i32, i32
  }
  func.func @transform_5(%arg0: i32) -> (i32, i32) {
    %c0_i32 = arith.constant 0 : i32
    %c0_i32_0 = arith.constant 0 : i32
    %c0_i32_1 = arith.constant 0 : i32
    return %c0_i32, %c0_i32_0 : i32, i32
  }
  func.func @transform_6(%arg0: i32) -> (i32, i32) {
    %c0_i32 = arith.constant 0 : i32
    %c0_i32_0 = arith.constant 0 : i32
    %c0_i32_1 = arith.constant 0 : i32
    return %c0_i32, %c0_i32_0 : i32, i32
  }
}

</mosaic_0001>

<bundles_post_ra>
// kernel: encoder_decoder_forward.2
= control target key start
LH: loop header
LB: loop body
LE: loop exit
PB: predicated region body
PF: predicated region fallthrough
CT: control target
= control target key end

     0   :  { %9 = vsyncpa [#allocation3], 0  ;;  %s2311_s15 = smov [#allocation2]   ;;  %s2705_s0 = inlined_call_operand.vmem [shape: f32[16,32], index: 0, kind: input, shape index: {}]   ;;  %s2706_s1 = inlined_call_operand.vmem [shape: f32[1,16], index: 1, kind: input, shape index: {}]   ;;  %s2707_s2 = inlined_call_operand.hbm [shape: bf16[320,128], index: 2, kind: input, shape index: {}]   ;;  %s2708_s3 = inlined_call_operand.vmem [shape: f32[16,128], index: 3, kind: input, shape index: {}]   ;;  %s2709_s4 = inlined_call_operand.vmem [shape: f32[16,128], index: 4, kind: output, shape index: {}]  }
   0x1   :  { %s19_s16 = sshll.u32 %s2311_s15, 4  ;;  %s20_s16 = int_to_ptr.vmem [resolvable:$true] %s19_s16 }
   0x2   :  { %s2297_s17 = scalar_lea.vmem %s20_s16, 2560  ;;  %p2302_p1 = scmp.lt.s32.totalorder %s20_s16, %s20_s16 }
   0x3   :  { %p2298_p0 = scmp.ne.s32.totalorder %s20_s16, %s2297_s17  ;;  %p2303_p2 = scmp.lt.s32.totalorder %s2297_s17, %s2297_s17 }
   0x5   :  { %p2304_p3 = por %p2303_p2, %p2302_p1 }
   0x7   :  { %p2305_p4 = pnand %p2304_p3, %p2298_p0 }
   0x9   :  { %2308 = shalt.err (!%p2305_p4)
}
   0xa   :  { %s2312_s18 = smov 64   ;;  %s2313_s19 = smov 4  }
   0xb   :  { %25 = dma.hbm_to_vmem [thread:$0]  %s2707_s2, 2560, %s20_s16, [#allocation3], %s2312_s18, %s2312_s18, %s2313_s19  }
   0xc   :  { %2309 = dma.done.wait [#allocation3], 2560  }
   0xd   :  { %2310 = vsyncadd [#allocation3], 4294964736  ;;  %v2314_v0 = vmov 0.0   ;;  %vm2315_vm0 = vmmov 0   ;;  %v2189_v1 = vld [vmem:[#allocation2 + $0x8] sm:$0xff]   ;;  %v2190_v2 = vld [vmem:[#allocation2] sm:$0xff]   ;;  %v37_v25 = vlaneseq }
   0xe   :  { %1972 = vmatprep.subr.bf16.mxu1 %v2314_v0  ;;  %1976 = vmatprep.mubr.msk.bf16.mxu1 %vm2315_vm0, %v2314_v0  ;;  %v2369_v3 = vld [vmem:[%s2705_s0] sm:$0xff]  ;;  %v2374_v4 = vld [vmem:[%s2705_s0 + $0x8] sm:$0xff]  ;;  %vm98_vm1 = vcmask 261120   ;;  %s2316_s0 = smov 120   ;;  %s2317_s27 = smov 96   ;;  %vm152_vm2 = vcmask 64512  }
   0xf   :  { %1986 = vmatprep.subr.bf16.mxu0 %v2314_v0  ;;  %1988 = vmatprep.mubr.msk.bf16.mxu0 %vm2315_vm0, %v2314_v0  ;;  %v76_v5 = vpack.c.bf16 %v2374_v4, %v2369_v3  ;;  %v1852_v7 = vld [vmem:[%s2708_s3] ss:$0 sm:$0xff]  ;;  %s2318_s28 = smov 80   ;;  %s2319_s29 = smov 88   ;;  %v38_v26 = vand.u32 127, %v37_v25  ;;  %vm200_vm7 = vcmask 130048  }
  0x10   :  { %1973 = vmatpush3.bf16.msra.mxu1 %v2189_v1  ;;  %s2320_s30 = smov 72   ;;  %s2321_s5 = smov 112   ;;  %v2323_v27 = vmov -1e+09   ;;  %v1851_v29 = vld [vmem:[%s2706_s1] ss:$0 sm:$0xff] }
  0x11   :  { %1974 = vmatprep.subr.bf16.mxu1 %v2314_v0  ;;  %s2322_s6 = smov 104   ;;  %vm48_vm3 = vcmp.lt.s32.totalorder %v38_v26, 8  ;;  %vm57_vm4 = vcmp.ge.s32.totalorder %v38_v26, 8  ;;  %vm60_vm5 = vcmp.lt.s32.totalorder %v38_v26, 16  ;;  %s2324_s1 = smov 56   ;;  %vm662_vm8 = vcmask 195584  }
  0x12   :  { %v65_v28 = vsel %vm48_vm3, 0.0, %v2323_v27  ;;  %vm62_vm6 = vmand %vm57_vm4, %vm60_vm5  ;;  %s2325_s9 = smov 48   ;;  %s2326_s10 = smov 40   ;;  %vm875_vm9 = vcmask 523264  }
  0x13   :  { %v2426_v30 = vadd.f32 %v1851_v29, %v65_v28  ;;  %v66_v31 = vsel %vm62_vm6, 0.0, %v2323_v27  ;;  %s2327_s11 = smov 8   ;;  %s2328_s12 = smov 16  }
  0x14   :  { %1975 = vmatpush3.bf16.msra.mxu1 %v2190_v2  ;;  %v2429_v34 = vadd.f32 %v1851_v29, %v66_v31  ;;  %s2329_s13 = smov 24  }
  0x15   :  { %1980 = vmatprep.subr.bf16.mxu1 %v2314_v0 }
  0x17   :  { %1977 = vmatmul.mubr.msk.bf16.vlgmr.msra.gmra.mxu1 %vm98_vm1, %v76_v5 }
  0x18   :  { %1982 = vmatprep.mubr.msk.bf16.mxu1 %vm2315_vm0, %v2314_v0 }
  0xd7   :  { %v136_v6 = vpop.f32.mrf.mxu1 }
  0xd8   :  { %v137_v10 = vadd.f32 %v1852_v7, %v136_v6 }
  0xd9   :  { %v1978_v8 = vpop.f32.mrf.mxu1 }
  0xdb   :  { %v139_v9 = vpop.f32.mrf.mxu1 }
  0xdc   :  { %v140_v11 = vadd.f32 %v1852_v7, %v139_v9 }
  0xdd   :  { %v1979_v12 = vpop.f32.mrf.mxu1 }
  0xde   :  { %v2386_v13 = vpack.c.bf16 %v140_v11, %v137_v10 }
  0xe0   :  { %271 = vrot.lane.b32.xlu1 %v2386_v13, %s2316_s0  ;;  %150 = vrot.lane.b32.xlu0 %v2386_v13, %s2317_s27 }
  0xe4   :  { %394 = vrot.lane.b32.xlu1 %v2386_v13, %s2318_s28  ;;  %273 = vrot.lane.b32.xlu0 %v2386_v13, %s2319_s29 }
  0xe8   :  { %515 = vrot.lane.b32.xlu1 %v2386_v13, %s2320_s30  ;;  %392 = vrot.lane.b32.xlu0 %v2386_v13, %s2321_s5 }
  0xec   :  { %513 = vrot.lane.b32.xlu0 %v2386_v13, %s2322_s6 }
 0x152   :  { %v151_v14 = vpop.permute.xlu0 %150  ;;  %v272_v17 = vpop.permute.xlu1 %271 }
 0x153   :  { %v157_v15 = vsel %vm152_vm2, %v151_v14, 0 }
 0x154   :  { %1981 = vmatpush3.bf16.xpose.msra.mxu1 %v157_v15 }
 0x155   :  { %1992 = vmatprep.subr.bf16.mxu1 %v2314_v0 }
 0x156   :  { %v274_v16 = vpop.permute.xlu0 %273  ;;  %v395_v19 = vpop.permute.xlu1 %394 }
 0x157   :  { %v279_v18 = vsel %vm152_vm2, %v274_v16, 0  ;;  %v400_v20 = vsel %vm152_vm2, %v395_v19, 0 }
 0x15a   :  { %v516_v21 = vpop.permute.xlu1 %515  ;;  %v393_v22 = vpop.permute.xlu0 %392 }
 0x15b   :  { %1983 = vmatmul.mubr.msk.bf16.vlgmr.msra.gmra.mxu1 %vm152_vm2, %v2386_v13  ;;  %v521_v23 = vsel %vm152_vm2, %v516_v21, 0 }
 0x15c   :  { %1993 = vmatpush3.bf16.xpose.msra.mxu1 %v279_v18  ;;  %1994 = vmatprep.mubr.msk.bf16.mxu1 %vm2315_vm0, %v2314_v0 }
 0x15d   :  { %2004 = vmatprep.subr.bf16.mxu1 %v2314_v0 }
 0x15e   :  { %v514_v24 = vpop.permute.xlu0 %513 }
 0x163   :  { %1995 = vmatmul.mubr.msk.bf16.vlgmr.msra.gmra.mxu1 %vm152_vm2, %v272_v17 }
 0x164   :  { %2005 = vmatpush3.bf16.xpose.msra.mxu1 %v400_v20  ;;  %2006 = vmatprep.mubr.msk.bf16.mxu1 %vm2315_vm0, %v2314_v0 }
 0x165   :  { %2016 = vmatprep.subr.bf16.mxu1 %v2314_v0 }
 0x16b   :  { %2007 = vmatmul.mubr.msk.bf16.vlgmr.msra.gmra.mxu1 %vm152_vm2, %v393_v22 }
 0x16c   :  { %2017 = vmatpush3.bf16.xpose.msra.mxu1 %v521_v23  ;;  %2018 = vmatprep.mubr.msk.bf16.mxu1 %vm2315_vm0, %v2314_v0 }
 0x16d   :  { %2028 = vmatprep.subr.bf16.mxu1 %v2314_v0 }
 0x173   :  { %2019 = vmatmul.mubr.msk.bf16.vlgmr.msra.gmra.mxu1 %vm152_vm2, %v514_v24 }
 0x174   :  { %2032 = vmatprep.mubr.msk.bf16.mxu1 %vm2315_vm0, %v2314_v0 }
 0x21b   :  { %v193_v32 = vpop.f32.mrf.mxu1 }
 0x21c   :  { %v194_v33 = vadd.f32 %v193_v32, %v2426_v30 }
 0x21d   :  { %v1984_v35 = vpop.f32.mrf.mxu1 }
 0x21e   :  { %v201_v36 = vsel %vm200_vm7, %v194_v33, -inf }
 0x21f   :  { %202 = vmax.xlane.f32.xlu1 %v201_v36  ;;  %v196_v37 = vpop.f32.mrf.mxu1 }
 0x220   :  { %v197_v38 = vadd.f32 %v196_v37, %v2429_v34 }
 0x221   :  { %v1985_v39 = vpop.f32.mrf.mxu1 }
 0x222   :  { %v204_v40 = vsel %vm200_vm7, %v197_v38, -inf }
 0x223   :  { %205 = vmax.xlane.f32.xlu0 %v204_v40  ;;  %v315_v41 = vpop.f32.mrf.mxu1 }
 0x224   :  { %v316_v42 = vadd.f32 %v315_v41, %v2426_v30 }
 0x225   :  { %v1996_v43 = vpop.f32.mrf.mxu1 }
 0x226   :  { %v322_v44 = vsel %vm200_vm7, %v316_v42, -inf }
 0x227   :  { %323 = vmax.xlane.f32.xlu0 %v322_v44  ;;  %v318_v45 = vpop.f32.mrf.mxu1 }
 0x228   :  { %v319_v46 = vadd.f32 %v318_v45, %v2429_v34 }
 0x229   :  { %v1997_v47 = vpop.f32.mrf.mxu1 }
 0x22a   :  { %v325_v48 = vsel %vm200_vm7, %v319_v46, -inf }
 0x22b   :  { %326 = vmax.xlane.f32.xlu1 %v325_v48  ;;  %v436_v49 = vpop.f32.mrf.mxu1 }
 0x22c   :  { %v437_v50 = vadd.f32 %v436_v49, %v2426_v30 }
 0x22d   :  { %v2008_v51 = vpop.f32.mrf.mxu1 }
 0x22e   :  { %v443_v52 = vsel %vm200_vm7, %v437_v50, -inf }
 0x22f   :  { %444 = vmax.xlane.f32.xlu0 %v443_v52  ;;  %v439_v53 = vpop.f32.mrf.mxu1 }
 0x230   :  { %v440_v54 = vadd.f32 %v439_v53, %v2429_v34 }
 0x231   :  { %v2009_v55 = vpop.f32.mrf.mxu1 }
 0x232   :  { %v446_v56 = vsel %vm200_vm7, %v440_v54, -inf }
 0x233   :  { %447 = vmax.xlane.f32.xlu1 %v446_v56  ;;  %v557_v57 = vpop.f32.mrf.mxu1 }
 0x234   :  { %v558_v58 = vadd.f32 %v557_v57, %v2426_v30 }
 0x235   :  { %v2020_v59 = vpop.f32.mrf.mxu1 }
 0x236   :  { %v564_v60 = vsel %vm200_vm7, %v558_v58, -inf }
 0x237   :  { %565 = vmax.xlane.f32.xlu0 %v564_v60  ;;  %v560_v61 = vpop.f32.mrf.mxu1 }
 0x238   :  { %v561_v62 = vadd.f32 %v560_v61, %v2429_v34 }
 0x239   :  { %v2021_v63 = vpop.f32.mrf.mxu1 }
 0x23a   :  { %v567_v1 = vsel %vm200_vm7, %v561_v62, -inf }
 0x23b   :  { %568 = vmax.xlane.f32.xlu1 %v567_v1 }
 0x2a8   :  { %v203_v2 = vpop.xlane.xlu1 %202 }
 0x2a9   :  { %v207_v5 = vsub.f32 %v194_v33, %v203_v2 }
 0x2ab   :  { %v209_v6 = vmul.f32 1.442695, %v207_v5 }
 0x2ac   :  { %v206_v7 = vpop.xlane.xlu0 %205 }
 0x2ad   :  { %2209 = vpow2.f32 %v209_v6  ;;  %v208_v8 = vsub.f32 %v197_v38, %v206_v7 }
 0x2af   :  { %v211_v9 = vmul.f32 1.442695, %v208_v8 }
 0x2b0   :  { %v324_v10 = vpop.xlane.xlu0 %323 }
 0x2b1   :  { %2211 = vpow2.f32 %v211_v9  ;;  %v328_v11 = vsub.f32 %v316_v42, %v324_v10 }
 0x2b3   :  { %v330_v12 = vmul.f32 1.442695, %v328_v11 }
 0x2b4   :  { %v327_v20 = vpop.xlane.xlu1 %326 }
 0x2b5   :  { %2213 = vpow2.f32 %v330_v12  ;;  %v329_v21 = vsub.f32 %v319_v46, %v327_v20 }
 0x2b7   :  { %v332_v25 = vmul.f32 1.442695, %v329_v21 }
 0x2b8   :  { %v445_v22 = vpop.xlane.xlu0 %444 }
 0x2b9   :  { %v449_v24 = vsub.f32 %v437_v50, %v445_v22  ;;  %2215 = vpow2.f32 %v332_v25  ;;  %v2191_v25 = vld [vmem:[#allocation2 + $0x18] sm:$0xff]  }
 0x2ba   :  { %v2210_v14 = vpop.eup %2209  ;;  %2029 = vmatpush3.bf16.msra.mxu1 %v2191_v25 }
 0x2bb   :  { %v213_v15 = vsel %vm200_vm7, %v2210_v14, 0.0  ;;  %v451_v29 = vmul.f32 1.442695, %v449_v24  ;;  %2030 = vmatprep.subr.bf16.mxu1 %v2314_v0 }
 0x2bc   :  { %214 = vadd.xlane.f32.xlu0 %v213_v15  ;;  %v448_v23 = vpop.xlane.xlu1 %447 }
 0x2bd   :  { %v450_v26 = vsub.f32 %v440_v54, %v448_v23  ;;  %2217 = vpow2.f32 %v451_v29 }
 0x2be   :  { %v2212_v16 = vpop.eup %2211 }
 0x2bf   :  { %v216_v17 = vsel %vm200_vm7, %v2212_v16, 0.0  ;;  %v453_v32 = vmul.f32 1.442695, %v450_v26 }
 0x2c0   :  { %217 = vadd.xlane.f32.xlu1 %v216_v17  ;;  %v566_v27 = vpop.xlane.xlu0 %565 }
 0x2c1   :  { %v570_v31 = vsub.f32 %v558_v58, %v566_v27  ;;  %2219 = vpow2.f32 %v453_v32 }
 0x2c2   :  { %v2448_v18 = vpop.eup %2213 }
 0x2c3   :  { %v334_v19 = vsel %vm200_vm7, %v2448_v18, 0.0  ;;  %v572_v35 = vmul.f32 1.442695, %v570_v31  ;;  %v2192_v31 = vld [vmem:[#allocation2 + $0x10] sm:$0xff]  }
 0x2c4   :  { %335 = vadd.xlane.f32.xlu0 %v334_v19  ;;  %v569_v28 = vpop.xlane.xlu1 %568  ;;  %2031 = vmatpush3.bf16.msra.mxu1 %v2192_v31  ;;  %v1869_v31 = vld [vmem:[%s2708_s3 + $0x3] ss:$0 sm:$0xff] }
 0x2c5   :  { %v571_v33 = vsub.f32 %v561_v62, %v569_v28  ;;  %2221 = vpow2.f32 %v572_v35  ;;  %2044 = vmatprep.subr.bf16.mxu1 %v2314_v0 }
 0x2c6   :  { %v2216_v37 = vpop.eup %2215 }
 0x2c7   :  { %v574_v36 = vmul.f32 1.442695, %v571_v33  ;;  %v337_v39 = vsel %vm200_vm7, %v2216_v37, 0.0 }
 0x2c9   :  { %2223 = vpow2.f32 %v574_v36 }
 0x2ca   :  { %v2218_v38 = vpop.eup %2217 }
 0x2cb   :  { %v455_v42 = vsel %vm200_vm7, %v2218_v38, 0.0 }
 0x2ce   :  { %v2220_v40 = vpop.eup %2219 }
 0x2cf   :  { %v458_v43 = vsel %vm200_vm7, %v2220_v40, 0.0 }
 0x2d1   :  { %345 = vrot.lane.b32.xlu1 %v2386_v13, %s2324_s1 }
 0x2d2   :  { %v2457_v41 = vpop.eup %2221 }
 0x2d3   :  { %v576_v45 = vsel %vm200_vm7, %v2457_v41, 0.0 }
 0x2d6   :  { %v2224_v44 = vpop.eup %2223 }
 0x2d7   :  { %v579_v46 = vsel %vm200_vm7, %v2224_v44, 0.0 }
 0x2da   :  { %224 = vrot.lane.b32.xlu0 %v2386_v13, %s2312_s18 }
 0x2f5   :  { %338 = vadd.xlane.f32.xlu1 %v337_v39 }
 0x2f9   :  { %456 = vadd.xlane.f32.xlu0 %v455_v42  ;;  %459 = vadd.xlane.f32.xlu1 %v458_v43 }
 0x2fd   :  { %577 = vadd.xlane.f32.xlu0 %v576_v45  ;;  %580 = vadd.xlane.f32.xlu1 %v579_v46 }
 0x30e   :  { %466 = vrot.lane.b32.xlu1 %v2386_v13, %s2325_s9 }
 0x313   :  { %587 = vrot.lane.b32.xlu0 %v2386_v13, %s2326_s10 }
 0x345   :  { %v215_v47 = vpop.xlane.xlu0 %214 }
 0x346   :  { %2225 = vrcp.f32 %v215_v47 }
 0x349   :  { %v218_v48 = vpop.xlane.xlu1 %217 }
 0x34a   :  { %2227 = vrcp.f32 %v218_v48 }
 0x34d   :  { %v336_v49 = vpop.xlane.xlu0 %335  ;;  %v346_v56 = vpop.permute.xlu1 %345 }
 0x34e   :  { %2229 = vrcp.f32 %v336_v49 }
 0x351   :  { %v225_v50 = vpop.permute.xlu0 %224 }
 0x352   :  { %1987 = vmatpush3.bf16.msra.mxu0 %v225_v50 }
 0x353   :  { %1998 = vmatprep.subr.bf16.mxu0 %v2314_v0  ;;  %v2226_v51 = vpop.eup %2225 }
 0x354   :  { %v221_v53 = vmul.f32 %v2226_v51, %v2210_v14 }
 0x357   :  { %v2228_v52 = vpop.eup %2227 }
 0x358   :  { %v222_v54 = vmul.f32 %v2228_v52, %v2212_v16 }
 0x35a   :  { %v223_v55 = vpack.c.bf16 %v222_v54, %v221_v53 }
 0x35b   :  { %v2230_v61 = vpop.eup %2229 }
 0x35c   :  { %1989 = vmatmul.mubr.msk.bf16.vlgmr.msra.gmra.mxu0 %vm200_vm7, %v223_v55  ;;  %v342_v63 = vmul.f32 %v2230_v61, %v2448_v18 }
 0x35d   :  { %1999 = vmatpush3.bf16.msra.mxu0 %v346_v56  ;;  %2000 = vmatprep.mubr.msk.bf16.mxu0 %vm2315_vm0, %v2314_v0 }
 0x35e   :  { %2010 = vmatprep.subr.bf16.mxu0 %v2314_v0 }
 0x37e   :  { %v339_v13 = vpop.xlane.xlu1 %338 }
 0x37f   :  { %2231 = vrcp.f32 %v339_v13  ;;  %v1864_v13 = vld [vmem:[%s2708_s3 + $0x1] ss:$0 sm:$0xff] }
 0x382   :  { %v457_v57 = vpop.xlane.xlu0 %456  ;;  %v460_v58 = vpop.xlane.xlu1 %459 }
 0x383   :  { %2233 = vrcp.f32 %v457_v57 }
 0x384   :  { %2235 = vrcp.f32 %v460_v58 }
 0x386   :  { %v578_v59 = vpop.xlane.xlu0 %577  ;;  %v581_v60 = vpop.xlane.xlu1 %580 }
 0x387   :  { %2237 = vrcp.f32 %v578_v59 }
 0x388   :  { %2239 = vrcp.f32 %v581_v60 }
 0x38a   :  { %v467_v7 = vpop.permute.xlu1 %466  ;;  %v588_v14 = vpop.permute.xlu0 %587 }
 0x38c   :  { %v2232_v62 = vpop.eup %2231 }
 0x38d   :  { %v343_v1 = vmul.f32 %v2232_v62, %v2216_v37 }
 0x38f   :  { %v344_v2 = vpack.c.bf16 %v343_v1, %v342_v63 }
 0x390   :  { %v2234_v5 = vpop.eup %2233 }
 0x391   :  { %v2236_v6 = vpop.eup %2235  ;;  %2001 = vmatmul.mubr.msk.bf16.vlgmr.msra.gmra.mxu0 %vm200_vm7, %v344_v2  ;;  %v463_v8 = vmul.f32 %v2234_v5, %v2218_v38 }
 0x392   :  { %2011 = vmatpush3.bf16.msra.mxu0 %v467_v7  ;;  %2012 = vmatprep.mubr.msk.bf16.mxu0 %vm2315_vm0, %v2314_v0  ;;  %v464_v9 = vmul.f32 %v2236_v6, %v2220_v40 }
 0x393   :  { %2022 = vmatprep.subr.bf16.mxu0 %v2314_v0 }
 0x394   :  { %v2238_v10 = vpop.eup %2237  ;;  %v465_v11 = vpack.c.bf16 %v464_v9, %v463_v8 }
 0x395   :  { %v2240_v12 = vpop.eup %2239  ;;  %v584_v15 = vmul.f32 %v2238_v10, %v2457_v41 }
 0x396   :  { %v585_v16 = vmul.f32 %v2240_v12, %v2224_v44 }
 0x398   :  { %v586_v17 = vpack.c.bf16 %v585_v16, %v584_v15  ;;  %v2193_v16 = vld [vmem:[#allocation2 + $0x28] sm:$0xff]  }
 0x399   :  { %2013 = vmatmul.mubr.msk.bf16.vlgmr.msra.gmra.mxu0 %vm200_vm7, %v465_v11 }
 0x39a   :  { %2023 = vmatpush3.bf16.msra.mxu0 %v588_v14  ;;  %2024 = vmatprep.mubr.msk.bf16.mxu0 %vm2315_vm0, %v2314_v0 }
 0x39b   :  { %2036 = vmatprep.subr.bf16.mxu0 %v2314_v0 }
 0x3a1   :  { %2025 = vmatmul.mubr.msk.bf16.vlgmr.msra.gmra.mxu0 %vm200_vm7, %v586_v17  ;;  %v2195_v17 = vld [vmem:[#allocation2 + $0x48] sm:$0xff]  }
 0x3a2   :  { %2040 = vmatprep.mubr.msk.bf16.mxu0 %vm2315_vm0, %v2314_v0  ;;  %2037 = vmatpush3.bf16.msra.mxu0 %v2193_v16 }
 0x3a3   :  { %2038 = vmatprep.subr.bf16.mxu0 %v2314_v0 }
 0x41c   :  { %v264_v18 = vpop.f32.mrf.mxu0 }
 0x41e   :  { %v1990_v19 = vpop.f32.mrf.mxu0 }
 0x420   :  { %v267_v20 = vpop.f32.mrf.mxu0 }
 0x422   :  { %v1991_v21 = vpop.f32.mrf.mxu0 }
 0x451   :  { %v385_v22 = vpop.f32.mrf.mxu0 }
 0x453   :  { %v2002_v23 = vpop.f32.mrf.mxu0 }
 0x455   :  { %v388_v24 = vpop.f32.mrf.mxu0 }
 0x456   :  { %v2159_v26 = vpack.i.bf16 %v388_v24, %v385_v22 }
 0x457   :  { %v2003_v27 = vpop.f32.mrf.mxu0 }
 0x458   :  { %2160 = vrot.lane.b32.xlu1 %v2159_v26, %s2327_s11  ;;  %v1868_v26 = vld [vmem:[%s2708_s3 + $0x2] ss:$0 sm:$0xff] }
 0x459   :  { %v506_v28 = vpop.f32.mrf.mxu0 }
 0x45b   :  { %v2014_v29 = vpop.f32.mrf.mxu0 }
 0x45d   :  { %v509_v32 = vpop.f32.mrf.mxu0 }
 0x45e   :  { %v2164_v33 = vpack.i.bf16 %v509_v32, %v506_v28 }
 0x45f   :  { %v2015_v35 = vpop.f32.mrf.mxu0 }
 0x460   :  { %2165 = vrot.lane.b32.xlu0 %v2164_v33, %s2328_s12 }
 0x461   :  { %v627_v36 = vpop.f32.mrf.mxu0 }
 0x463   :  { %v2026_v37 = vpop.f32.mrf.mxu0 }
 0x464   :  { %v2196_v37 = vld [vmem:[#allocation2 + $0x40] sm:$0xff]  }
 0x465   :  { %v630_v38 = vpop.f32.mrf.mxu0 }
 0x466   :  { %v2169_v39 = vpack.i.bf16 %v630_v38, %v627_v36  ;;  %v2197_v38 = vld [vmem:[#allocation2 + $0x38] sm:$0xff]  }
 0x467   :  { %v2027_v40 = vpop.f32.mrf.mxu0 }
 0x468   :  { %2170 = vrot.lane.b32.xlu1 %v2169_v39, %s2329_s13  ;;  %v2198_v39 = vld [vmem:[#allocation2 + $0x30] sm:$0xff]   ;;  %v1870_v40 = vld [vmem:[%s2708_s3 + $0x4] ss:$0 sm:$0xff] }
 0x4ca   :  { %v2161_v41 = vpop.permute.xlu1 %2160 }
 0x4cb   :  { %v2163_v43 = vunpack.i.h.bf16 %v2161_v41  ;;  %v2162_v44 = vunpack.i.l.bf16 %v2161_v41 }
 0x4cd   :  { %v659_v48 = vsel %vm152_vm2, %v267_v20, %v2163_v43  ;;  %v658_v49 = vsel %vm152_vm2, %v264_v18, %v2162_v44 }
 0x4d2   :  { %v2166_v42 = vpop.permute.xlu0 %2165 }
 0x4d3   :  { %v2168_v45 = vunpack.i.h.bf16 %v2166_v42  ;;  %v2167_v46 = vunpack.i.l.bf16 %v2166_v42 }
 0x4d5   :  { %v660_v52 = vsel %vm200_vm7, %v658_v49, %v2167_v46  ;;  %v661_v53 = vsel %vm200_vm7, %v659_v48, %v2168_v45 }
 0x4da   :  { %v2171_v47 = vpop.permute.xlu1 %2170 }
 0x4db   :  { %v2173_v50 = vunpack.i.h.bf16 %v2171_v47  ;;  %v2172_v51 = vunpack.i.l.bf16 %v2171_v47 }
 0x4dd   :  { %v663_v54 = vsel %vm662_vm8, %v660_v52, %v2172_v51  ;;  %v664_v55 = vsel %vm662_vm8, %v661_v53, %v2173_v50  ;;  %v1874_v50 = vld [vmem:[%s2708_s3 + $0x5] ss:$0 sm:$0xff] }
 0x4de   :  { %v665_v56 = vpack.c.bf16 %v664_v55, %v663_v54 }
 0x4e0   :  { %2033 = vmatmul.mubr.msk.bf16.vlgmr.msra.gmra.mxu1 %vm98_vm1, %v665_v56 }
 0x4e1   :  { %2052 = vmatprep.mubr.msk.bf16.mxu1 %vm2315_vm0, %v2314_v0  ;;  %2045 = vmatpush3.bf16.msra.mxu1 %v2195_v17 }
 0x4e2   :  { %2046 = vmatprep.subr.bf16.mxu1 %v2314_v0 }
 0x4e5   :  { %2047 = vmatpush3.bf16.msra.mxu1 %v2196_v37 }
 0x4e6   :  { %2048 = vmatprep.subr.bf16.mxu1 %v2314_v0 }
 0x4e9   :  { %2049 = vmatpush3.bf16.msra.mxu1 %v2197_v38 }
 0x4ea   :  { %2050 = vmatprep.subr.bf16.mxu1 %v2314_v0 }
 0x4ed   :  { %2051 = vmatpush3.bf16.msra.mxu1 %v2198_v39 }
 0x4ee   :  { %2070 = vmatprep.subr.bf16.mxu1 %v2314_v0 }
 0x5a0   :  { %v719_v57 = vpop.f32.mrf.mxu1 }
 0x5a1   :  { %v720_v58 = vadd.f32 %v1864_v13, %v719_v57 }
 0x5a2   :  { %v2034_v59 = vpop.f32.mrf.mxu1 }
 0x5a3   :  { %v728_v60 = vadd.f32 %v720_v58, %v2369_v3 }
 0x5a4   :  { %v722_v61 = vpop.f32.mrf.mxu1 }
 0x5a5   :  { %v723_v62 = vadd.f32 %v1864_v13, %v722_v61  ;;  %v730_v63 = vsel %vm98_vm1, %v728_v60, 0.0 }
 0x5a6   :  { %731 = vadd.xlane.f32.xlu0 %v730_v63  ;;  %v2035_v1 = vpop.f32.mrf.mxu1 }
 0x5a7   :  { %v729_v2 = vadd.f32 %v723_v62, %v2374_v4  ;;  %v2194_v4 = vld [vmem:[#allocation2 + $0x20] sm:$0xff]  }
 0x5a8   :  { %2039 = vmatpush3.bf16.msra.mxu0 %v2194_v4 }
 0x5a9   :  { %v733_v5 = vsel %vm98_vm1, %v729_v2, 0.0  ;;  %2056 = vmatprep.subr.bf16.mxu0 %v2314_v0 }
 0x5aa   :  { %734 = vadd.xlane.f32.xlu1 %v733_v5 }
 0x62f   :  { %v732_v6 = vpop.xlane.xlu0 %731 }
 0x630   :  { %v737_v7 = vmul.f32 0.03125, %v732_v6 }
 0x632   :  { %v739_v8 = vsub.f32 %v728_v60, %v737_v7 }
 0x633   :  { %v735_v9 = vpop.xlane.xlu1 %734 }
 0x634   :  { %v738_v10 = vmul.f32 0.03125, %v735_v9  ;;  %v741_v11 = vmul.f32 %v739_v8, %v739_v8  ;;  %v2199_v9 = vld [vmem:[#allocation2 + $0x58] sm:$0xff]  }
 0x636   :  { %v740_v12 = vsub.f32 %v729_v2, %v738_v10  ;;  %v743_v3 = vsel %vm98_vm1, %v741_v11, 0.0  ;;  %v2200_v10 = vld [vmem:[#allocation2 + $0x50] sm:$0xff]  }
 0x637   :  { %744 = vadd.xlane.f32.xlu0 %v743_v3 }
 0x638   :  { %v742_v14 = vmul.f32 %v740_v12, %v740_v12 }
 0x63a   :  { %v746_v15 = vsel %vm98_vm1, %v742_v14, 0.0 }
 0x63b   :  { %747 = vadd.xlane.f32.xlu0 %v746_v15 }
 0x6c0   :  { %v745_v18 = vpop.xlane.xlu0 %744 }
 0x6c1   :  { %v749_v19 = vmul.f32 0.03125, %v745_v18  ;;  %v1880_v18 = vld [vmem:[%s2708_s3 + $0x6] ss:$0 sm:$0xff] }
 0x6c3   :  { %v751_v20 = vadd.f32 1e-06, %v749_v19 }
 0x6c4   :  { %v748_v21 = vpop.xlane.xlu0 %747 }
 0x6c5   :  { %2241 = vrsqrt.f32 %v751_v20  ;;  %v750_v22 = vmul.f32 0.03125, %v748_v21 }
 0x6c7   :  { %v752_v23 = vadd.f32 1e-06, %v750_v22  ;;  %v1881_v22 = vld [vmem:[%s2708_s3 + $0x7] ss:$0 sm:$0xff] }
 0x6c9   :  { %2243 = vrsqrt.f32 %v752_v23 }
 0x6d2   :  { %v2242_v24 = vpop.eup %2241 }
 0x6d3   :  { %v755_v25 = vmul.f32 %v2242_v24, %v739_v8 }
 0x6d5   :  { %v761_v29 = vmul.f32 %v1868_v26, %v755_v25 }
 0x6d6   :  { %v2244_v27 = vpop.eup %2243 }
 0x6d7   :  { %v756_v28 = vmul.f32 %v2244_v27, %v740_v12  ;;  %v767_v33 = vadd.f32 %v1869_v31, %v761_v29 }
 0x6d9   :  { %v762_v32 = vmul.f32 %v1868_v26, %v756_v28  ;;  %v1882_v28 = vld [vmem:[%s2708_s3 + $0x8] ss:$0 sm:$0xff] }
 0x6db   :  { %v768_v35 = vadd.f32 %v1869_v31, %v762_v32 }
 0x6dd   :  { %v783_v36 = vpack.c.bf16 %v768_v35, %v767_v33 }
 0x6df   :  { %2041 = vmatmul.mubr.msk.bf16.vlgmr.msra.gmra.mxu0 %vm98_vm1, %v783_v36 }
 0x6e0   :  { %2060 = vmatprep.mubr.msk.bf16.mxu0 %vm2315_vm0, %v2314_v0  ;;  %2057 = vmatpush3.bf16.msra.mxu0 %v2199_v9 }
 0x6e1   :  { %2058 = vmatprep.subr.bf16.mxu0 %v2314_v0 }
 0x6e4   :  { %2059 = vmatpush3.bf16.msra.mxu0 %v2200_v10 }
 0x6e5   :  { %2064 = vmatprep.subr.bf16.mxu0 %v2314_v0 }
 0x79f   :  { %v837_v41 = vpop.f32.mrf.mxu0 }
 0x7a0   :  { %v838_v43 = vadd.f32 %v1870_v40, %v837_v41 }
 0x7a1   :  { %v2042_v42 = vpop.f32.mrf.mxu0 }
 0x7a2   :  { %v844_v47 = vmax.f32 %v838_v43, 0.0 }
 0x7a3   :  { %v840_v44 = vpop.f32.mrf.mxu0 }
 0x7a4   :  { %v841_v45 = vadd.f32 %v1870_v40, %v840_v44 }
 0x7a5   :  { %v2043_v46 = vpop.f32.mrf.mxu0 }
 0x7a6   :  { %v845_v48 = vmax.f32 %v841_v45, 0.0 }
 0x7a8   :  { %v846_v49 = vpack.c.bf16 %v845_v48, %v844_v47 }
 0x7aa   :  { %2053 = vmatmul.mubr.msk.bf16.vlgmr.msra.gmra.mxu1 %vm875_vm9, %v846_v49 }
 0x7ab   :  { %2072 = vmatprep.mubr.msk.bf16.mxu1 %vm2315_vm0, %v2314_v0 }
 0x86a   :  { %v913_v51 = vpop.f32.mrf.mxu1 }
 0x86b   :  { %v914_v52 = vadd.f32 %v1874_v50, %v913_v51 }
 0x86c   :  { %v2054_v53 = vpop.f32.mrf.mxu1 }
 0x86d   :  { %v922_v54 = vadd.f32 %v914_v52, %v767_v33 }
 0x86e   :  { %v916_v55 = vpop.f32.mrf.mxu1 }
 0x86f   :  { %v917_v56 = vadd.f32 %v1874_v50, %v916_v55  ;;  %v924_v13 = vsel %vm98_vm1, %v922_v54, 0.0 }
 0x870   :  { %925 = vadd.xlane.f32.xlu1 %v924_v13  ;;  %v2055_v57 = vpop.f32.mrf.mxu1 }
 0x871   :  { %v923_v58 = vadd.f32 %v917_v56, %v768_v35 }
 0x873   :  { %v927_v59 = vsel %vm98_vm1, %v923_v58, 0.0 }
 0x874   :  { %928 = vadd.xlane.f32.xlu0 %v927_v59 }
 0x8f9   :  { %v926_v60 = vpop.xlane.xlu1 %925 }
 0x8fa   :  { %v930_v61 = vmul.f32 0.03125, %v926_v60 }
 0x8fc   :  { %v932_v62 = vsub.f32 %v922_v54, %v930_v61 }
 0x8fd   :  { %v929_v63 = vpop.xlane.xlu0 %928 }
 0x8fe   :  { %v931_v1 = vmul.f32 0.03125, %v929_v63  ;;  %v934_v2 = vmul.f32 %v932_v62, %v932_v62 }
 0x900   :  { %v933_v5 = vsub.f32 %v923_v58, %v931_v1  ;;  %v936_v6 = vsel %vm98_vm1, %v934_v2, 0.0 }
 0x901   :  { %937 = vadd.xlane.f32.xlu1 %v936_v6 }
 0x902   :  { %v935_v7 = vmul.f32 %v933_v5, %v933_v5 }
 0x904   :  { %v939_v8 = vsel %vm98_vm1, %v935_v7, 0.0 }
 0x905   :  { %940 = vadd.xlane.f32.xlu0 %v939_v8 }
 0x98a   :  { %v938_v11 = vpop.xlane.xlu1 %937 }
 0x98b   :  { %v942_v12 = vmul.f32 0.03125, %v938_v11 }
 0x98d   :  { %v944_v3 = vadd.f32 1e-06, %v942_v12 }
 0x98e   :  { %v941_v14 = vpop.xlane.xlu0 %940 }
 0x98f   :  { %2245 = vrsqrt.f32 %v944_v3  ;;  %v943_v15 = vmul.f32 0.03125, %v941_v14 }
 0x991   :  { %v945_v16 = vadd.f32 1e-06, %v943_v15 }
 0x993   :  { %2247 = vrsqrt.f32 %v945_v16 }
 0x99c   :  { %v2246_v4 = vpop.eup %2245 }
 0x99d   :  { %v948_v17 = vmul.f32 %v2246_v4, %v932_v62 }
 0x99f   :  { %v954_v21 = vmul.f32 %v1880_v18, %v948_v17 }
 0x9a0   :  { %v2248_v19 = vpop.eup %2247 }
 0x9a1   :  { %v949_v20 = vmul.f32 %v2248_v19, %v933_v5  ;;  %v2545_v24 = vadd.f32 %v1881_v22, %v954_v21 }
 0x9a3   :  { %v955_v23 = vmul.f32 %v1880_v18, %v949_v20 }
 0x9a5   :  { %v2547_v25 = vadd.f32 %v1881_v22, %v955_v23 }
 0x9a7   :  { %v962_v26 = vpack.c.bf16 %v2547_v25, %v2545_v24 }
 0x9a9   :  { %2061 = vmatmul.mubr.msk.bf16.vlgmr.msra.gmra.mxu0 %vm98_vm1, %v962_v26 }
 0x9aa   :  { %2066 = vmatprep.mubr.msk.bf16.mxu0 %vm2315_vm0, %v2314_v0 }
 0xa69   :  { %v1021_v27 = vpop.f32.mrf.mxu0 }
 0xa6a   :  { %v1022_v32 = vadd.f32 %v1882_v28, %v1021_v27 }
 0xa6b   :  { %v2062_v29 = vpop.f32.mrf.mxu0 }
 0xa6d   :  { %v1024_v31 = vpop.f32.mrf.mxu0 }
 0xa6e   :  { %v1025_v33 = vadd.f32 %v1882_v28, %v1024_v31 }
 0xa6f   :  { %v2063_v35 = vpop.f32.mrf.mxu0 }
 0xa70   :  { %v2557_v36 = vpack.c.bf16 %v1025_v33, %v1022_v32 }
 0xa72   :  { %1156 = vrot.lane.b32.xlu0 %v2557_v36, %s2319_s29  ;;  %1035 = vrot.lane.b32.xlu1 %v2557_v36, %s2317_s27 }
 0xa76   :  { %1275 = vrot.lane.b32.xlu0 %v2557_v36, %s2321_s5  ;;  %1154 = vrot.lane.b32.xlu1 %v2557_v36, %s2316_s0 }
 0xa7a   :  { %1396 = vrot.lane.b32.xlu0 %v2557_v36, %s2322_s6  ;;  %1277 = vrot.lane.b32.xlu1 %v2557_v36, %s2318_s28 }
 0xa7e   :  { %1398 = vrot.lane.b32.xlu1 %v2557_v36, %s2320_s30 }
 0xae4   :  { %v1036_v37 = vpop.permute.xlu1 %1035  ;;  %v1157_v39 = vpop.permute.xlu0 %1156 }
 0xae5   :  { %v1041_v38 = vsel %vm152_vm2, %v1036_v37, 0  ;;  %v1162_v41 = vsel %vm152_vm2, %v1157_v39, 0 }
 0xae6   :  { %2065 = vmatpush3.bf16.xpose.msra.mxu0 %v1041_v38 }
 0xae7   :  { %2076 = vmatprep.subr.bf16.mxu0 %v2314_v0 }
 0xae8   :  { %v1155_v40 = vpop.permute.xlu1 %1154  ;;  %v1276_v45 = vpop.permute.xlu0 %1275 }
 0xaec   :  { %v1278_v42 = vpop.permute.xlu1 %1277  ;;  %v1397_v47 = vpop.permute.xlu0 %1396 }
 0xaed   :  { %2067 = vmatmul.mubr.msk.bf16.vlgmr.msra.gmra.mxu0 %vm152_vm2, %v2557_v36  ;;  %v1283_v43 = vsel %vm152_vm2, %v1278_v42, 0 }
 0xaee   :  { %2077 = vmatpush3.bf16.xpose.msra.mxu0 %v1162_v41  ;;  %2078 = vmatprep.mubr.msk.bf16.mxu0 %vm2315_vm0, %v2314_v0 }
 0xaef   :  { %2088 = vmatprep.subr.bf16.mxu0 %v2314_v0 }
 0xaf0   :  { %v1399_v44 = vpop.permute.xlu1 %1398 }
 0xaf1   :  { %v1404_v46 = vsel %vm152_vm2, %v1399_v44, 0 }
 0xaf5   :  { %2079 = vmatmul.mubr.msk.bf16.vlgmr.msra.gmra.mxu0 %vm152_vm2, %v1155_v40 }
 0xaf6   :  { %2089 = vmatpush3.bf16.xpose.msra.mxu0 %v1283_v43  ;;  %2090 = vmatprep.mubr.msk.bf16.mxu0 %vm2315_vm0, %v2314_v0 }
 0xaf7   :  { %2100 = vmatprep.subr.bf16.mxu0 %v2314_v0 }
 0xafd   :  { %2091 = vmatmul.mubr.msk.bf16.vlgmr.msra.gmra.mxu0 %vm152_vm2, %v1276_v45 }
 0xafe   :  { %2101 = vmatpush3.bf16.xpose.msra.mxu0 %v1404_v46  ;;  %2102 = vmatprep.mubr.msk.bf16.mxu0 %vm2315_vm0, %v2314_v0 }
 0xaff   :  { %2112 = vmatprep.subr.bf16.mxu0 %v2314_v0 }
 0xb05   :  { %2103 = vmatmul.mubr.msk.bf16.vlgmr.msra.gmra.mxu0 %vm152_vm2, %v1397_v47 }
 0xb06   :  { %2116 = vmatprep.mubr.msk.bf16.mxu0 %vm2315_vm0, %v2314_v0 }
 0xbad   :  { %v1077_v48 = vpop.f32.mrf.mxu0 }
 0xbae   :  { %v1078_v49 = vadd.f32 %v1077_v48, %v2426_v30 }
 0xbaf   :  { %v2068_v50 = vpop.f32.mrf.mxu0 }
 0xbb0   :  { %v1084_v51 = vsel %vm200_vm7, %v1078_v49, -inf }
 0xbb1   :  { %1085 = vmax.xlane.f32.xlu1 %v1084_v51  ;;  %v1080_v52 = vpop.f32.mrf.mxu0 }
 0xbb2   :  { %v1081_v53 = vadd.f32 %v1080_v52, %v2429_v34 }
 0xbb3   :  { %v2069_v54 = vpop.f32.mrf.mxu0 }
 0xbb4   :  { %v1087_v55 = vsel %vm200_vm7, %v1081_v53, -inf }
 0xbb5   :  { %1088 = vmax.xlane.f32.xlu0 %v1087_v55  ;;  %v1198_v56 = vpop.f32.mrf.mxu0 }
 0xbb6   :  { %v1199_v13 = vadd.f32 %v1198_v56, %v2426_v30 }
 0xbb7   :  { %v2080_v57 = vpop.f32.mrf.mxu0 }
 0xbb8   :  { %v1205_v58 = vsel %vm200_vm7, %v1199_v13, -inf }
 0xbb9   :  { %1206 = vmax.xlane.f32.xlu0 %v1205_v58  ;;  %v1201_v59 = vpop.f32.mrf.mxu0 }
 0xbba   :  { %v1202_v60 = vadd.f32 %v1201_v59, %v2429_v34 }
 0xbbb   :  { %v2081_v61 = vpop.f32.mrf.mxu0 }
 0xbbc   :  { %v1208_v62 = vsel %vm200_vm7, %v1202_v60, -inf }
 0xbbd   :  { %1209 = vmax.xlane.f32.xlu1 %v1208_v62  ;;  %v1319_v63 = vpop.f32.mrf.mxu0 }
 0xbbe   :  { %v1320_v1 = vadd.f32 %v1319_v63, %v2426_v30 }
 0xbbf   :  { %v2092_v2 = vpop.f32.mrf.mxu0 }
 0xbc0   :  { %v1326_v5 = vsel %vm200_vm7, %v1320_v1, -inf }
 0xbc1   :  { %1327 = vmax.xlane.f32.xlu0 %v1326_v5  ;;  %v1322_v6 = vpop.f32.mrf.mxu0 }
 0xbc2   :  { %v1323_v7 = vadd.f32 %v1322_v6, %v2429_v34 }
 0xbc3   :  { %v2093_v8 = vpop.f32.mrf.mxu0 }
 0xbc4   :  { %v1329_v9 = vsel %vm200_vm7, %v1323_v7, -inf }
 0xbc5   :  { %1330 = vmax.xlane.f32.xlu1 %v1329_v9  ;;  %v1440_v10 = vpop.f32.mrf.mxu0 }
 0xbc6   :  { %v1441_v11 = vadd.f32 %v1440_v10, %v2426_v30 }
 0xbc7   :  { %v2104_v12 = vpop.f32.mrf.mxu0 }
 0xbc8   :  { %v1447_v3 = vsel %vm200_vm7, %v1441_v11, -inf }
 0xbc9   :  { %1448 = vmax.xlane.f32.xlu0 %v1447_v3  ;;  %v1443_v14 = vpop.f32.mrf.mxu0 }
 0xbca   :  { %v1444_v15 = vadd.f32 %v1443_v14, %v2429_v34 }
 0xbcb   :  { %v2105_v16 = vpop.f32.mrf.mxu0 }
 0xbcc   :  { %v1450_v4 = vsel %vm200_vm7, %v1444_v15, -inf }
 0xbcd   :  { %1451 = vmax.xlane.f32.xlu1 %v1450_v4 }
 0xc3a   :  { %v1086_v17 = vpop.xlane.xlu1 %1085 }
 0xc3b   :  { %v1090_v18 = vsub.f32 %v1078_v49, %v1086_v17 }
 0xc3d   :  { %v1092_v19 = vmul.f32 1.442695, %v1090_v18 }
 0xc3e   :  { %v1089_v20 = vpop.xlane.xlu0 %1088 }
 0xc3f   :  { %2249 = vpow2.f32 %v1092_v19  ;;  %v1091_v21 = vsub.f32 %v1081_v53, %v1089_v20 }
 0xc41   :  { %v1094_v22 = vmul.f32 1.442695, %v1091_v21 }
 0xc42   :  { %v1207_v23 = vpop.xlane.xlu0 %1206 }
 0xc43   :  { %2251 = vpow2.f32 %v1094_v22  ;;  %v1211_v30 = vsub.f32 %v1199_v13, %v1207_v23 }
 0xc45   :  { %v1213_v26 = vmul.f32 1.442695, %v1211_v30 }
 0xc46   :  { %v1210_v33 = vpop.xlane.xlu1 %1209 }
 0xc47   :  { %2253 = vpow2.f32 %v1213_v26  ;;  %v1212_v35 = vsub.f32 %v1202_v60, %v1210_v33 }
 0xc49   :  { %v1215_v40 = vmul.f32 1.442695, %v1212_v35 }
 0xc4a   :  { %v1328_v37 = vpop.xlane.xlu0 %1327 }
 0xc4b   :  { %v1332_v39 = vsub.f32 %v1320_v1, %v1328_v37  ;;  %2255 = vpow2.f32 %v1215_v40 }
 0xc4c   :  { %v2250_v27 = vpop.eup %2249 }
 0xc4d   :  { %v1096_v28 = vsel %vm200_vm7, %v2250_v27, 0.0  ;;  %v1334_v44 = vmul.f32 1.442695, %v1332_v39 }
 0xc4e   :  { %1097 = vadd.xlane.f32.xlu0 %v1096_v28  ;;  %v1331_v38 = vpop.xlane.xlu1 %1330 }
 0xc4f   :  { %v1333_v41 = vsub.f32 %v1323_v7, %v1331_v38  ;;  %2257 = vpow2.f32 %v1334_v44  ;;  %v2201_v38 = vld [vmem:[#allocation2 + $0x68] sm:$0xff]  }
 0xc50   :  { %v2252_v34 = vpop.eup %2251  ;;  %2113 = vmatpush3.bf16.msra.mxu0 %v2201_v38 }
 0xc51   :  { %v1099_v29 = vsel %vm200_vm7, %v2252_v34, 0.0  ;;  %v1336_v46 = vmul.f32 1.442695, %v1333_v41  ;;  %2114 = vmatprep.subr.bf16.mxu0 %v2314_v0 }
 0xc52   :  { %1100 = vadd.xlane.f32.xlu1 %v1099_v29  ;;  %v1449_v42 = vpop.xlane.xlu0 %1448 }
 0xc53   :  { %v1453_v45 = vsub.f32 %v1441_v11, %v1449_v42  ;;  %2259 = vpow2.f32 %v1336_v46 }
 0xc54   :  { %v2612_v31 = vpop.eup %2253 }
 0xc55   :  { %v1217_v32 = vsel %vm200_vm7, %v2612_v31, 0.0  ;;  %v1455_v48 = vmul.f32 1.442695, %v1453_v45 }
 0xc56   :  { %1218 = vadd.xlane.f32.xlu0 %v1217_v32  ;;  %v1452_v43 = vpop.xlane.xlu1 %1451 }
 0xc57   :  { %v1454_v47 = vsub.f32 %v1444_v15, %v1452_v43  ;;  %2261 = vpow2.f32 %v1455_v48  ;;  %v2202_v43 = vld [vmem:[#allocation2 + $0x60] sm:$0xff]  }
 0xc58   :  { %v2256_v50 = vpop.eup %2255  ;;  %2115 = vmatpush3.bf16.msra.mxu0 %v2202_v43 }
 0xc59   :  { %v1457_v49 = vmul.f32 1.442695, %v1454_v47  ;;  %v1220_v52 = vsel %vm200_vm7, %v2256_v50, 0.0  ;;  %2128 = vmatprep.subr.bf16.mxu0 %v2314_v0 }
 0xc5b   :  { %2263 = vpow2.f32 %v1457_v49 }
 0xc5c   :  { %v2258_v51 = vpop.eup %2257 }
 0xc5d   :  { %v1338_v55 = vsel %vm200_vm7, %v2258_v51, 0.0 }
 0xc60   :  { %v2260_v53 = vpop.eup %2259 }
 0xc61   :  { %v1341_v56 = vsel %vm200_vm7, %v2260_v53, 0.0 }
 0xc63   :  { %1228 = vrot.lane.b32.xlu1 %v2557_v36, %s2324_s1 }
 0xc64   :  { %v2262_v54 = vpop.eup %2261 }
 0xc65   :  { %v1459_v57 = vsel %vm200_vm7, %v2262_v54, 0.0 }
 0xc68   :  { %v2264_v13 = vpop.eup %2263 }
 0xc69   :  { %v1462_v58 = vsel %vm200_vm7, %v2264_v13, 0.0 }
 0xc6c   :  { %1107 = vrot.lane.b32.xlu0 %v2557_v36, %s2312_s18 }
 0xc87   :  { %1221 = vadd.xlane.f32.xlu1 %v1220_v52 }
 0xc8b   :  { %1339 = vadd.xlane.f32.xlu0 %v1338_v55  ;;  %1342 = vadd.xlane.f32.xlu1 %v1341_v56 }
 0xc8f   :  { %1460 = vadd.xlane.f32.xlu0 %v1459_v57  ;;  %1463 = vadd.xlane.f32.xlu1 %v1462_v58 }
 0xca0   :  { %1349 = vrot.lane.b32.xlu1 %v2557_v36, %s2325_s9 }
 0xca5   :  { %1470 = vrot.lane.b32.xlu0 %v2557_v36, %s2326_s10 }
 0xcd7   :  { %v1098_v59 = vpop.xlane.xlu0 %1097 }
 0xcd8   :  { %2265 = vrcp.f32 %v1098_v59 }
 0xcdb   :  { %v1101_v60 = vpop.xlane.xlu1 %1100 }
 0xcdc   :  { %2267 = vrcp.f32 %v1101_v60 }
 0xcdf   :  { %v1219_v61 = vpop.xlane.xlu0 %1218  ;;  %v1229_v7 = vpop.permute.xlu1 %1228 }
 0xce0   :  { %2269 = vrcp.f32 %v1219_v61 }
 0xce3   :  { %v1108_v62 = vpop.permute.xlu0 %1107 }
 0xce4   :  { %2071 = vmatpush3.bf16.msra.mxu1 %v1108_v62 }
 0xce5   :  { %2082 = vmatprep.subr.bf16.mxu1 %v2314_v0  ;;  %v2266_v63 = vpop.eup %2265 }
 0xce6   :  { %v1104_v2 = vmul.f32 %v2266_v63, %v2250_v27 }
 0xce9   :  { %v2268_v1 = vpop.eup %2267 }
 0xcea   :  { %v1105_v5 = vmul.f32 %v2268_v1, %v2252_v34 }
 0xcec   :  { %v1106_v6 = vpack.c.bf16 %v1105_v5, %v1104_v2 }
 0xced   :  { %v2270_v12 = vpop.eup %2269 }
 0xcee   :  { %2073 = vmatmul.mubr.msk.bf16.vlgmr.msra.gmra.mxu1 %vm200_vm7, %v1106_v6  ;;  %v1225_v14 = vmul.f32 %v2270_v12, %v2612_v31  ;;  %v1894_v6 = vld [vmem:[%s2708_s3 + $0x9] ss:$0 sm:$0xff] }
 0xcef   :  { %2083 = vmatpush3.bf16.msra.mxu1 %v1229_v7  ;;  %2084 = vmatprep.mubr.msk.bf16.mxu1 %vm2315_vm0, %v2314_v0 }
 0xcf0   :  { %2094 = vmatprep.subr.bf16.mxu1 %v2314_v0 }
 0xd10   :  { %v1222_v36 = vpop.xlane.xlu1 %1221 }
 0xd11   :  { %2271 = vrcp.f32 %v1222_v36 }
 0xd14   :  { %v1340_v8 = vpop.xlane.xlu0 %1339  ;;  %v1343_v9 = vpop.xlane.xlu1 %1342 }
 0xd15   :  { %2273 = vrcp.f32 %v1340_v8 }
 0xd16   :  { %2275 = vrcp.f32 %v1343_v9 }
 0xd18   :  { %v1461_v10 = vpop.xlane.xlu0 %1460  ;;  %v1464_v11 = vpop.xlane.xlu1 %1463 }
 0xd19   :  { %2277 = vrcp.f32 %v1461_v10 }
 0xd1a   :  { %2279 = vrcp.f32 %v1464_v11 }
 0xd1c   :  { %v1350_v18 = vpop.permute.xlu1 %1349  ;;  %v1471_v30 = vpop.permute.xlu0 %1470 }
 0xd1e   :  { %v2272_v3 = vpop.eup %2271 }
 0xd1f   :  { %v1226_v15 = vmul.f32 %v2272_v3, %v2256_v50 }
 0xd21   :  { %v1227_v16 = vpack.c.bf16 %v1226_v15, %v1225_v14 }
 0xd22   :  { %v2274_v4 = vpop.eup %2273 }
 0xd23   :  { %v2276_v17 = vpop.eup %2275  ;;  %2085 = vmatmul.mubr.msk.bf16.vlgmr.msra.gmra.mxu1 %vm200_vm7, %v1227_v16  ;;  %v1346_v19 = vmul.f32 %v2274_v4, %v2258_v51 }
 0xd24   :  { %2095 = vmatpush3.bf16.msra.mxu1 %v1350_v18  ;;  %2096 = vmatprep.mubr.msk.bf16.mxu1 %vm2315_vm0, %v2314_v0  ;;  %v1347_v20 = vmul.f32 %v2276_v17, %v2260_v53 }
 0xd25   :  { %2106 = vmatprep.subr.bf16.mxu1 %v2314_v0 }
 0xd26   :  { %v2278_v21 = vpop.eup %2277  ;;  %v1348_v22 = vpack.c.bf16 %v1347_v20, %v1346_v19 }
 0xd27   :  { %v2280_v23 = vpop.eup %2279  ;;  %v1467_v26 = vmul.f32 %v2278_v21, %v2262_v54 }
 0xd28   :  { %v1468_v27 = vmul.f32 %v2280_v23, %v2264_v13 }
 0xd2a   :  { %v1469_v28 = vpack.c.bf16 %v1468_v27, %v1467_v26  ;;  %v2205_v26 = vld [vmem:[#allocation2 + $0x98] sm:$0xff]  }
 0xd2b   :  { %2097 = vmatmul.mubr.msk.bf16.vlgmr.msra.gmra.mxu1 %vm200_vm7, %v1348_v22 }
 0xd2c   :  { %2107 = vmatpush3.bf16.msra.mxu1 %v1471_v30  ;;  %2108 = vmatprep.mubr.msk.bf16.mxu1 %vm2315_vm0, %v2314_v0  ;;  %v2203_v30 = vld [vmem:[#allocation2 + $0x78] sm:$0xff]  }
 0xd2d   :  { %2120 = vmatprep.subr.bf16.mxu1 %v2314_v0 }
 0xd33   :  { %2109 = vmatmul.mubr.msk.bf16.vlgmr.msra.gmra.mxu1 %vm200_vm7, %v1469_v28 }
 0xd34   :  { %2124 = vmatprep.mubr.msk.bf16.mxu1 %vm2315_vm0, %v2314_v0  ;;  %2121 = vmatpush3.bf16.msra.mxu1 %v2203_v30 }
 0xd35   :  { %2122 = vmatprep.subr.bf16.mxu1 %v2314_v0 }
 0xdae   :  { %v1147_v34 = vpop.f32.mrf.mxu1 }
 0xdb0   :  { %v2074_v29 = vpop.f32.mrf.mxu1 }
 0xdb2   :  { %v1150_v31 = vpop.f32.mrf.mxu1 }
 0xdb4   :  { %v2075_v32 = vpop.f32.mrf.mxu1 }
 0xde3   :  { %v1268_v33 = vpop.f32.mrf.mxu1 }
 0xde5   :  { %v2086_v35 = vpop.f32.mrf.mxu1 }
 0xde7   :  { %v1271_v37 = vpop.f32.mrf.mxu1 }
 0xde8   :  { %v2174_v39 = vpack.i.bf16 %v1271_v37, %v1268_v33  ;;  %v1898_v37 = vld [vmem:[%s2708_s3 + $0xa] ss:$0 sm:$0xff] }
 0xde9   :  { %v2087_v40 = vpop.f32.mrf.mxu1 }
 0xdea   :  { %2175 = vrot.lane.b32.xlu1 %v2174_v39, %s2327_s11 }
 0xdeb   :  { %v1389_v41 = vpop.f32.mrf.mxu1 }
 0xded   :  { %v2098_v42 = vpop.f32.mrf.mxu1 }
 0xdef   :  { %v1392_v44 = vpop.f32.mrf.mxu1 }
 0xdf0   :  { %v2179_v45 = vpack.i.bf16 %v1392_v44, %v1389_v41  ;;  %v1899_v41 = vld [vmem:[%s2708_s3 + $0xb] ss:$0 sm:$0xff] }
 0xdf1   :  { %v2099_v46 = vpop.f32.mrf.mxu1 }
 0xdf2   :  { %2180 = vrot.lane.b32.xlu0 %v2179_v45, %s2328_s12  ;;  %v2206_v46 = vld [vmem:[#allocation2 + $0x90] sm:$0xff]  }
 0xdf3   :  { %v1510_v47 = vpop.f32.mrf.mxu1 }
 0xdf5   :  { %v2110_v48 = vpop.f32.mrf.mxu1 }
 0xdf6   :  { %v2208_v48 = vld [vmem:[#allocation2 + $0x80] sm:$0xff]  }
 0xdf7   :  { %v1513_v49 = vpop.f32.mrf.mxu1 }
 0xdf8   :  { %v2184_v50 = vpack.i.bf16 %v1513_v49, %v1510_v47  ;;  %v2207_v47 = vld [vmem:[#allocation2 + $0x88] sm:$0xff]  }
 0xdf9   :  { %v2111_v51 = vpop.f32.mrf.mxu1  ;;  %v1900_v49 = vld [vmem:[%s2708_s3 + $0xc] ss:$0 sm:$0xff] }
 0xdfa   :  { %2185 = vrot.lane.b32.xlu1 %v2184_v50, %s2329_s13 }
 0xe5c   :  { %v2176_v52 = vpop.permute.xlu1 %2175 }
 0xe5d   :  { %v2178_v54 = vunpack.i.h.bf16 %v2176_v52  ;;  %v2177_v55 = vunpack.i.l.bf16 %v2176_v52 }
 0xe5f   :  { %v1542_v58 = vsel %vm152_vm2, %v1150_v31, %v2178_v54  ;;  %v1541_v59 = vsel %vm152_vm2, %v1147_v34, %v2177_v55 }
 0xe64   :  { %v2181_v53 = vpop.permute.xlu0 %2180 }
 0xe65   :  { %v2183_v56 = vunpack.i.h.bf16 %v2181_v53  ;;  %v2182_v13 = vunpack.i.l.bf16 %v2181_v53 }
 0xe67   :  { %v1544_v62 = vsel %vm200_vm7, %v1542_v58, %v2183_v56  ;;  %v1543_v63 = vsel %vm200_vm7, %v1541_v59, %v2182_v13 }
 0xe6c   :  { %v2186_v57 = vpop.permute.xlu1 %2185 }
 0xe6d   :  { %v2188_v60 = vunpack.i.h.bf16 %v2186_v57  ;;  %v2187_v61 = vunpack.i.l.bf16 %v2186_v57 }
 0xe6f   :  { %v1546_v1 = vsel %vm662_vm8, %v1544_v62, %v2188_v60  ;;  %v1545_v2 = vsel %vm662_vm8, %v1543_v63, %v2187_v61 }
 0xe70   :  { %v1547_v5 = vpack.c.bf16 %v1546_v1, %v1545_v2 }
 0xe72   :  { %2117 = vmatmul.mubr.msk.bf16.vlgmr.msra.gmra.mxu0 %vm98_vm1, %v1547_v5 }
 0xe73   :  { %2136 = vmatprep.mubr.msk.bf16.mxu0 %vm2315_vm0, %v2314_v0  ;;  %2129 = vmatpush3.bf16.msra.mxu0 %v2205_v26 }
 0xe74   :  { %2130 = vmatprep.subr.bf16.mxu0 %v2314_v0 }
 0xe77   :  { %2131 = vmatpush3.bf16.msra.mxu0 %v2206_v46 }
 0xe78   :  { %2132 = vmatprep.subr.bf16.mxu0 %v2314_v0 }
 0xe7b   :  { %2133 = vmatpush3.bf16.msra.mxu0 %v2207_v47 }
 0xe7c   :  { %2134 = vmatprep.subr.bf16.mxu0 %v2314_v0  ;;  %v1904_v0 = vld [vmem:[%s2708_s3 + $0xd] ss:$0 sm:$0xff] }
 0xe7f   :  { %2135 = vmatpush3.bf16.msra.mxu0 %v2208_v48 }
 0xf32   :  { %v1601_v7 = vpop.f32.mrf.mxu0 }
 0xf33   :  { %v1602_v36 = vadd.f32 %v1894_v6, %v1601_v7 }
 0xf34   :  { %v2118_v8 = vpop.f32.mrf.mxu0 }
 0xf35   :  { %v1610_v9 = vadd.f32 %v1602_v36, %v2545_v24 }
 0xf36   :  { %v1604_v10 = vpop.f32.mrf.mxu0 }
 0xf37   :  { %v1605_v11 = vadd.f32 %v1894_v6, %v1604_v10  ;;  %v1612_v12 = vsel %vm98_vm1, %v1610_v9, 0.0 }
 0xf38   :  { %1613 = vadd.xlane.f32.xlu0 %v1612_v12  ;;  %v2119_v3 = vpop.f32.mrf.mxu0 }
 0xf39   :  { %v1611_v14 = vadd.f32 %v1605_v11, %v2547_v25  ;;  %v2204_v25 = vld [vmem:[#allocation2 + $0x70] sm:$0xff]  }
 0xf3a   :  { %2123 = vmatpush3.bf16.msra.mxu1 %v2204_v25 }
 0xf3b   :  { %v1615_v15 = vsel %vm98_vm1, %v1611_v14, 0.0 }
 0xf3c   :  { %1616 = vadd.xlane.f32.xlu1 %v1615_v15 }
 0xfc1   :  { %v1614_v16 = vpop.xlane.xlu0 %1613 }
 0xfc2   :  { %v1618_v4 = vmul.f32 0.03125, %v1614_v16 }
 0xfc4   :  { %v1620_v17 = vsub.f32 %v1610_v9, %v1618_v4 }
 0xfc5   :  { %v1617_v18 = vpop.xlane.xlu1 %1616 }
 0xfc6   :  { %v1619_v19 = vmul.f32 0.03125, %v1617_v18  ;;  %v1622_v20 = vmul.f32 %v1620_v17, %v1620_v17 }
 0xfc8   :  { %v1621_v21 = vsub.f32 %v1611_v14, %v1619_v19  ;;  %v1624_v24 = vsel %vm98_vm1, %v1622_v20, 0.0 }
 0xfc9   :  { %1625 = vadd.xlane.f32.xlu0 %v1624_v24  ;;  %v1910_v24 = vld [vmem:[%s2708_s3 + $0xe] ss:$0 sm:$0xff] }
 0xfca   :  { %v1623_v22 = vmul.f32 %v1621_v21, %v1621_v21 }
 0xfcc   :  { %v1627_v23 = vsel %vm98_vm1, %v1623_v22, 0.0 }
 0xfcd   :  { %1628 = vadd.xlane.f32.xlu0 %v1627_v23  ;;  %v1911_v23 = vld [vmem:[%s2708_s3 + $0xf] ss:$0 sm:$0xff] }
0x1052   :  { %v1626_v27 = vpop.xlane.xlu0 %1625 }
0x1053   :  { %v1630_v28 = vmul.f32 0.03125, %v1626_v27 }
0x1055   :  { %v1632_v34 = vadd.f32 1e-06, %v1630_v28 }
0x1056   :  { %v1629_v29 = vpop.xlane.xlu0 %1628 }
0x1057   :  { %2281 = vrsqrt.f32 %v1632_v34  ;;  %v1631_v31 = vmul.f32 0.03125, %v1629_v29 }
0x1059   :  { %v1633_v32 = vadd.f32 1e-06, %v1631_v31 }
0x105b   :  { %2283 = vrsqrt.f32 %v1633_v32 }
0x1064   :  { %v2282_v33 = vpop.eup %2281 }
0x1065   :  { %v1636_v35 = vmul.f32 %v2282_v33, %v1620_v17 }
0x1067   :  { %v1642_v40 = vmul.f32 %v1898_v37, %v1636_v35 }
0x1068   :  { %v2284_v38 = vpop.eup %2283 }
0x1069   :  { %v1637_v39 = vmul.f32 %v2284_v38, %v1621_v21  ;;  %v1648_v43 = vadd.f32 %v1899_v41, %v1642_v40 }
0x106b   :  { %v1643_v42 = vmul.f32 %v1898_v37, %v1637_v39 }
0x106d   :  { %v1649_v44 = vadd.f32 %v1899_v41, %v1643_v42 }
0x106f   :  { %v1664_v45 = vpack.c.bf16 %v1649_v44, %v1648_v43 }
0x1071   :  { %2125 = vmatmul.mubr.msk.bf16.vlgmr.msra.gmra.mxu1 %vm98_vm1, %v1664_v45 }
0x1131   :  { %v1718_v50 = vpop.f32.mrf.mxu1 }
0x1132   :  { %v1719_v52 = vadd.f32 %v1900_v49, %v1718_v50 }
0x1133   :  { %v2126_v51 = vpop.f32.mrf.mxu1 }
0x1134   :  { %v1725_v56 = vmax.f32 %v1719_v52, 0.0 }
0x1135   :  { %v1721_v53 = vpop.f32.mrf.mxu1 }
0x1136   :  { %v1722_v54 = vadd.f32 %v1900_v49, %v1721_v53 }
0x1137   :  { %v2127_v55 = vpop.f32.mrf.mxu1 }
0x1138   :  { %v1726_v13 = vmax.f32 %v1722_v54, 0.0 }
0x113a   :  { %v1727_v57 = vpack.c.bf16 %v1726_v13, %v1725_v56 }
0x113c   :  { %2137 = vmatmul.mubr.msk.bf16.vlgmr.msra.gmra.mxu0 %vm875_vm9, %v1727_v57 }
0x11fc   :  { %v1793_v58 = vpop.f32.mrf.mxu0 }
0x11fd   :  { %v1794_v59 = vadd.f32 %v1904_v0, %v1793_v58 }
0x11fe   :  { %v2138_v60 = vpop.f32.mrf.mxu0 }
0x11ff   :  { %v1802_v61 = vadd.f32 %v1794_v59, %v1648_v43 }
0x1200   :  { %v1796_v62 = vpop.f32.mrf.mxu0 }
0x1201   :  { %v1797_v63 = vadd.f32 %v1904_v0, %v1796_v62  ;;  %v1804_v1 = vsel %vm98_vm1, %v1802_v61, 0.0 }
0x1202   :  { %1805 = vadd.xlane.f32.xlu1 %v1804_v1  ;;  %v2139_v2 = vpop.f32.mrf.mxu0 }
0x1203   :  { %v1803_v5 = vadd.f32 %v1797_v63, %v1649_v44 }
0x1205   :  { %v1807_v6 = vsel %vm98_vm1, %v1803_v5, 0.0 }
0x1206   :  { %1808 = vadd.xlane.f32.xlu0 %v1807_v6 }
0x128b   :  { %v1806_v7 = vpop.xlane.xlu1 %1805 }
0x128c   :  { %v1810_v36 = vmul.f32 0.03125, %v1806_v7 }
0x128e   :  { %v1812_v8 = vsub.f32 %v1802_v61, %v1810_v36 }
0x128f   :  { %v1809_v9 = vpop.xlane.xlu0 %1808 }
0x1290   :  { %v1811_v10 = vmul.f32 0.03125, %v1809_v9  ;;  %v1814_v11 = vmul.f32 %v1812_v8, %v1812_v8 }
0x1292   :  { %v1813_v12 = vsub.f32 %v1803_v5, %v1811_v10  ;;  %v1816_v3 = vsel %vm98_vm1, %v1814_v11, 0.0 }
0x1293   :  { %1817 = vadd.xlane.f32.xlu1 %v1816_v3 }
0x1294   :  { %v1815_v14 = vmul.f32 %v1813_v12, %v1813_v12 }
0x1296   :  { %v1819_v15 = vsel %vm98_vm1, %v1815_v14, 0.0 }
0x1297   :  { %1820 = vadd.xlane.f32.xlu0 %v1819_v15 }
0x131c   :  { %v1818_v16 = vpop.xlane.xlu1 %1817 }
0x131d   :  { %v1822_v4 = vmul.f32 0.03125, %v1818_v16 }
0x131f   :  { %v1824_v17 = vadd.f32 1e-06, %v1822_v4 }
0x1320   :  { %v1821_v18 = vpop.xlane.xlu0 %1820 }
0x1321   :  { %2285 = vrsqrt.f32 %v1824_v17  ;;  %v1823_v19 = vmul.f32 0.03125, %v1821_v18 }
0x1323   :  { %v1825_v20 = vadd.f32 1e-06, %v1823_v19 }
0x1325   :  { %2287 = vrsqrt.f32 %v1825_v20 }
0x132e   :  { %v2286_v21 = vpop.eup %2285 }
0x132f   :  { %v1828_v22 = vmul.f32 %v2286_v21, %v1812_v8 }
0x1331   :  { %v1834_v30 = vmul.f32 %v1910_v24, %v1828_v22 }
0x1332   :  { %v2288_v25 = vpop.eup %2287 }
0x1333   :  { %v1840_v26 = vadd.f32 %v1911_v23, %v1834_v30  ;;  %v1829_v27 = vmul.f32 %v2288_v25, %v1813_v12 }
0x1335   :  { %v1842_v28 = vsel %vm98_vm1, %v1840_v26, 0.0  ;;  %v1835_v34 = vmul.f32 %v1910_v24, %v1829_v27 }
0x1336   :  { %1844 = vst [vmem:[%s2709_s4] sm:$0xff] %v1842_v28 }
0x1337   :  { %v1841_v29 = vadd.f32 %v1911_v23, %v1835_v34 }
0x1339   :  { %v1843_v31 = vsel %vm98_vm1, %v1841_v29, 0.0 }
0x133a   :  { %1845 = vst [vmem:[%s2709_s4 + $0x8] sm:$0xff] %v1843_v31 }
0x133b   :  { %1850 = vsyncpa [#allocation3], 1 }

// kernel: encoder_decoder_forward.3
= control target key start
LH: loop header
LB: loop body
LE: loop exit
PB: predicated region body
PF: predicated region fallthrough
CT: control target
= control target key end

     0   :  { %v4264_v1 = vmov 0.0   ;;  %vm4265_vm0 = vmmov 0   ;;  %vm108_vm1 = vcmask 261120   ;;  %s5084_s0 = inlined_call_operand.vmem [shape: f32[16,32], index: 0, kind: input, shape index: {}]   ;;  %s5085_s1 = inlined_call_operand.vmem [shape: f32[16,128], index: 1, kind: input, shape index: {}]   ;;  %s5086_s2 = inlined_call_operand.vmem [shape: f32[1,16], index: 2, kind: input, shape index: {}]   ;;  %s5087_s3 = inlined_call_operand.vmem [shape: f32[1,16], index: 3, kind: input, shape index: {}]   ;;  %s5088_s4 = inlined_call_operand.vmem [shape: bf16[544,128], index: 4, kind: input, shape index: {}]   ;;  %s5089_s5 = inlined_call_operand.vmem [shape: f32[26,128], index: 5, kind: input, shape index: {}]   ;;  %s5090_s6 = inlined_call_operand.hbm [shape: f32[16,128], index: 6, kind: output, shape index: {}]  }
   0x1   :  { %v4056_v0 = vld [vmem:[%s5088_s4 + $0x8] sm:$0xff]   ;;  %3657 = vmatprep.subr.bf16.mxu0 %v4264_v1  ;;  %3665 = vmatprep.subr.bf16.mxu1 %v4264_v1  ;;  %v4057_v2 = vld [vmem:[%s5088_s4] sm:$0xff]  }
   0x2   :  { %3658 = vmatpush3.bf16.msra.mxu0 %v4056_v0  ;;  %3661 = vmatprep.mubr.msk.bf16.mxu0 %vm4265_vm0, %v4264_v1  ;;  %v4331_v3 = vld [vmem:[%s5084_s0] sm:$0xff]  ;;  %v4336_v4 = vld [vmem:[%s5084_s0 + $0x8] sm:$0xff] }
   0x3   :  { %3659 = vmatprep.subr.bf16.mxu0 %v4264_v1  ;;  %3667 = vmatprep.mubr.msk.bf16.mxu1 %vm4265_vm0, %v4264_v1  ;;  %v86_v5 = vpack.c.bf16 %v4336_v4, %v4331_v3 }
   0x6   :  { %3660 = vmatpush3.bf16.msra.mxu0 %v4057_v2 }
   0x7   :  { %3671 = vmatprep.subr.bf16.mxu0 %v4264_v1 }
   0x9   :  { %3662 = vmatmul.mubr.msk.bf16.vlgmr.msra.gmra.mxu0 %vm108_vm1, %v86_v5 }
   0xa   :  { %3673 = vmatprep.mubr.msk.bf16.mxu0 %vm4265_vm0, %v4264_v1 }
   0xb   :  { %11 = vsyncpa [#allocation3], 0  ;;  %v3437_v7 = vld [vmem:[%s5089_s5] ss:$0 sm:$0xff]  ;;  %s4266_s30 = smov 120   ;;  %s4267_s7 = smov 96   ;;  %v29_v25 = vlaneseq }
   0xc   :  { %s4268_s8 = smov 80   ;;  %s4269_s9 = smov 88   ;;  %vm162_vm2 = vcmask 64512   ;;  %v4273_v30 = vmov -1e+09   ;;  %vm210_vm11 = vcmask 130048  }
   0xd   :  { %s4270_s10 = smov 72   ;;  %s4271_s11 = smov 112   ;;  %v30_v26 = vshrl.u32 %v29_v25, 7  ;;  %v4387_v27 = vand.u32 127, %v29_v25  ;;  %v3435_v32 = vld [vmem:[%s5087_s3] ss:$0 sm:$0xff] }
   0xe   :  { %s4272_s12 = smov 104   ;;  %s4274_s3 = smov 56   ;;  %vm672_vm12 = vcmask 195584   ;;  %vm1639_vm13 = vcmask 523264  }
   0xf   :  { %vm43_vm3 = vcmp.lt.s32.totalorder %v4387_v27, 8  ;;  %vm60_vm4 = vcmp.ge.s32.totalorder %v30_v26, %v4387_v27  ;;  %v31_v28 = vadd.s32 8, %v30_v26  ;;  %vm52_vm5 = vcmp.ge.s32.totalorder %v4387_v27, 8  ;;  %s4275_s15 = smov 64   ;;  %s4276_s16 = smov 48  }
  0x10   :  { %vm55_vm6 = vcmp.lt.s32.totalorder %v4387_v27, 16  ;;  %vm62_vm7 = vmand %vm43_vm3, %vm60_vm4  ;;  %s4277_s17 = smov 40   ;;  %s4278_s20 = smov 8  }
  0x11   :  { %vm4395_vm8 = vmand %vm52_vm5, %vm55_vm6  ;;  %vm61_vm9 = vcmp.ge.s32.totalorder %v31_v28, %v4387_v27  ;;  %v64_v31 = vsel %vm62_vm7, 0.0, %v4273_v30  ;;  %s4279_s23 = smov 16   ;;  %s4280_s24 = smov 24  }
  0x12   :  { %vm63_vm10 = vmand %vm4395_vm8, %vm61_vm9  ;;  %v4406_v33 = vadd.f32 %v3435_v32, %v64_v31 }
  0x13   :  { %v65_v34 = vsel %vm63_vm10, 0.0, %v4273_v30 }
  0x14   :  { %v4410_v37 = vadd.f32 %v3435_v32, %v65_v34 }
  0xc9   :  { %v146_v6 = vpop.f32.mrf.mxu0 }
  0xca   :  { %v147_v10 = vadd.f32 %v3437_v7, %v146_v6 }
  0xcb   :  { %v3663_v8 = vpop.f32.mrf.mxu0 }
  0xcd   :  { %v149_v9 = vpop.f32.mrf.mxu0 }
  0xce   :  { %v150_v11 = vadd.f32 %v3437_v7, %v149_v9 }
  0xcf   :  { %v3664_v12 = vpop.f32.mrf.mxu0 }
  0xd0   :  { %v4350_v13 = vpack.c.bf16 %v150_v11, %v147_v10 }
  0xd2   :  { %281 = vrot.lane.b32.xlu1 %v4350_v13, %s4266_s30  ;;  %160 = vrot.lane.b32.xlu0 %v4350_v13, %s4267_s7 }
  0xd6   :  { %404 = vrot.lane.b32.xlu1 %v4350_v13, %s4268_s8  ;;  %283 = vrot.lane.b32.xlu0 %v4350_v13, %s4269_s9 }
  0xda   :  { %525 = vrot.lane.b32.xlu1 %v4350_v13, %s4270_s10  ;;  %402 = vrot.lane.b32.xlu0 %v4350_v13, %s4271_s11 }
  0xde   :  { %523 = vrot.lane.b32.xlu0 %v4350_v13, %s4272_s12 }
 0x144   :  { %v161_v14 = vpop.permute.xlu0 %160  ;;  %v282_v17 = vpop.permute.xlu1 %281 }
 0x145   :  { %v167_v15 = vsel %vm162_vm2, %v161_v14, 0 }
 0x146   :  { %3666 = vmatpush3.bf16.xpose.msra.mxu1 %v167_v15 }
 0x147   :  { %3677 = vmatprep.subr.bf16.mxu1 %v4264_v1 }
 0x148   :  { %v284_v16 = vpop.permute.xlu0 %283  ;;  %v405_v19 = vpop.permute.xlu1 %404 }
 0x149   :  { %v289_v18 = vsel %vm162_vm2, %v284_v16, 0  ;;  %v410_v20 = vsel %vm162_vm2, %v405_v19, 0 }
 0x14c   :  { %v526_v21 = vpop.permute.xlu1 %525  ;;  %v403_v22 = vpop.permute.xlu0 %402 }
 0x14d   :  { %3668 = vmatmul.mubr.msk.bf16.vlgmr.msra.gmra.mxu1 %vm162_vm2, %v4350_v13  ;;  %v531_v23 = vsel %vm162_vm2, %v526_v21, 0 }
 0x14e   :  { %3678 = vmatpush3.bf16.xpose.msra.mxu1 %v289_v18  ;;  %3679 = vmatprep.mubr.msk.bf16.mxu1 %vm4265_vm0, %v4264_v1 }
 0x14f   :  { %3689 = vmatprep.subr.bf16.mxu1 %v4264_v1 }
 0x150   :  { %v524_v24 = vpop.permute.xlu0 %523 }
 0x155   :  { %3680 = vmatmul.mubr.msk.bf16.vlgmr.msra.gmra.mxu1 %vm162_vm2, %v282_v17 }
 0x156   :  { %3690 = vmatpush3.bf16.xpose.msra.mxu1 %v410_v20  ;;  %3691 = vmatprep.mubr.msk.bf16.mxu1 %vm4265_vm0, %v4264_v1 }
 0x157   :  { %3701 = vmatprep.subr.bf16.mxu1 %v4264_v1 }
 0x15d   :  { %3692 = vmatmul.mubr.msk.bf16.vlgmr.msra.gmra.mxu1 %vm162_vm2, %v403_v22 }
 0x15e   :  { %3702 = vmatpush3.bf16.xpose.msra.mxu1 %v531_v23  ;;  %3703 = vmatprep.mubr.msk.bf16.mxu1 %vm4265_vm0, %v4264_v1 }
 0x15f   :  { %3713 = vmatprep.subr.bf16.mxu1 %v4264_v1 }
 0x165   :  { %3704 = vmatmul.mubr.msk.bf16.vlgmr.msra.gmra.mxu1 %vm162_vm2, %v524_v24 }
 0x166   :  { %3717 = vmatprep.mubr.msk.bf16.mxu1 %vm4265_vm0, %v4264_v1 }
 0x20d   :  { %v203_v35 = vpop.f32.mrf.mxu1 }
 0x20e   :  { %v204_v36 = vadd.f32 %v203_v35, %v4406_v33 }
 0x20f   :  { %v3669_v38 = vpop.f32.mrf.mxu1 }
 0x210   :  { %v211_v39 = vsel %vm210_vm11, %v204_v36, -inf }
 0x211   :  { %212 = vmax.xlane.f32.xlu1 %v211_v39  ;;  %v206_v40 = vpop.f32.mrf.mxu1 }
 0x212   :  { %v207_v41 = vadd.f32 %v206_v40, %v4410_v37 }
 0x213   :  { %v3670_v42 = vpop.f32.mrf.mxu1 }
 0x214   :  { %v214_v43 = vsel %vm210_vm11, %v207_v41, -inf }
 0x215   :  { %215 = vmax.xlane.f32.xlu0 %v214_v43  ;;  %v325_v44 = vpop.f32.mrf.mxu1 }
 0x216   :  { %v326_v45 = vadd.f32 %v325_v44, %v4406_v33 }
 0x217   :  { %v3681_v46 = vpop.f32.mrf.mxu1 }
 0x218   :  { %v332_v47 = vsel %vm210_vm11, %v326_v45, -inf }
 0x219   :  { %333 = vmax.xlane.f32.xlu0 %v332_v47  ;;  %v328_v48 = vpop.f32.mrf.mxu1 }
 0x21a   :  { %v329_v49 = vadd.f32 %v328_v48, %v4410_v37 }
 0x21b   :  { %v3682_v50 = vpop.f32.mrf.mxu1 }
 0x21c   :  { %v335_v51 = vsel %vm210_vm11, %v329_v49, -inf }
 0x21d   :  { %336 = vmax.xlane.f32.xlu1 %v335_v51  ;;  %v446_v52 = vpop.f32.mrf.mxu1 }
 0x21e   :  { %v447_v53 = vadd.f32 %v446_v52, %v4406_v33 }
 0x21f   :  { %v3693_v54 = vpop.f32.mrf.mxu1 }
 0x220   :  { %v453_v55 = vsel %vm210_vm11, %v447_v53, -inf }
 0x221   :  { %454 = vmax.xlane.f32.xlu0 %v453_v55  ;;  %v449_v56 = vpop.f32.mrf.mxu1 }
 0x222   :  { %v450_v57 = vadd.f32 %v449_v56, %v4410_v37 }
 0x223   :  { %v3694_v58 = vpop.f32.mrf.mxu1 }
 0x224   :  { %v456_v59 = vsel %vm210_vm11, %v450_v57, -inf }
 0x225   :  { %457 = vmax.xlane.f32.xlu1 %v456_v59  ;;  %v567_v60 = vpop.f32.mrf.mxu1 }
 0x226   :  { %v568_v61 = vadd.f32 %v567_v60, %v4406_v33 }
 0x227   :  { %v3705_v62 = vpop.f32.mrf.mxu1 }
 0x228   :  { %v574_v63 = vsel %vm210_vm11, %v568_v61, -inf }
 0x229   :  { %575 = vmax.xlane.f32.xlu0 %v574_v63  ;;  %v570_v0 = vpop.f32.mrf.mxu1 }
 0x22a   :  { %v571_v2 = vadd.f32 %v570_v0, %v4410_v37 }
 0x22b   :  { %v3706_v5 = vpop.f32.mrf.mxu1 }
 0x22c   :  { %v577_v6 = vsel %vm210_vm11, %v571_v2, -inf }
 0x22d   :  { %578 = vmax.xlane.f32.xlu1 %v577_v6 }
 0x29a   :  { %v213_v7 = vpop.xlane.xlu1 %212 }
 0x29b   :  { %v217_v8 = vsub.f32 %v204_v36, %v213_v7 }
 0x29d   :  { %v219_v9 = vmul.f32 1.442695, %v217_v8 }
 0x29e   :  { %v216_v10 = vpop.xlane.xlu0 %215 }
 0x29f   :  { %4090 = vpow2.f32 %v219_v9  ;;  %v218_v11 = vsub.f32 %v207_v41, %v216_v10 }
 0x2a1   :  { %v221_v12 = vmul.f32 1.442695, %v218_v11 }
 0x2a2   :  { %v334_v14 = vpop.xlane.xlu0 %333 }
 0x2a3   :  { %4092 = vpow2.f32 %v221_v12  ;;  %v338_v15 = vsub.f32 %v326_v45, %v334_v14 }
 0x2a5   :  { %v340_v16 = vmul.f32 1.442695, %v338_v15 }
 0x2a6   :  { %v337_v23 = vpop.xlane.xlu1 %336 }
 0x2a7   :  { %4094 = vpow2.f32 %v340_v16  ;;  %v339_v24 = vsub.f32 %v329_v49, %v337_v23 }
 0x2a9   :  { %v342_v31 = vmul.f32 1.442695, %v339_v24 }
 0x2aa   :  { %v455_v25 = vpop.xlane.xlu0 %454 }
 0x2ab   :  { %v459_v28 = vsub.f32 %v447_v53, %v455_v25  ;;  %4096 = vpow2.f32 %v342_v31 }
 0x2ac   :  { %v4091_v17 = vpop.eup %4090 }
 0x2ad   :  { %v223_v18 = vsel %vm210_vm11, %v4091_v17, 0.0  ;;  %v461_v36 = vmul.f32 1.442695, %v459_v28 }
 0x2ae   :  { %224 = vadd.xlane.f32.xlu0 %v223_v18  ;;  %v458_v26 = vpop.xlane.xlu1 %457 }
 0x2af   :  { %v460_v32 = vsub.f32 %v450_v57, %v458_v26  ;;  %4098 = vpow2.f32 %v461_v36 }
 0x2b0   :  { %v4093_v19 = vpop.eup %4092 }
 0x2b1   :  { %v226_v20 = vsel %vm210_vm11, %v4093_v19, 0.0  ;;  %v463_v39 = vmul.f32 1.442695, %v460_v32 }
 0x2b2   :  { %227 = vadd.xlane.f32.xlu1 %v226_v20  ;;  %v576_v34 = vpop.xlane.xlu0 %575 }
 0x2b3   :  { %v580_v38 = vsub.f32 %v568_v61, %v576_v34  ;;  %4100 = vpow2.f32 %v463_v39 }
 0x2b4   :  { %v4429_v21 = vpop.eup %4094 }
 0x2b5   :  { %v344_v22 = vsel %vm210_vm11, %v4429_v21, 0.0  ;;  %v582_v41 = vmul.f32 1.442695, %v580_v38 }
 0x2b6   :  { %345 = vadd.xlane.f32.xlu0 %v344_v22  ;;  %v579_v35 = vpop.xlane.xlu1 %578 }
 0x2b7   :  { %v581_v40 = vsub.f32 %v571_v2, %v579_v35  ;;  %4102 = vpow2.f32 %v582_v41  ;;  %v4058_v35 = vld [vmem:[%s5088_s4 + $0x18] sm:$0xff]   ;;  %v4059_v41 = vld [vmem:[%s5088_s4 + $0x10] sm:$0xff]  }
 0x2b8   :  { %v4097_v43 = vpop.eup %4096  ;;  %3714 = vmatpush3.bf16.msra.mxu1 %v4058_v35 }
 0x2b9   :  { %v584_v42 = vmul.f32 1.442695, %v581_v40  ;;  %v347_v45 = vsel %vm210_vm11, %v4097_v43, 0.0  ;;  %3715 = vmatprep.subr.bf16.mxu1 %v4264_v1 }
 0x2bb   :  { %4104 = vpow2.f32 %v584_v42 }
 0x2bc   :  { %v4099_v44 = vpop.eup %4098  ;;  %3716 = vmatpush3.bf16.msra.mxu1 %v4059_v41 }
 0x2bd   :  { %v465_v49 = vsel %vm210_vm11, %v4099_v44, 0.0  ;;  %3729 = vmatprep.subr.bf16.mxu1 %v4264_v1 }
 0x2c0   :  { %v4101_v46 = vpop.eup %4100 }
 0x2c1   :  { %v468_v48 = vsel %vm210_vm11, %v4101_v46, 0.0 }
 0x2c3   :  { %355 = vrot.lane.b32.xlu1 %v4350_v13, %s4274_s3 }
 0x2c4   :  { %v4438_v47 = vpop.eup %4102 }
 0x2c5   :  { %v586_v52 = vsel %vm210_vm11, %v4438_v47, 0.0 }
 0x2c8   :  { %v4105_v50 = vpop.eup %4104 }
 0x2c9   :  { %v589_v51 = vsel %vm210_vm11, %v4105_v50, 0.0 }
 0x2cc   :  { %234 = vrot.lane.b32.xlu0 %v4350_v13, %s4275_s15 }
 0x2e7   :  { %348 = vadd.xlane.f32.xlu1 %v347_v45 }
 0x2eb   :  { %469 = vadd.xlane.f32.xlu1 %v468_v48  ;;  %466 = vadd.xlane.f32.xlu0 %v465_v49 }
 0x2ef   :  { %590 = vadd.xlane.f32.xlu1 %v589_v51  ;;  %587 = vadd.xlane.f32.xlu0 %v586_v52 }
 0x300   :  { %476 = vrot.lane.b32.xlu1 %v4350_v13, %s4276_s16 }
 0x305   :  { %597 = vrot.lane.b32.xlu0 %v4350_v13, %s4277_s17 }
 0x337   :  { %v225_v53 = vpop.xlane.xlu0 %224 }
 0x338   :  { %4106 = vrcp.f32 %v225_v53 }
 0x33b   :  { %v228_v54 = vpop.xlane.xlu1 %227 }
 0x33c   :  { %4108 = vrcp.f32 %v228_v54 }
 0x33f   :  { %v346_v55 = vpop.xlane.xlu0 %345  ;;  %v356_v62 = vpop.permute.xlu1 %355 }
 0x340   :  { %4110 = vrcp.f32 %v346_v55 }
 0x343   :  { %v235_v56 = vpop.permute.xlu0 %234 }
 0x344   :  { %3672 = vmatpush3.bf16.msra.mxu0 %v235_v56 }
 0x345   :  { %3683 = vmatprep.subr.bf16.mxu0 %v4264_v1  ;;  %v4107_v57 = vpop.eup %4106 }
 0x346   :  { %v231_v59 = vmul.f32 %v4107_v57, %v4091_v17 }
 0x349   :  { %v4109_v58 = vpop.eup %4108 }
 0x34a   :  { %v232_v60 = vmul.f32 %v4109_v58, %v4093_v19 }
 0x34c   :  { %v233_v61 = vpack.c.bf16 %v232_v60, %v231_v59 }
 0x34d   :  { %v4111_v6 = vpop.eup %4110 }
 0x34e   :  { %3674 = vmatmul.mubr.msk.bf16.vlgmr.msra.gmra.mxu0 %vm210_vm11, %v233_v61  ;;  %v352_v8 = vmul.f32 %v4111_v6, %v4429_v21 }
 0x34f   :  { %3684 = vmatpush3.bf16.msra.mxu0 %v356_v62  ;;  %3685 = vmatprep.mubr.msk.bf16.mxu0 %vm4265_vm0, %v4264_v1 }
 0x350   :  { %3695 = vmatprep.subr.bf16.mxu0 %v4264_v1 }
 0x370   :  { %v349_v13 = vpop.xlane.xlu1 %348 }
 0x371   :  { %4112 = vrcp.f32 %v349_v13 }
 0x374   :  { %v470_v63 = vpop.xlane.xlu1 %469  ;;  %v467_v0 = vpop.xlane.xlu0 %466 }
 0x375   :  { %4114 = vrcp.f32 %v470_v63 }
 0x376   :  { %4116 = vrcp.f32 %v467_v0 }
 0x378   :  { %v591_v2 = vpop.xlane.xlu1 %590  ;;  %v588_v5 = vpop.xlane.xlu0 %587 }
 0x379   :  { %4118 = vrcp.f32 %v591_v2  ;;  %v3449_v2 = vld [vmem:[%s5089_s5 + $0x1] ss:$0 sm:$0xff] }
 0x37a   :  { %4120 = vrcp.f32 %v588_v5 }
 0x37c   :  { %v477_v14 = vpop.permute.xlu1 %476  ;;  %v598_v20 = vpop.permute.xlu0 %597 }
 0x37e   :  { %v4113_v7 = vpop.eup %4112 }
 0x37f   :  { %v353_v9 = vmul.f32 %v4113_v7, %v4097_v43 }
 0x381   :  { %v354_v10 = vpack.c.bf16 %v353_v9, %v352_v8 }
 0x382   :  { %v4115_v11 = vpop.eup %4114 }
 0x383   :  { %v4117_v12 = vpop.eup %4116  ;;  %3686 = vmatmul.mubr.msk.bf16.vlgmr.msra.gmra.mxu0 %vm210_vm11, %v354_v10  ;;  %v474_v16 = vmul.f32 %v4115_v11, %v4101_v46 }
 0x384   :  { %3696 = vmatpush3.bf16.msra.mxu0 %v477_v14  ;;  %3697 = vmatprep.mubr.msk.bf16.mxu0 %vm4265_vm0, %v4264_v1  ;;  %v473_v15 = vmul.f32 %v4117_v12, %v4099_v44 }
 0x385   :  { %3707 = vmatprep.subr.bf16.mxu0 %v4264_v1 }
 0x386   :  { %v4119_v17 = vpop.eup %4118  ;;  %v475_v18 = vpack.c.bf16 %v474_v16, %v473_v15 }
 0x387   :  { %v4121_v19 = vpop.eup %4120  ;;  %v595_v22 = vmul.f32 %v4119_v17, %v4105_v50 }
 0x388   :  { %v594_v21 = vmul.f32 %v4121_v19, %v4438_v47 }
 0x38a   :  { %v596_v23 = vpack.c.bf16 %v595_v22, %v594_v21 }
 0x38b   :  { %3698 = vmatmul.mubr.msk.bf16.vlgmr.msra.gmra.mxu0 %vm210_vm11, %v475_v18 }
 0x38c   :  { %3708 = vmatpush3.bf16.msra.mxu0 %v598_v20  ;;  %3709 = vmatprep.mubr.msk.bf16.mxu0 %vm4265_vm0, %v4264_v1 }
 0x38d   :  { %3721 = vmatprep.subr.bf16.mxu0 %v4264_v1 }
 0x393   :  { %3710 = vmatmul.mubr.msk.bf16.vlgmr.msra.gmra.mxu0 %vm210_vm11, %v596_v23 }
 0x394   :  { %3725 = vmatprep.mubr.msk.bf16.mxu0 %vm4265_vm0, %v4264_v1 }
 0x40e   :  { %v274_v24 = vpop.f32.mrf.mxu0 }
 0x410   :  { %v3675_v25 = vpop.f32.mrf.mxu0 }
 0x411   :  { %v4061_v25 = vld [vmem:[%s5088_s4 + $0x30] sm:$0xff]  }
 0x412   :  { %v277_v26 = vpop.f32.mrf.mxu0 }
 0x414   :  { %v3676_v28 = vpop.f32.mrf.mxu0 }
 0x415   :  { %v28_v28 = vld [vmem:[%s5085_s1 + $0x8] sm:$0xff] }
 0x443   :  { %v395_v31 = vpop.f32.mrf.mxu0 }
 0x445   :  { %v3687_v32 = vpop.f32.mrf.mxu0 }
 0x446   :  { %v4062_v32 = vld [vmem:[%s5088_s4 + $0x28] sm:$0xff]  }
 0x447   :  { %v398_v34 = vpop.f32.mrf.mxu0  ;;  %3722 = vmatpush3.bf16.msra.mxu0 %v4062_v32 }
 0x448   :  { %v3996_v36 = vpack.i.bf16 %v398_v34, %v395_v31  ;;  %v4063_v34 = vld [vmem:[%s5088_s4 + $0x20] sm:$0xff]   ;;  %3723 = vmatprep.subr.bf16.mxu0 %v4264_v1 }
 0x449   :  { %v3688_v38 = vpop.f32.mrf.mxu0 }
 0x44a   :  { %3997 = vrot.lane.b32.xlu1 %v3996_v36, %s4278_s20 }
 0x44b   :  { %v516_v39 = vpop.f32.mrf.mxu0  ;;  %3724 = vmatpush3.bf16.msra.mxu0 %v4063_v34 }
 0x44c   :  { %3737 = vmatprep.subr.bf16.mxu0 %v4264_v1 }
 0x44d   :  { %v3699_v40 = vpop.f32.mrf.mxu0 }
 0x44f   :  { %v519_v42 = vpop.f32.mrf.mxu0 }
 0x450   :  { %v4001_v43 = vpack.i.bf16 %v519_v42, %v516_v39 }
 0x451   :  { %v3700_v44 = vpop.f32.mrf.mxu0 }
 0x452   :  { %4002 = vrot.lane.b32.xlu0 %v4001_v43, %s4279_s23  ;;  %v3453_v44 = vld [vmem:[%s5089_s5 + $0x2] ss:$0 sm:$0xff] }
 0x453   :  { %v637_v45 = vpop.f32.mrf.mxu0 }
 0x455   :  { %v3711_v46 = vpop.f32.mrf.mxu0 }
 0x457   :  { %v640_v47 = vpop.f32.mrf.mxu0 }
 0x458   :  { %v4006_v48 = vpack.i.bf16 %v640_v47, %v637_v45 }
 0x459   :  { %v3712_v49 = vpop.f32.mrf.mxu0 }
 0x45a   :  { %4007 = vrot.lane.b32.xlu1 %v4006_v48, %s4280_s24  ;;  %v3454_v48 = vld [vmem:[%s5089_s5 + $0x3] ss:$0 sm:$0xff] }
 0x4bc   :  { %v3998_v50 = vpop.permute.xlu1 %3997 }
 0x4bd   :  { %v4000_v52 = vunpack.i.h.bf16 %v3998_v50  ;;  %v3999_v53 = vunpack.i.l.bf16 %v3998_v50 }
 0x4bf   :  { %v669_v57 = vsel %vm162_vm2, %v277_v26, %v4000_v52  ;;  %v668_v58 = vsel %vm162_vm2, %v274_v24, %v3999_v53  ;;  %v27_v26 = vld [vmem:[%s5085_s1] sm:$0xff] }
 0x4c0   :  { %v4509_v31 = vpack.c.bf16 %v28_v28, %v27_v26  ;;  %v3459_v53 = vld [vmem:[%s5089_s5 + $0x5] ss:$0 sm:$0xff] }
 0x4c4   :  { %v4003_v51 = vpop.permute.xlu0 %4002 }
 0x4c5   :  { %v4005_v54 = vunpack.i.h.bf16 %v4003_v51  ;;  %v4004_v55 = vunpack.i.l.bf16 %v4003_v51 }
 0x4c7   :  { %v671_v61 = vsel %vm210_vm11, %v669_v57, %v4005_v54  ;;  %v670_v62 = vsel %vm210_vm11, %v668_v58, %v4004_v55 }
 0x4cc   :  { %v4008_v56 = vpop.permute.xlu1 %4007 }
 0x4cd   :  { %v4010_v59 = vunpack.i.h.bf16 %v4008_v56  ;;  %v4009_v60 = vunpack.i.l.bf16 %v4008_v56 }
 0x4cf   :  { %v674_v13 = vsel %vm672_vm12, %v671_v61, %v4010_v59  ;;  %v673_v63 = vsel %vm672_vm12, %v670_v62, %v4009_v60 }
 0x4d0   :  { %v675_v0 = vpack.c.bf16 %v674_v13, %v673_v63  ;;  %v3455_v13 = vld [vmem:[%s5089_s5 + $0x4] ss:$0 sm:$0xff] }
 0x4d2   :  { %3718 = vmatmul.mubr.msk.bf16.vlgmr.msra.gmra.mxu1 %vm108_vm1, %v675_v0 }
 0x4d3   :  { %3733 = vmatprep.mubr.msk.bf16.mxu1 %vm4265_vm0, %v4264_v1 }
 0x592   :  { %v729_v5 = vpop.f32.mrf.mxu1 }
 0x593   :  { %v730_v6 = vadd.f32 %v3449_v2, %v729_v5 }
 0x594   :  { %v3719_v7 = vpop.f32.mrf.mxu1 }
 0x595   :  { %v738_v8 = vadd.f32 %v730_v6, %v4331_v3 }
 0x596   :  { %v732_v9 = vpop.f32.mrf.mxu1 }
 0x597   :  { %v733_v10 = vadd.f32 %v3449_v2, %v732_v9  ;;  %v740_v11 = vsel %vm108_vm1, %v738_v8, 0.0 }
 0x598   :  { %741 = vadd.xlane.f32.xlu0 %v740_v11  ;;  %v3720_v12 = vpop.f32.mrf.mxu1 }
 0x599   :  { %v739_v14 = vadd.f32 %v733_v10, %v4336_v4  ;;  %v4060_v4 = vld [vmem:[%s5088_s4 + $0x38] sm:$0xff]  }
 0x59a   :  { %3730 = vmatpush3.bf16.msra.mxu1 %v4060_v4 }
 0x59b   :  { %v743_v15 = vsel %vm108_vm1, %v739_v14, 0.0  ;;  %3731 = vmatprep.subr.bf16.mxu1 %v4264_v1 }
 0x59c   :  { %744 = vadd.xlane.f32.xlu1 %v743_v15 }
 0x59e   :  { %3732 = vmatpush3.bf16.msra.mxu1 %v4061_v25 }
 0x59f   :  { %3743 = vmatprep.subr.bf16.mxu1 %v4264_v1 }
 0x5a1   :  { %3734 = vmatmul.mubr.msk.bf16.vlgmr.msra.gmra.mxu1 %vm108_vm1, %v4509_v31 }
 0x5a2   :  { %3745 = vmatprep.mubr.msk.bf16.mxu1 %vm4265_vm0, %v4264_v1 }
 0x621   :  { %v742_v16 = vpop.xlane.xlu0 %741 }
 0x622   :  { %v747_v17 = vmul.f32 0.03125, %v742_v16 }
 0x624   :  { %v749_v18 = vsub.f32 %v738_v8, %v747_v17 }
 0x625   :  { %v745_v19 = vpop.xlane.xlu1 %744 }
 0x626   :  { %v748_v20 = vmul.f32 0.03125, %v745_v19  ;;  %v751_v21 = vmul.f32 %v749_v18, %v749_v18  ;;  %v3436_v19 = vld [vmem:[%s5086_s2] ss:$0 sm:$0xff] }
 0x628   :  { %v750_v22 = vsub.f32 %v739_v14, %v748_v20  ;;  %v753_v3 = vsel %vm108_vm1, %v751_v21, 0.0  ;;  %v76_v21 = vsel %vm4395_vm8, 0.0, %v4273_v30 }
 0x629   :  { %754 = vadd.xlane.f32.xlu0 %v753_v3 }
 0x62a   :  { %v752_v23 = vmul.f32 %v750_v22, %v750_v22 }
 0x62c   :  { %v756_v24 = vsel %vm108_vm1, %v752_v23, 0.0  ;;  %v4589_v23 = vadd.f32 %v3436_v19, %v76_v21 }
 0x62d   :  { %757 = vadd.xlane.f32.xlu0 %v756_v24 }
 0x661   :  { %v904_v54 = vpop.f32.mrf.mxu1 }
 0x662   :  { %v905_v56 = vadd.f32 %v3459_v53, %v904_v54 }
 0x663   :  { %v3735_v55 = vpop.f32.mrf.mxu1 }
 0x665   :  { %v907_v57 = vpop.f32.mrf.mxu1 }
 0x666   :  { %v908_v58 = vadd.f32 %v3459_v53, %v907_v57 }
 0x667   :  { %v3736_v59 = vpop.f32.mrf.mxu1 }
 0x668   :  { %v4542_v60 = vpack.c.bf16 %v908_v58, %v905_v56 }
 0x66a   :  { %1039 = vrot.lane.b32.xlu1 %v4542_v60, %s4266_s30  ;;  %v922_v61 = vsel %vm162_vm2, %v4542_v60, 0 }
 0x66e   :  { %1160 = vrot.lane.b32.xlu1 %v4542_v60, %s4271_s11 }
 0x6b2   :  { %v755_v35 = vpop.xlane.xlu0 %754 }
 0x6b3   :  { %v759_v36 = vmul.f32 0.03125, %v755_v35 }
 0x6b5   :  { %v761_v38 = vadd.f32 1e-06, %v759_v36 }
 0x6b6   :  { %v758_v39 = vpop.xlane.xlu0 %757 }
 0x6b7   :  { %4122 = vrsqrt.f32 %v761_v38  ;;  %v760_v40 = vmul.f32 0.03125, %v758_v39 }
 0x6b9   :  { %v762_v41 = vadd.f32 1e-06, %v760_v40 }
 0x6bb   :  { %4124 = vrsqrt.f32 %v762_v41 }
 0x6c4   :  { %v4123_v42 = vpop.eup %4122 }
 0x6c5   :  { %v765_v43 = vmul.f32 %v4123_v42, %v749_v18  ;;  %v75_v18 = vsel %vm43_vm3, 0.0, %v4273_v30 }
 0x6c6   :  { %v4583_v20 = vadd.f32 %v3436_v19, %v75_v18 }
 0x6c7   :  { %v771_v47 = vmul.f32 %v3453_v44, %v765_v43 }
 0x6c8   :  { %v4125_v45 = vpop.eup %4124 }
 0x6c9   :  { %v766_v46 = vmul.f32 %v4125_v45, %v750_v22  ;;  %v4530_v50 = vadd.f32 %v3454_v48, %v771_v47 }
 0x6cb   :  { %v772_v49 = vmul.f32 %v3453_v44, %v766_v46 }
 0x6cd   :  { %v4532_v51 = vadd.f32 %v3454_v48, %v772_v49 }
 0x6cf   :  { %v779_v52 = vpack.c.bf16 %v4532_v51, %v4530_v50 }
 0x6d1   :  { %3726 = vmatmul.mubr.msk.bf16.vlgmr.msra.gmra.mxu0 %vm108_vm1, %v779_v52 }
 0x6d2   :  { %3739 = vmatprep.mubr.msk.bf16.mxu0 %vm4265_vm0, %v4264_v1  ;;  %3738 = vmatpush3.bf16.xpose.msra.mxu0 %v922_v61 }
 0x6d3   :  { %3749 = vmatprep.subr.bf16.mxu0 %v4264_v1 }
 0x6dc   :  { %v1040_v8 = vpop.permute.xlu1 %1039 }
 0x6dd   :  { %v1045_v9 = vsel %vm162_vm2, %v1040_v8, 0 }
 0x6e0   :  { %v1161_v10 = vpop.permute.xlu1 %1160 }
 0x6e1   :  { %v1166_v12 = vsel %vm162_vm2, %v1161_v10, 0 }
 0x791   :  { %v838_v62 = vpop.f32.mrf.mxu0 }
 0x792   :  { %v839_v2 = vadd.f32 %v3455_v13, %v838_v62 }
 0x793   :  { %v3727_v63 = vpop.f32.mrf.mxu0 }
 0x795   :  { %v841_v0 = vpop.f32.mrf.mxu0 }
 0x796   :  { %v842_v5 = vadd.f32 %v3455_v13, %v841_v0 }
 0x797   :  { %v3728_v6 = vpop.f32.mrf.mxu0 }
 0x798   :  { %v916_v7 = vpack.c.bf16 %v842_v5, %v839_v2 }
 0x79a   :  { %1158 = vrot.lane.b32.xlu1 %v916_v7, %s4271_s11  ;;  %1037 = vrot.lane.b32.xlu0 %v916_v7, %s4266_s30 }
 0x79b   :  { %3740 = vmatmul.mubr.msk.bf16.vlgmr.msra.gmra.mxu0 %vm162_vm2, %v916_v7 }
 0x79c   :  { %3750 = vmatpush3.bf16.xpose.msra.mxu0 %v1045_v9  ;;  %3751 = vmatprep.mubr.msk.bf16.mxu0 %vm4265_vm0, %v4264_v1 }
 0x79d   :  { %3761 = vmatprep.subr.bf16.mxu0 %v4264_v1 }
 0x79e   :  { %1279 = vrot.lane.b32.xlu1 %v916_v7, %s4272_s12  ;;  %1281 = vrot.lane.b32.xlu0 %v4542_v60, %s4272_s12 }
 0x80c   :  { %v1038_v11 = vpop.permute.xlu0 %1037  ;;  %v1159_v15 = vpop.permute.xlu1 %1158 }
 0x80d   :  { %3752 = vmatmul.mubr.msk.bf16.vlgmr.msra.gmra.mxu0 %vm162_vm2, %v1038_v11 }
 0x80e   :  { %3762 = vmatpush3.bf16.xpose.msra.mxu0 %v1166_v12  ;;  %3763 = vmatprep.mubr.msk.bf16.mxu0 %vm4265_vm0, %v4264_v1 }
 0x80f   :  { %3773 = vmatprep.subr.bf16.mxu0 %v4264_v1 }
 0x810   :  { %v1282_v14 = vpop.permute.xlu0 %1281  ;;  %v1280_v17 = vpop.permute.xlu1 %1279 }
 0x811   :  { %v1287_v16 = vsel %vm162_vm2, %v1282_v14, 0 }
 0x815   :  { %3764 = vmatmul.mubr.msk.bf16.vlgmr.msra.gmra.mxu0 %vm162_vm2, %v1159_v15 }
 0x816   :  { %3774 = vmatpush3.bf16.xpose.msra.mxu0 %v1287_v16  ;;  %3775 = vmatprep.mubr.msk.bf16.mxu0 %vm4265_vm0, %v4264_v1 }
 0x817   :  { %3785 = vmatprep.subr.bf16.mxu0 %v4264_v1 }
 0x81d   :  { %3776 = vmatmul.mubr.msk.bf16.vlgmr.msra.gmra.mxu0 %vm162_vm2, %v1280_v17 }
 0x81e   :  { %3789 = vmatprep.mubr.msk.bf16.mxu0 %vm4265_vm0, %v4264_v1 }
 0x85b   :  { %v958_v22 = vpop.f32.mrf.mxu0 }
 0x85c   :  { %v959_v3 = vadd.f32 %v958_v22, %v4583_v20 }
 0x85d   :  { %v3741_v24 = vpop.f32.mrf.mxu0 }
 0x85e   :  { %v965_v4 = vsel %vm210_vm11, %v959_v3, -inf }
 0x85f   :  { %966 = vmax.xlane.f32.xlu0 %v965_v4  ;;  %v961_v27 = vpop.f32.mrf.mxu0 }
 0x860   :  { %v962_v25 = vadd.f32 %v961_v27, %v4589_v23 }
 0x861   :  { %v3742_v26 = vpop.f32.mrf.mxu0 }
 0x862   :  { %v968_v28 = vsel %vm210_vm11, %v962_v25, -inf }
 0x863   :  { %969 = vmax.xlane.f32.xlu1 %v968_v28 }
 0x8cd   :  { %v1081_v32 = vpop.f32.mrf.mxu0 }
 0x8ce   :  { %v1082_v29 = vadd.f32 %v1081_v32, %v4583_v20 }
 0x8cf   :  { %v3753_v30 = vpop.f32.mrf.mxu0 }
 0x8d0   :  { %v1088_v34 = vsel %vm210_vm11, %v1082_v29, -inf }
 0x8d1   :  { %1089 = vmax.xlane.f32.xlu0 %v1088_v34  ;;  %v1084_v35 = vpop.f32.mrf.mxu0 }
 0x8d2   :  { %v1085_v36 = vadd.f32 %v1084_v35, %v4589_v23 }
 0x8d3   :  { %v3754_v38 = vpop.f32.mrf.mxu0 }
 0x8d4   :  { %v1091_v39 = vsel %vm210_vm11, %v1085_v36, -inf }
 0x8d5   :  { %1092 = vmax.xlane.f32.xlu0 %v1091_v39  ;;  %v1202_v40 = vpop.f32.mrf.mxu0 }
 0x8d6   :  { %v1203_v41 = vadd.f32 %v1202_v40, %v4583_v20 }
 0x8d7   :  { %v3765_v42 = vpop.f32.mrf.mxu0 }
 0x8d8   :  { %v1209_v43 = vsel %vm210_vm11, %v1203_v41, -inf }
 0x8d9   :  { %1210 = vmax.xlane.f32.xlu1 %v1209_v43  ;;  %v1205_v44 = vpop.f32.mrf.mxu0 }
 0x8da   :  { %v1206_v45 = vadd.f32 %v1205_v44, %v4589_v23 }
 0x8db   :  { %v3766_v46 = vpop.f32.mrf.mxu0 }
 0x8dc   :  { %v1212_v47 = vsel %vm210_vm11, %v1206_v45, -inf }
 0x8dd   :  { %1213 = vmax.xlane.f32.xlu0 %v1212_v47  ;;  %v1323_v48 = vpop.f32.mrf.mxu0 }
 0x8de   :  { %v1324_v49 = vadd.f32 %v1323_v48, %v4583_v20 }
 0x8df   :  { %v3777_v52 = vpop.f32.mrf.mxu0 }
 0x8e0   :  { %v1330_v53 = vsel %vm210_vm11, %v1324_v49, -inf }
 0x8e1   :  { %1331 = vmax.xlane.f32.xlu1 %v1330_v53  ;;  %v1326_v54 = vpop.f32.mrf.mxu0 }
 0x8e2   :  { %v1327_v55 = vadd.f32 %v1326_v54, %v4589_v23 }
 0x8e3   :  { %v3778_v56 = vpop.f32.mrf.mxu0 }
 0x8e4   :  { %v1333_v57 = vsel %vm210_vm11, %v1327_v55, -inf }
 0x8e5   :  { %1334 = vmax.xlane.f32.xlu0 %v1333_v57 }
 0x8e8   :  { %v967_v62 = vpop.xlane.xlu0 %966 }
 0x8e9   :  { %v971_v13 = vsub.f32 %v959_v3, %v967_v62 }
 0x8eb   :  { %v973_v2 = vmul.f32 1.442695, %v971_v13 }
 0x8ec   :  { %v970_v58 = vpop.xlane.xlu1 %969 }
 0x8ed   :  { %v972_v59 = vsub.f32 %v962_v25, %v970_v58 }
 0x8ef   :  { %v975_v61 = vmul.f32 1.442695, %v972_v59 }
 0x8f1   :  { %4126 = vpow2.f32 %v975_v61 }
 0x8f2   :  { %989 = vrot.lane.b32.xlu1 %v4542_v60, %s4267_s7  ;;  %4128 = vpow2.f32 %v973_v2 }
 0x8fe   :  { %v4608_v63 = vpop.eup %4126 }
 0x8ff   :  { %v980_v0 = vsel %vm210_vm11, %v4608_v63, 0.0  ;;  %v4129_v5 = vpop.eup %4128 }
 0x900   :  { %981 = vadd.xlane.f32.xlu0 %v980_v0  ;;  %v977_v6 = vsel %vm210_vm11, %v4129_v5, 0.0 }
 0x916   :  { %978 = vadd.xlane.f32.xlu1 %v977_v6 }
 0x95a   :  { %v1090_v7 = vpop.xlane.xlu0 %1089 }
 0x95b   :  { %v1094_v8 = vsub.f32 %v1082_v29, %v1090_v7 }
 0x95d   :  { %v1096_v9 = vmul.f32 1.442695, %v1094_v8 }
 0x95e   :  { %v1093_v10 = vpop.xlane.xlu0 %1092 }
 0x95f   :  { %4130 = vpow2.f32 %v1096_v9  ;;  %v1095_v11 = vsub.f32 %v1085_v36, %v1093_v10 }
 0x961   :  { %v1098_v12 = vmul.f32 1.442695, %v1095_v11 }
 0x962   :  { %v1211_v14 = vpop.xlane.xlu1 %1210 }
 0x963   :  { %4132 = vpow2.f32 %v1098_v12  ;;  %v1215_v15 = vsub.f32 %v1203_v41, %v1211_v14 }
 0x965   :  { %v1217_v16 = vmul.f32 1.442695, %v1215_v15 }
 0x966   :  { %v1214_v17 = vpop.xlane.xlu0 %1213 }
 0x967   :  { %4134 = vpow2.f32 %v1217_v16  ;;  %v1216_v18 = vsub.f32 %v1206_v45, %v1214_v17 }
 0x969   :  { %v1219_v19 = vmul.f32 1.442695, %v1216_v18 }
 0x96a   :  { %v1332_v21 = vpop.xlane.xlu1 %1331 }
 0x96b   :  { %4136 = vpow2.f32 %v1219_v19  ;;  %v1336_v22 = vsub.f32 %v1324_v49, %v1332_v21 }
 0x96c   :  { %v4131_v3 = vpop.eup %4130 }
 0x96d   :  { %v1338_v24 = vmul.f32 1.442695, %v1336_v22  ;;  %v1100_v4 = vsel %vm210_vm11, %v4131_v3, 0.0  ;;  %v4064_v22 = vld [vmem:[%s5088_s4 + $0x48] sm:$0xff]  }
 0x96e   :  { %1101 = vadd.xlane.f32.xlu1 %v1100_v4  ;;  %v990_v27 = vpop.permute.xlu1 %989  ;;  %v1335_v25 = vpop.xlane.xlu0 %1334  ;;  %3786 = vmatpush3.bf16.msra.mxu0 %v4064_v22 }
 0x96f   :  { %4138 = vpow2.f32 %v1338_v24  ;;  %v1337_v26 = vsub.f32 %v1327_v55, %v1335_v25  ;;  %3744 = vmatpush3.bf16.msra.mxu1 %v990_v27  ;;  %3787 = vmatprep.subr.bf16.mxu0 %v4264_v1  ;;  %v4065_v25 = vld [vmem:[%s5088_s4 + $0x40] sm:$0xff]  }
 0x970   :  { %v4133_v28 = vpop.eup %4132  ;;  %3755 = vmatprep.subr.bf16.mxu1 %v4264_v1 }
 0x971   :  { %v1340_v32 = vmul.f32 1.442695, %v1337_v26  ;;  %v1103_v29 = vsel %vm210_vm11, %v4133_v28, 0.0 }
 0x972   :  { %1104 = vadd.xlane.f32.xlu0 %v1103_v29  ;;  %3788 = vmatpush3.bf16.msra.mxu0 %v4065_v25 }
 0x973   :  { %4140 = vpow2.f32 %v1340_v32  ;;  %3801 = vmatprep.subr.bf16.mxu0 %v4264_v1 }
 0x974   :  { %v4135_v30 = vpop.eup %4134 }
 0x975   :  { %v1221_v34 = vsel %vm210_vm11, %v4135_v30, 0.0 }
 0x976   :  { %1222 = vadd.xlane.f32.xlu1 %v1221_v34 }
 0x978   :  { %v4137_v35 = vpop.eup %4136 }
 0x979   :  { %v1224_v36 = vsel %vm210_vm11, %v4137_v35, 0.0 }
 0x97a   :  { %1225 = vadd.xlane.f32.xlu0 %v1224_v36 }
 0x97c   :  { %v4139_v38 = vpop.eup %4138 }
 0x97d   :  { %v1342_v39 = vsel %vm210_vm11, %v4139_v38, 0.0 }
 0x97e   :  { %1343 = vadd.xlane.f32.xlu1 %v1342_v39 }
 0x980   :  { %v4141_v40 = vpop.eup %4140 }
 0x981   :  { %v1345_v41 = vsel %vm210_vm11, %v4141_v40, 0.0 }
 0x982   :  { %1346 = vadd.xlane.f32.xlu0 %v1345_v41 }
 0x989   :  { %v982_v42 = vpop.xlane.xlu0 %981 }
 0x98a   :  { %4142 = vrcp.f32 %v982_v42 }
 0x98f   :  { %1232 = vrot.lane.b32.xlu1 %v4542_v60, %s4268_s8 }
 0x993   :  { %1353 = vrot.lane.b32.xlu1 %v4542_v60, %s4270_s10 }
 0x997   :  { %v4143_v44 = vpop.eup %4142 }
 0x998   :  { %1111 = vrot.lane.b32.xlu0 %v4542_v60, %s4269_s9  ;;  %v986_v47 = vmul.f32 %v4143_v44, %v4608_v63 }
 0x99f   :  { %v979_v43 = vpop.xlane.xlu1 %978 }
 0x9a0   :  { %4144 = vrcp.f32 %v979_v43 }
 0x9ad   :  { %v4145_v45 = vpop.eup %4144 }
 0x9ae   :  { %v985_v46 = vmul.f32 %v4145_v45, %v4129_v5 }
 0x9b0   :  { %v987_v48 = vpack.c.bf16 %v986_v47, %v985_v46 }
 0x9b2   :  { %3746 = vmatmul.mubr.msk.bf16.vlgmr.msra.gmra.mxu1 %vm210_vm11, %v987_v48 }
 0x9b3   :  { %3757 = vmatprep.mubr.msk.bf16.mxu1 %vm4265_vm0, %v4264_v1 }
 0x9f7   :  { %v1102_v52 = vpop.xlane.xlu1 %1101 }
 0x9fb   :  { %v1105_v49 = vpop.xlane.xlu0 %1104 }
 0x9fc   :  { %4146 = vrcp.f32 %v1105_v49 }
 0x9fd   :  { %4148 = vrcp.f32 %v1102_v52 }
 0x9ff   :  { %v1223_v53 = vpop.xlane.xlu1 %1222 }
 0xa03   :  { %v1226_v60 = vpop.xlane.xlu0 %1225 }
 0xa04   :  { %4150 = vrcp.f32 %v1226_v60 }
 0xa05   :  { %4152 = vrcp.f32 %v1223_v53 }
 0xa07   :  { %v1344_v57 = vpop.xlane.xlu1 %1343 }
 0xa09   :  { %v4147_v54 = vpop.eup %4146 }
 0xa0a   :  { %v4149_v56 = vpop.eup %4148  ;;  %v1109_v58 = vmul.f32 %v4147_v54, %v4133_v28 }
 0xa0b   :  { %v1347_v55 = vpop.xlane.xlu0 %1346  ;;  %v1108_v61 = vmul.f32 %v4149_v56, %v4131_v3  ;;  %v1233_v63 = vpop.permute.xlu1 %1232 }
 0xa0c   :  { %4154 = vrcp.f32 %v1347_v55  ;;  %v3471_v55 = vld [vmem:[%s5089_s5 + $0x6] ss:$0 sm:$0xff] }
 0xa0d   :  { %4156 = vrcp.f32 %v1344_v57  ;;  %v1110_v62 = vpack.c.bf16 %v1109_v58, %v1108_v61 }
 0xa0f   :  { %v1112_v59 = vpop.permute.xlu0 %1111  ;;  %v1354_v8 = vpop.permute.xlu1 %1353 }
 0xa10   :  { %3756 = vmatpush3.bf16.msra.mxu1 %v1112_v59 }
 0xa11   :  { %3767 = vmatprep.subr.bf16.mxu1 %v4264_v1  ;;  %v4151_v13 = vpop.eup %4150 }
 0xa12   :  { %v4153_v0 = vpop.eup %4152  ;;  %v1230_v2 = vmul.f32 %v4151_v13, %v4137_v35 }
 0xa13   :  { %3758 = vmatmul.mubr.msk.bf16.vlgmr.msra.gmra.mxu1 %vm210_vm11, %v1110_v62  ;;  %v1229_v5 = vmul.f32 %v4153_v0, %v4135_v30 }
 0xa14   :  { %3768 = vmatpush3.bf16.msra.mxu1 %v1233_v63  ;;  %3769 = vmatprep.mubr.msk.bf16.mxu1 %vm4265_vm0, %v4264_v1 }
 0xa15   :  { %3779 = vmatprep.subr.bf16.mxu1 %v4264_v1  ;;  %v1231_v6 = vpack.c.bf16 %v1230_v2, %v1229_v5 }
 0xa19   :  { %v4155_v7 = vpop.eup %4154 }
 0xa1a   :  { %v4157_v9 = vpop.eup %4156  ;;  %v1351_v10 = vmul.f32 %v4155_v7, %v4141_v40 }
 0xa1b   :  { %3770 = vmatmul.mubr.msk.bf16.vlgmr.msra.gmra.mxu1 %vm210_vm11, %v1231_v6  ;;  %v1350_v11 = vmul.f32 %v4157_v9, %v4139_v38 }
 0xa1c   :  { %3780 = vmatpush3.bf16.msra.mxu1 %v1354_v8  ;;  %3781 = vmatprep.mubr.msk.bf16.mxu1 %vm4265_vm0, %v4264_v1 }
 0xa1d   :  { %3793 = vmatprep.subr.bf16.mxu1 %v4264_v1  ;;  %v1352_v12 = vpack.c.bf16 %v1351_v10, %v1350_v11 }
 0xa23   :  { %3782 = vmatmul.mubr.msk.bf16.vlgmr.msra.gmra.mxu1 %vm210_vm11, %v1352_v12 }
 0xa24   :  { %3797 = vmatprep.mubr.msk.bf16.mxu1 %vm4265_vm0, %v4264_v1 }
 0xa72   :  { %v1029_v14 = vpop.f32.mrf.mxu1 }
 0xa74   :  { %v3747_v15 = vpop.f32.mrf.mxu1 }
 0xa75   :  { %v4067_v15 = vld [vmem:[%s5088_s4 + $0x50] sm:$0xff]  }
 0xa76   :  { %v1032_v16 = vpop.f32.mrf.mxu1 }
 0xa78   :  { %v3748_v17 = vpop.f32.mrf.mxu1 }
 0xad3   :  { %v1151_v18 = vpop.f32.mrf.mxu1 }
 0xad5   :  { %v3759_v19 = vpop.f32.mrf.mxu1 }
 0xad7   :  { %v1154_v21 = vpop.f32.mrf.mxu1 }
 0xad8   :  { %v4011_v3 = vpack.i.bf16 %v1154_v21, %v1151_v18 }
 0xad9   :  { %v3760_v24 = vpop.f32.mrf.mxu1 }
 0xada   :  { %4012 = vrot.lane.b32.xlu0 %v4011_v3, %s4278_s20 }
 0xadb   :  { %v1272_v4 = vpop.f32.mrf.mxu1 }
 0xadd   :  { %v3771_v27 = vpop.f32.mrf.mxu1 }
 0xade   :  { %v3475_v27 = vld [vmem:[%s5089_s5 + $0x7] ss:$0 sm:$0xff] }
 0xadf   :  { %v1275_v26 = vpop.f32.mrf.mxu1 }
 0xae0   :  { %v4016_v28 = vpack.i.bf16 %v1275_v26, %v1272_v4 }
 0xae1   :  { %v3772_v32 = vpop.f32.mrf.mxu1 }
 0xae2   :  { %4017 = vrot.lane.b32.xlu1 %v4016_v28, %s4279_s23  ;;  %v3476_v32 = vld [vmem:[%s5089_s5 + $0x8] ss:$0 sm:$0xff] }
 0xae3   :  { %v1393_v29 = vpop.f32.mrf.mxu1 }
 0xae5   :  { %v3783_v30 = vpop.f32.mrf.mxu1 }
 0xae7   :  { %v1396_v34 = vpop.f32.mrf.mxu1 }
 0xae8   :  { %v4021_v35 = vpack.i.bf16 %v1396_v34, %v1393_v29 }
 0xae9   :  { %v3784_v36 = vpop.f32.mrf.mxu1 }
 0xaea   :  { %4022 = vrot.lane.b32.xlu0 %v4021_v35, %s4280_s24  ;;  %v4069_v36 = vld [vmem:[%s5088_s4 + $0x70] sm:$0xff]  }
 0xb4c   :  { %v4013_v38 = vpop.permute.xlu0 %4012 }
 0xb4d   :  { %v4015_v40 = vunpack.i.h.bf16 %v4013_v38  ;;  %v4014_v41 = vunpack.i.l.bf16 %v4013_v38  ;;  %v4070_v38 = vld [vmem:[%s5088_s4 + $0x68] sm:$0xff]  }
 0xb4f   :  { %v1425_v45 = vsel %vm162_vm2, %v1032_v16, %v4015_v40  ;;  %v1424_v46 = vsel %vm162_vm2, %v1029_v14, %v4014_v41  ;;  %v4068_v16 = vld [vmem:[%s5088_s4 + $0x78] sm:$0xff]   ;;  %v3477_v40 = vld [vmem:[%s5089_s5 + $0x9] ss:$0 sm:$0xff] }
 0xb54   :  { %v4018_v39 = vpop.permute.xlu1 %4017 }
 0xb55   :  { %v4020_v42 = vunpack.i.h.bf16 %v4018_v39  ;;  %v4019_v43 = vunpack.i.l.bf16 %v4018_v39  ;;  %v4071_v39 = vld [vmem:[%s5088_s4 + $0x60] sm:$0xff]  }
 0xb57   :  { %v1427_v49 = vsel %vm210_vm11, %v1425_v45, %v4020_v42  ;;  %v1426_v52 = vsel %vm210_vm11, %v1424_v46, %v4019_v43 }
 0xb5c   :  { %v4023_v44 = vpop.permute.xlu0 %4022 }
 0xb5d   :  { %v4025_v47 = vunpack.i.h.bf16 %v4023_v44  ;;  %v4024_v48 = vunpack.i.l.bf16 %v4023_v44 }
 0xb5f   :  { %v1429_v60 = vsel %vm672_vm12, %v1427_v49, %v4025_v47  ;;  %v1428_v53 = vsel %vm672_vm12, %v1426_v52, %v4024_v48  ;;  %v3481_v52 = vld [vmem:[%s5089_s5 + $0xa] ss:$0 sm:$0xff] }
 0xb60   :  { %v1430_v54 = vpack.c.bf16 %v1429_v60, %v1428_v53 }
 0xb62   :  { %3790 = vmatmul.mubr.msk.bf16.vlgmr.msra.gmra.mxu0 %vm108_vm1, %v1430_v54 }
 0xb63   :  { %3809 = vmatprep.mubr.msk.bf16.mxu0 %vm4265_vm0, %v4264_v1  ;;  %3802 = vmatpush3.bf16.msra.mxu0 %v4068_v16 }
 0xb64   :  { %3803 = vmatprep.subr.bf16.mxu0 %v4264_v1 }
 0xb67   :  { %3804 = vmatpush3.bf16.msra.mxu0 %v4069_v36 }
 0xb68   :  { %3805 = vmatprep.subr.bf16.mxu0 %v4264_v1 }
 0xb6b   :  { %3806 = vmatpush3.bf16.msra.mxu0 %v4070_v38 }
 0xb6c   :  { %3807 = vmatprep.subr.bf16.mxu0 %v4264_v1 }
 0xb6f   :  { %3808 = vmatpush3.bf16.msra.mxu0 %v4071_v39 }
 0xb70   :  { %3827 = vmatprep.subr.bf16.mxu0 %v4264_v1 }
 0xc22   :  { %v1484_v56 = vpop.f32.mrf.mxu0 }
 0xc23   :  { %v1485_v57 = vadd.f32 %v3471_v55, %v1484_v56 }
 0xc24   :  { %v3791_v58 = vpop.f32.mrf.mxu0 }
 0xc25   :  { %v1493_v59 = vadd.f32 %v1485_v57, %v4530_v50 }
 0xc26   :  { %v1487_v61 = vpop.f32.mrf.mxu0 }
 0xc27   :  { %v1488_v62 = vadd.f32 %v3471_v55, %v1487_v61  ;;  %v1495_v13 = vsel %vm108_vm1, %v1493_v59, 0.0 }
 0xc28   :  { %1496 = vadd.xlane.f32.xlu1 %v1495_v13  ;;  %v3792_v63 = vpop.f32.mrf.mxu0 }
 0xc29   :  { %v1494_v0 = vadd.f32 %v1488_v62, %v4532_v51  ;;  %v4066_v51 = vld [vmem:[%s5088_s4 + $0x58] sm:$0xff]  }
 0xc2a   :  { %3794 = vmatpush3.bf16.msra.mxu1 %v4066_v51 }
 0xc2b   :  { %v1498_v2 = vsel %vm108_vm1, %v1494_v0, 0.0  ;;  %3795 = vmatprep.subr.bf16.mxu1 %v4264_v1 }
 0xc2c   :  { %1499 = vadd.xlane.f32.xlu0 %v1498_v2 }
 0xc2e   :  { %3796 = vmatpush3.bf16.msra.mxu1 %v4067_v15 }
 0xc2f   :  { %3813 = vmatprep.subr.bf16.mxu1 %v4264_v1 }
 0xcb1   :  { %v1497_v5 = vpop.xlane.xlu1 %1496 }
 0xcb2   :  { %v1501_v6 = vmul.f32 0.03125, %v1497_v5 }
 0xcb4   :  { %v1503_v7 = vsub.f32 %v1493_v59, %v1501_v6 }
 0xcb5   :  { %v1500_v8 = vpop.xlane.xlu0 %1499 }
 0xcb6   :  { %v1502_v9 = vmul.f32 0.03125, %v1500_v8  ;;  %v1505_v10 = vmul.f32 %v1503_v7, %v1503_v7 }
 0xcb8   :  { %v1504_v11 = vsub.f32 %v1494_v0, %v1502_v9  ;;  %v1507_v50 = vsel %vm108_vm1, %v1505_v10, 0.0 }
 0xcb9   :  { %1508 = vadd.xlane.f32.xlu0 %v1507_v50  ;;  %v4073_v50 = vld [vmem:[%s5088_s4 + $0x80] sm:$0xff]  }
 0xcba   :  { %v1506_v12 = vmul.f32 %v1504_v11, %v1504_v11 }
 0xcbc   :  { %v1510_v14 = vsel %vm108_vm1, %v1506_v12, 0.0 }
 0xcbd   :  { %1511 = vadd.xlane.f32.xlu1 %v1510_v14 }
 0xd42   :  { %v1509_v17 = vpop.xlane.xlu0 %1508 }
 0xd43   :  { %v1513_v18 = vmul.f32 0.03125, %v1509_v17 }
 0xd45   :  { %v1515_v19 = vadd.f32 1e-06, %v1513_v18 }
 0xd46   :  { %v1512_v21 = vpop.xlane.xlu1 %1511 }
 0xd47   :  { %4158 = vrsqrt.f32 %v1515_v19  ;;  %v1514_v22 = vmul.f32 0.03125, %v1512_v21  ;;  %v3487_v21 = vld [vmem:[%s5089_s5 + $0xb] ss:$0 sm:$0xff] }
 0xd49   :  { %v1516_v3 = vadd.f32 1e-06, %v1514_v22 }
 0xd4b   :  { %4160 = vrsqrt.f32 %v1516_v3 }
 0xd54   :  { %v4159_v24 = vpop.eup %4158 }
 0xd55   :  { %v1519_v4 = vmul.f32 %v4159_v24, %v1503_v7 }
 0xd57   :  { %v1525_v28 = vmul.f32 %v3475_v27, %v1519_v4  ;;  %v3488_v4 = vld [vmem:[%s5089_s5 + $0xc] ss:$0 sm:$0xff] }
 0xd58   :  { %v4161_v25 = vpop.eup %4160 }
 0xd59   :  { %v1520_v26 = vmul.f32 %v4161_v25, %v1504_v11  ;;  %v1531_v30 = vadd.f32 %v3476_v32, %v1525_v28  ;;  %v4072_v11 = vld [vmem:[%s5088_s4 + $0x88] sm:$0xff]  }
 0xd5b   :  { %v1526_v29 = vmul.f32 %v3475_v27, %v1520_v26 }
 0xd5d   :  { %v1532_v34 = vadd.f32 %v3476_v32, %v1526_v29  ;;  %v3489_v29 = vld [vmem:[%s5089_s5 + $0xd] ss:$0 sm:$0xff] }
 0xd5f   :  { %v1547_v35 = vpack.c.bf16 %v1532_v34, %v1531_v30 }
 0xd61   :  { %3798 = vmatmul.mubr.msk.bf16.vlgmr.msra.gmra.mxu1 %vm108_vm1, %v1547_v35 }
 0xd62   :  { %3817 = vmatprep.mubr.msk.bf16.mxu1 %vm4265_vm0, %v4264_v1  ;;  %3814 = vmatpush3.bf16.msra.mxu1 %v4072_v11 }
 0xd63   :  { %3815 = vmatprep.subr.bf16.mxu1 %v4264_v1 }
 0xd66   :  { %3816 = vmatpush3.bf16.msra.mxu1 %v4073_v50 }
 0xd67   :  { %3821 = vmatprep.subr.bf16.mxu1 %v4264_v1 }
 0xe21   :  { %v1601_v41 = vpop.f32.mrf.mxu1 }
 0xe22   :  { %v1602_v43 = vadd.f32 %v3477_v40, %v1601_v41 }
 0xe23   :  { %v3799_v42 = vpop.f32.mrf.mxu1 }
 0xe24   :  { %v1608_v47 = vmax.f32 %v1602_v43, 0.0 }
 0xe25   :  { %v1604_v44 = vpop.f32.mrf.mxu1 }
 0xe26   :  { %v1605_v45 = vadd.f32 %v3477_v40, %v1604_v44 }
 0xe27   :  { %v3800_v46 = vpop.f32.mrf.mxu1 }
 0xe28   :  { %v1609_v48 = vmax.f32 %v1605_v45, 0.0 }
 0xe2a   :  { %v1610_v49 = vpack.c.bf16 %v1609_v48, %v1608_v47 }
 0xe2c   :  { %3810 = vmatmul.mubr.msk.bf16.vlgmr.msra.gmra.mxu0 %vm1639_vm13, %v1610_v49 }
 0xe2d   :  { %3829 = vmatprep.mubr.msk.bf16.mxu0 %vm4265_vm0, %v4264_v1 }
 0xeec   :  { %v1677_v60 = vpop.f32.mrf.mxu0 }
 0xeed   :  { %v1678_v53 = vadd.f32 %v3481_v52, %v1677_v60 }
 0xeee   :  { %v3811_v54 = vpop.f32.mrf.mxu0 }
 0xeef   :  { %v1686_v55 = vadd.f32 %v1678_v53, %v1531_v30 }
 0xef0   :  { %v1680_v56 = vpop.f32.mrf.mxu0 }
 0xef1   :  { %v1681_v57 = vadd.f32 %v3481_v52, %v1680_v56  ;;  %v1688_v58 = vsel %vm108_vm1, %v1686_v55, 0.0 }
 0xef2   :  { %1689 = vadd.xlane.f32.xlu0 %v1688_v58  ;;  %v3812_v59 = vpop.f32.mrf.mxu0 }
 0xef3   :  { %v1687_v61 = vadd.f32 %v1681_v57, %v1532_v34 }
 0xef5   :  { %v1691_v62 = vsel %vm108_vm1, %v1687_v61, 0.0 }
 0xef6   :  { %1692 = vadd.xlane.f32.xlu1 %v1691_v62 }
 0xf7b   :  { %v1690_v13 = vpop.xlane.xlu0 %1689 }
 0xf7c   :  { %v1694_v63 = vmul.f32 0.03125, %v1690_v13 }
 0xf7e   :  { %v1696_v0 = vsub.f32 %v1686_v55, %v1694_v63 }
 0xf7f   :  { %v1693_v2 = vpop.xlane.xlu1 %1692 }
 0xf80   :  { %v1695_v5 = vmul.f32 0.03125, %v1693_v2  ;;  %v1698_v6 = vmul.f32 %v1696_v0, %v1696_v0 }
 0xf82   :  { %v1697_v7 = vsub.f32 %v1687_v61, %v1695_v5  ;;  %v1700_v8 = vsel %vm108_vm1, %v1698_v6, 0.0 }
 0xf83   :  { %1701 = vadd.xlane.f32.xlu0 %v1700_v8 }
 0xf84   :  { %v1699_v9 = vmul.f32 %v1697_v7, %v1697_v7 }
 0xf86   :  { %v1703_v10 = vsel %vm108_vm1, %v1699_v9, 0.0 }
 0xf87   :  { %1704 = vadd.xlane.f32.xlu1 %v1703_v10 }
0x100c   :  { %v1702_v12 = vpop.xlane.xlu0 %1701 }
0x100d   :  { %v1706_v14 = vmul.f32 0.03125, %v1702_v12 }
0x100f   :  { %v1708_v51 = vadd.f32 1e-06, %v1706_v14 }
0x1010   :  { %v1705_v15 = vpop.xlane.xlu1 %1704 }
0x1011   :  { %4162 = vrsqrt.f32 %v1708_v51  ;;  %v1707_v16 = vmul.f32 0.03125, %v1705_v15 }
0x1013   :  { %v1709_v17 = vadd.f32 1e-06, %v1707_v16 }
0x1015   :  { %4164 = vrsqrt.f32 %v1709_v17 }
0x101e   :  { %v4163_v18 = vpop.eup %4162 }
0x101f   :  { %v1712_v19 = vmul.f32 %v4163_v18, %v1696_v0 }
0x1021   :  { %v1718_v24 = vmul.f32 %v3487_v21, %v1712_v19 }
0x1022   :  { %v4165_v22 = vpop.eup %4164 }
0x1023   :  { %v1713_v3 = vmul.f32 %v4165_v22, %v1697_v7  ;;  %v4731_v25 = vadd.f32 %v3488_v4, %v1718_v24 }
0x1025   :  { %v1719_v27 = vmul.f32 %v3487_v21, %v1713_v3 }
0x1027   :  { %v4733_v26 = vadd.f32 %v3488_v4, %v1719_v27 }
0x1029   :  { %v1726_v28 = vpack.c.bf16 %v4733_v26, %v4731_v25 }
0x102b   :  { %3818 = vmatmul.mubr.msk.bf16.vlgmr.msra.gmra.mxu1 %vm108_vm1, %v1726_v28 }
0x102c   :  { %3823 = vmatprep.mubr.msk.bf16.mxu1 %vm4265_vm0, %v4264_v1 }
0x10eb   :  { %v1785_v32 = vpop.f32.mrf.mxu1 }
0x10ec   :  { %v1786_v35 = vadd.f32 %v3489_v29, %v1785_v32 }
0x10ed   :  { %v3819_v30 = vpop.f32.mrf.mxu1 }
0x10ef   :  { %v1788_v34 = vpop.f32.mrf.mxu1 }
0x10f0   :  { %v1789_v36 = vadd.f32 %v3489_v29, %v1788_v34 }
0x10f1   :  { %v3820_v38 = vpop.f32.mrf.mxu1 }
0x10f2   :  { %v4743_v39 = vpack.c.bf16 %v1789_v36, %v1786_v35 }
0x10f4   :  { %1920 = vrot.lane.b32.xlu1 %v4743_v39, %s4269_s9  ;;  %1799 = vrot.lane.b32.xlu0 %v4743_v39, %s4267_s7 }
0x10f8   :  { %1918 = vrot.lane.b32.xlu1 %v4743_v39, %s4266_s30  ;;  %2041 = vrot.lane.b32.xlu0 %v4743_v39, %s4268_s8 }
0x10fc   :  { %2039 = vrot.lane.b32.xlu1 %v4743_v39, %s4271_s11  ;;  %2162 = vrot.lane.b32.xlu0 %v4743_v39, %s4270_s10 }
0x1100   :  { %2160 = vrot.lane.b32.xlu1 %v4743_v39, %s4272_s12 }
0x1166   :  { %v1800_v40 = vpop.permute.xlu0 %1799  ;;  %v1921_v42 = vpop.permute.xlu1 %1920 }
0x1167   :  { %v1805_v41 = vsel %vm162_vm2, %v1800_v40, 0  ;;  %v1926_v43 = vsel %vm162_vm2, %v1921_v42, 0 }
0x1168   :  { %3822 = vmatpush3.bf16.xpose.msra.mxu1 %v1805_v41 }
0x1169   :  { %3833 = vmatprep.subr.bf16.mxu1 %v4264_v1 }
0x116a   :  { %v2042_v44 = vpop.permute.xlu0 %2041  ;;  %v1919_v45 = vpop.permute.xlu1 %1918 }
0x116b   :  { %v2047_v46 = vsel %vm162_vm2, %v2042_v44, 0 }
0x116e   :  { %v2163_v47 = vpop.permute.xlu0 %2162  ;;  %v2040_v48 = vpop.permute.xlu1 %2039 }
0x116f   :  { %3824 = vmatmul.mubr.msk.bf16.vlgmr.msra.gmra.mxu1 %vm162_vm2, %v4743_v39  ;;  %v2168_v49 = vsel %vm162_vm2, %v2163_v47, 0 }
0x1170   :  { %3834 = vmatpush3.bf16.xpose.msra.mxu1 %v1926_v43  ;;  %3835 = vmatprep.mubr.msk.bf16.mxu1 %vm4265_vm0, %v4264_v1 }
0x1171   :  { %3845 = vmatprep.subr.bf16.mxu1 %v4264_v1 }
0x1172   :  { %v2161_v52 = vpop.permute.xlu1 %2160 }
0x1177   :  { %3836 = vmatmul.mubr.msk.bf16.vlgmr.msra.gmra.mxu1 %vm162_vm2, %v1919_v45 }
0x1178   :  { %3846 = vmatpush3.bf16.xpose.msra.mxu1 %v2047_v46  ;;  %3847 = vmatprep.mubr.msk.bf16.mxu1 %vm4265_vm0, %v4264_v1 }
0x1179   :  { %3857 = vmatprep.subr.bf16.mxu1 %v4264_v1 }
0x117f   :  { %3848 = vmatmul.mubr.msk.bf16.vlgmr.msra.gmra.mxu1 %vm162_vm2, %v2040_v48 }
0x1180   :  { %3858 = vmatpush3.bf16.xpose.msra.mxu1 %v2168_v49  ;;  %3859 = vmatprep.mubr.msk.bf16.mxu1 %vm4265_vm0, %v4264_v1 }
0x1181   :  { %3869 = vmatprep.subr.bf16.mxu1 %v4264_v1 }
0x1187   :  { %3860 = vmatmul.mubr.msk.bf16.vlgmr.msra.gmra.mxu1 %vm162_vm2, %v2161_v52 }
0x1188   :  { %3873 = vmatprep.mubr.msk.bf16.mxu1 %vm4265_vm0, %v4264_v1 }
0x122f   :  { %v1841_v60 = vpop.f32.mrf.mxu1 }
0x1230   :  { %v1842_v53 = vadd.f32 %v1841_v60, %v4406_v33 }
0x1231   :  { %v3825_v54 = vpop.f32.mrf.mxu1 }
0x1232   :  { %v1848_v55 = vsel %vm210_vm11, %v1842_v53, -inf }
0x1233   :  { %1849 = vmax.xlane.f32.xlu0 %v1848_v55  ;;  %v1844_v56 = vpop.f32.mrf.mxu1 }
0x1234   :  { %v1845_v57 = vadd.f32 %v1844_v56, %v4410_v37 }
0x1235   :  { %v3826_v58 = vpop.f32.mrf.mxu1 }
0x1236   :  { %v1851_v59 = vsel %vm210_vm11, %v1845_v57, -inf }
0x1237   :  { %1852 = vmax.xlane.f32.xlu1 %v1851_v59  ;;  %v1962_v61 = vpop.f32.mrf.mxu1 }
0x1238   :  { %v1963_v62 = vadd.f32 %v1962_v61, %v4406_v33 }
0x1239   :  { %v3837_v13 = vpop.f32.mrf.mxu1 }
0x123a   :  { %v1969_v63 = vsel %vm210_vm11, %v1963_v62, -inf }
0x123b   :  { %1970 = vmax.xlane.f32.xlu0 %v1969_v63  ;;  %v1965_v0 = vpop.f32.mrf.mxu1 }
0x123c   :  { %v1966_v2 = vadd.f32 %v1965_v0, %v4410_v37 }
0x123d   :  { %v3838_v5 = vpop.f32.mrf.mxu1 }
0x123e   :  { %v1972_v6 = vsel %vm210_vm11, %v1966_v2, -inf }
0x123f   :  { %1973 = vmax.xlane.f32.xlu0 %v1972_v6  ;;  %v2083_v7 = vpop.f32.mrf.mxu1 }
0x1240   :  { %v2084_v8 = vadd.f32 %v2083_v7, %v4406_v33 }
0x1241   :  { %v3849_v9 = vpop.f32.mrf.mxu1 }
0x1242   :  { %v2090_v10 = vsel %vm210_vm11, %v2084_v8, -inf }
0x1243   :  { %2091 = vmax.xlane.f32.xlu1 %v2090_v10  ;;  %v2086_v11 = vpop.f32.mrf.mxu1 }
0x1244   :  { %v2087_v50 = vadd.f32 %v2086_v11, %v4410_v37 }
0x1245   :  { %v3850_v12 = vpop.f32.mrf.mxu1 }
0x1246   :  { %v2093_v14 = vsel %vm210_vm11, %v2087_v50, -inf }
0x1247   :  { %2094 = vmax.xlane.f32.xlu0 %v2093_v14  ;;  %v2204_v51 = vpop.f32.mrf.mxu1 }
0x1248   :  { %v2205_v15 = vadd.f32 %v2204_v51, %v4406_v33 }
0x1249   :  { %v3861_v16 = vpop.f32.mrf.mxu1 }
0x124a   :  { %v2211_v17 = vsel %vm210_vm11, %v2205_v15, -inf }
0x124b   :  { %2212 = vmax.xlane.f32.xlu1 %v2211_v17  ;;  %v2207_v18 = vpop.f32.mrf.mxu1 }
0x124c   :  { %v2208_v19 = vadd.f32 %v2207_v18, %v4410_v37 }
0x124d   :  { %v3862_v21 = vpop.f32.mrf.mxu1 }
0x124e   :  { %v2214_v22 = vsel %vm210_vm11, %v2208_v19, -inf }
0x124f   :  { %2215 = vmax.xlane.f32.xlu0 %v2214_v22 }
0x125c   :  { %1871 = vrot.lane.b32.xlu1 %v4743_v39, %s4275_s15 }
0x12bc   :  { %v1850_v3 = vpop.xlane.xlu0 %1849 }
0x12bd   :  { %v1854_v24 = vsub.f32 %v1842_v53, %v1850_v3 }
0x12bf   :  { %v1856_v4 = vmul.f32 1.442695, %v1854_v24 }
0x12c0   :  { %v1853_v27 = vpop.xlane.xlu1 %1852 }
0x12c1   :  { %4166 = vpow2.f32 %v1856_v4  ;;  %v1855_v33 = vsub.f32 %v1845_v57, %v1853_v27 }
0x12c3   :  { %v1858_v28 = vmul.f32 1.442695, %v1855_v33 }
0x12c4   :  { %v1971_v32 = vpop.xlane.xlu0 %1970 }
0x12c5   :  { %4168 = vpow2.f32 %v1858_v28  ;;  %v1975_v29 = vsub.f32 %v1963_v62, %v1971_v32 }
0x12c7   :  { %v1977_v30 = vmul.f32 1.442695, %v1975_v29 }
0x12c8   :  { %v1974_v34 = vpop.xlane.xlu0 %1973 }
0x12c9   :  { %4170 = vpow2.f32 %v1977_v30  ;;  %v1976_v37 = vsub.f32 %v1966_v2, %v1974_v34 }
0x12cb   :  { %v1979_v35 = vmul.f32 1.442695, %v1976_v37 }
0x12cc   :  { %v2092_v36 = vpop.xlane.xlu1 %2091 }
0x12cd   :  { %4172 = vpow2.f32 %v1979_v35  ;;  %v2096_v38 = vsub.f32 %v2084_v8, %v2092_v36 }
0x12ce   :  { %v4167_v40 = vpop.eup %4166 }
0x12cf   :  { %v2098_v41 = vmul.f32 1.442695, %v2096_v38  ;;  %v1860_v42 = vsel %vm210_vm11, %v4167_v40, 0.0 }
0x12d0   :  { %v2095_v43 = vpop.xlane.xlu0 %2094  ;;  %1861 = vadd.xlane.f32.xlu1 %v1860_v42 }
0x12d1   :  { %4174 = vpow2.f32 %v2098_v41  ;;  %v2097_v44 = vsub.f32 %v2087_v50, %v2095_v43 }
0x12d2   :  { %v4169_v45 = vpop.eup %4168 }
0x12d3   :  { %v2100_v46 = vmul.f32 1.442695, %v2097_v44  ;;  %v1863_v47 = vsel %vm210_vm11, %v4169_v45, 0.0 }
0x12d4   :  { %v2213_v48 = vpop.xlane.xlu1 %2212  ;;  %1864 = vadd.xlane.f32.xlu0 %v1863_v47  ;;  %v4074_v47 = vld [vmem:[%s5088_s4 + $0x98] sm:$0xff]  }
0x12d5   :  { %4176 = vpow2.f32 %v2100_v46  ;;  %v2217_v49 = vsub.f32 %v2205_v15, %v2213_v48  ;;  %3870 = vmatpush3.bf16.msra.mxu1 %v4074_v47 }
0x12d6   :  { %v4171_v52 = vpop.eup %4170  ;;  %3871 = vmatprep.subr.bf16.mxu1 %v4264_v1 }
0x12d7   :  { %v2219_v60 = vmul.f32 1.442695, %v2217_v49  ;;  %v1981_v53 = vsel %vm210_vm11, %v4171_v52, 0.0 }
0x12d8   :  { %1982 = vadd.xlane.f32.xlu1 %v1981_v53  ;;  %v1872_v54 = vpop.permute.xlu1 %1871  ;;  %v2216_v55 = vpop.xlane.xlu0 %2215  ;;  %v4075_v53 = vld [vmem:[%s5088_s4 + $0x90] sm:$0xff]  }
0x12d9   :  { %4178 = vpow2.f32 %v2219_v60  ;;  %v2218_v56 = vsub.f32 %v2208_v19, %v2216_v55  ;;  %3828 = vmatpush3.bf16.msra.mxu0 %v1872_v54  ;;  %3872 = vmatpush3.bf16.msra.mxu1 %v4075_v53 }
0x12da   :  { %v4173_v57 = vpop.eup %4172  ;;  %3839 = vmatprep.subr.bf16.mxu0 %v4264_v1  ;;  %3885 = vmatprep.subr.bf16.mxu1 %v4264_v1 }
0x12db   :  { %v2221_v58 = vmul.f32 1.442695, %v2218_v56  ;;  %v1984_v59 = vsel %vm210_vm11, %v4173_v57, 0.0 }
0x12dc   :  { %1985 = vadd.xlane.f32.xlu0 %v1984_v59 }
0x12dd   :  { %4180 = vpow2.f32 %v2221_v58 }
0x12de   :  { %v4175_v61 = vpop.eup %4174 }
0x12df   :  { %v2102_v62 = vsel %vm210_vm11, %v4175_v61, 0.0 }
0x12e0   :  { %2103 = vadd.xlane.f32.xlu1 %v2102_v62 }
0x12e2   :  { %v4177_v13 = vpop.eup %4176 }
0x12e3   :  { %v2105_v63 = vsel %vm210_vm11, %v4177_v13, 0.0 }
0x12e4   :  { %2106 = vadd.xlane.f32.xlu0 %v2105_v63 }
0x12e6   :  { %v4179_v0 = vpop.eup %4178 }
0x12e7   :  { %v2223_v2 = vsel %vm210_vm11, %v4179_v0, 0.0 }
0x12e8   :  { %2224 = vadd.xlane.f32.xlu1 %v2223_v2 }
0x12ea   :  { %v4181_v5 = vpop.eup %4180 }
0x12eb   :  { %v2226_v6 = vsel %vm210_vm11, %v4181_v5, 0.0 }
0x12ec   :  { %2227 = vadd.xlane.f32.xlu0 %v2226_v6 }
0x12f9   :  { %2113 = vrot.lane.b32.xlu1 %v4743_v39, %s4276_s16 }
0x12fd   :  { %2234 = vrot.lane.b32.xlu1 %v4743_v39, %s4277_s17 }
0x1302   :  { %1992 = vrot.lane.b32.xlu0 %v4743_v39, %s4274_s3 }
0x1359   :  { %v1862_v7 = vpop.xlane.xlu1 %1861 }
0x135a   :  { %4182 = vrcp.f32 %v1862_v7 }
0x135d   :  { %v1865_v8 = vpop.xlane.xlu0 %1864 }
0x135e   :  { %4184 = vrcp.f32 %v1865_v8 }
0x1361   :  { %v1983_v10 = vpop.xlane.xlu1 %1982 }
0x1365   :  { %v1986_v9 = vpop.xlane.xlu0 %1985 }
0x1366   :  { %4186 = vrcp.f32 %v1986_v9 }
0x1367   :  { %v4183_v11 = vpop.eup %4182  ;;  %4188 = vrcp.f32 %v1983_v10 }
0x1368   :  { %v1868_v12 = vmul.f32 %v4183_v11, %v4167_v40 }
0x1369   :  { %v2104_v15 = vpop.xlane.xlu1 %2103 }
0x136b   :  { %v4185_v50 = vpop.eup %4184 }
0x136c   :  { %v1869_v14 = vmul.f32 %v4185_v50, %v4169_v45 }
0x136d   :  { %v2107_v51 = vpop.xlane.xlu0 %2106 }
0x136e   :  { %v1870_v16 = vpack.c.bf16 %v1869_v14, %v1868_v12  ;;  %4190 = vrcp.f32 %v2107_v51 }
0x136f   :  { %4192 = vrcp.f32 %v2104_v15 }
0x1370   :  { %3830 = vmatmul.mubr.msk.bf16.vlgmr.msra.gmra.mxu0 %vm210_vm11, %v1870_v16  ;;  %v3501_v16 = vld [vmem:[%s5089_s5 + $0xe] ss:$0 sm:$0xff] }
0x1371   :  { %3841 = vmatprep.mubr.msk.bf16.mxu0 %vm4265_vm0, %v4264_v1  ;;  %v2225_v19 = vpop.xlane.xlu1 %2224 }
0x1373   :  { %v4187_v39 = vpop.eup %4186 }
0x1374   :  { %v4189_v18 = vpop.eup %4188  ;;  %v1990_v21 = vmul.f32 %v4187_v39, %v4173_v57 }
0x1375   :  { %v2228_v17 = vpop.xlane.xlu0 %2227  ;;  %v1989_v3 = vmul.f32 %v4189_v18, %v4171_v52  ;;  %v2114_v27 = vpop.permute.xlu1 %2113 }
0x1376   :  { %4194 = vrcp.f32 %v2228_v17 }
0x1377   :  { %4196 = vrcp.f32 %v2225_v19  ;;  %v1991_v24 = vpack.c.bf16 %v1990_v21, %v1989_v3 }
0x1379   :  { %v1993_v22 = vpop.permute.xlu0 %1992  ;;  %v2235_v34 = vpop.permute.xlu1 %2234 }
0x137a   :  { %3840 = vmatpush3.bf16.msra.mxu0 %v1993_v22 }
0x137b   :  { %3851 = vmatprep.subr.bf16.mxu0 %v4264_v1  ;;  %v4191_v4 = vpop.eup %4190 }
0x137c   :  { %v4193_v33 = vpop.eup %4192  ;;  %v2111_v28 = vmul.f32 %v4191_v4, %v4177_v13 }
0x137d   :  { %3842 = vmatmul.mubr.msk.bf16.vlgmr.msra.gmra.mxu0 %vm210_vm11, %v1991_v24  ;;  %v2110_v32 = vmul.f32 %v4193_v33, %v4175_v61 }
0x137e   :  { %3852 = vmatpush3.bf16.msra.mxu0 %v2114_v27  ;;  %3853 = vmatprep.mubr.msk.bf16.mxu0 %vm4265_vm0, %v4264_v1 }
0x137f   :  { %3863 = vmatprep.subr.bf16.mxu0 %v4264_v1  ;;  %v2112_v29 = vpack.c.bf16 %v2111_v28, %v2110_v32 }
0x1383   :  { %v4195_v30 = vpop.eup %4194 }
0x1384   :  { %v4197_v37 = vpop.eup %4196  ;;  %v2232_v35 = vmul.f32 %v4195_v30, %v4181_v5 }
0x1385   :  { %3854 = vmatmul.mubr.msk.bf16.vlgmr.msra.gmra.mxu0 %vm210_vm11, %v2112_v29  ;;  %v2231_v36 = vmul.f32 %v4197_v37, %v4179_v0 }
0x1386   :  { %3864 = vmatpush3.bf16.msra.mxu0 %v2235_v34  ;;  %3865 = vmatprep.mubr.msk.bf16.mxu0 %vm4265_vm0, %v4264_v1 }
0x1387   :  { %3877 = vmatprep.subr.bf16.mxu0 %v4264_v1  ;;  %v2233_v38 = vpack.c.bf16 %v2232_v35, %v2231_v36 }
0x138d   :  { %3866 = vmatmul.mubr.msk.bf16.vlgmr.msra.gmra.mxu0 %vm210_vm11, %v2233_v38  ;;  %v4077_v38 = vld [vmem:[%s5088_s4 + $0xb0] sm:$0xff]  }
0x138e   :  { %3881 = vmatprep.mubr.msk.bf16.mxu0 %vm4265_vm0, %v4264_v1 }
0x1430   :  { %v1911_v40 = vpop.f32.mrf.mxu0 }
0x1432   :  { %v3831_v41 = vpop.f32.mrf.mxu0 }
0x1433   :  { %v4079_v41 = vld [vmem:[%s5088_s4 + $0xa0] sm:$0xff]  }
0x1434   :  { %v1914_v42 = vpop.f32.mrf.mxu0 }
0x1436   :  { %v3832_v43 = vpop.f32.mrf.mxu0 }
0x143d   :  { %v2032_v44 = vpop.f32.mrf.mxu0 }
0x143f   :  { %v3843_v45 = vpop.f32.mrf.mxu0 }
0x1441   :  { %v2035_v46 = vpop.f32.mrf.mxu0 }
0x1442   :  { %v4026_v48 = vpack.i.bf16 %v2035_v46, %v2032_v44 }
0x1443   :  { %v3844_v49 = vpop.f32.mrf.mxu0 }
0x1444   :  { %4027 = vrot.lane.b32.xlu0 %v4026_v48, %s4278_s20  ;;  %v3505_v49 = vld [vmem:[%s5089_s5 + $0xf] ss:$0 sm:$0xff] }
0x1445   :  { %v2153_v52 = vpop.f32.mrf.mxu0 }
0x1447   :  { %v3855_v60 = vpop.f32.mrf.mxu0 }
0x1449   :  { %v2156_v54 = vpop.f32.mrf.mxu0 }
0x144a   :  { %v4031_v55 = vpack.i.bf16 %v2156_v54, %v2153_v52  ;;  %v3506_v54 = vld [vmem:[%s5089_s5 + $0x10] ss:$0 sm:$0xff] }
0x144b   :  { %v3856_v56 = vpop.f32.mrf.mxu0 }
0x144c   :  { %4032 = vrot.lane.b32.xlu1 %v4031_v55, %s4279_s23 }
0x144d   :  { %v2274_v57 = vpop.f32.mrf.mxu0 }
0x144f   :  { %v3867_v58 = vpop.f32.mrf.mxu0 }
0x1451   :  { %v2277_v59 = vpop.f32.mrf.mxu0 }
0x1452   :  { %v4036_v61 = vpack.i.bf16 %v2277_v59, %v2274_v57  ;;  %v3511_v59 = vld [vmem:[%s5089_s5 + $0x12] ss:$0 sm:$0xff] }
0x1453   :  { %v3868_v62 = vpop.f32.mrf.mxu0 }
0x1454   :  { %4037 = vrot.lane.b32.xlu0 %v4036_v61, %s4280_s24 }
0x14b6   :  { %v4028_v13 = vpop.permute.xlu0 %4027 }
0x14b7   :  { %v4030_v0 = vunpack.i.h.bf16 %v4028_v13  ;;  %v4029_v2 = vunpack.i.l.bf16 %v4028_v13 }
0x14b9   :  { %v2306_v8 = vsel %vm162_vm2, %v1914_v42, %v4030_v0  ;;  %v2305_v9 = vsel %vm162_vm2, %v1911_v40, %v4029_v2  ;;  %v4078_v40 = vld [vmem:[%s5088_s4 + $0xa8] sm:$0xff]  }
0x14ba   :  { %3878 = vmatpush3.bf16.msra.mxu0 %v4078_v40 }
0x14bb   :  { %3879 = vmatprep.subr.bf16.mxu0 %v4264_v1 }
0x14be   :  { %v4033_v63 = vpop.permute.xlu1 %4032  ;;  %3880 = vmatpush3.bf16.msra.mxu0 %v4079_v41 }
0x14bf   :  { %v4035_v5 = vunpack.i.h.bf16 %v4033_v63  ;;  %v4034_v6 = vunpack.i.l.bf16 %v4033_v63  ;;  %3893 = vmatprep.subr.bf16.mxu0 %v4264_v1 }
0x14c1   :  { %v2308_v50 = vsel %vm210_vm11, %v2306_v8, %v4035_v5  ;;  %v2307_v12 = vsel %vm210_vm11, %v2305_v9, %v4034_v6  ;;  %v3507_v8 = vld [vmem:[%s5089_s5 + $0x11] ss:$0 sm:$0xff] }
0x14c6   :  { %v4038_v7 = vpop.permute.xlu0 %4037 }
0x14c7   :  { %v4040_v10 = vunpack.i.h.bf16 %v4038_v7  ;;  %v4039_v11 = vunpack.i.l.bf16 %v4038_v7 }
0x14c9   :  { %v2310_v14 = vsel %vm672_vm12, %v2308_v50, %v4040_v10  ;;  %v2309_v51 = vsel %vm672_vm12, %v2307_v12, %v4039_v11 }
0x14ca   :  { %v2311_v15 = vpack.c.bf16 %v2310_v14, %v2309_v51 }
0x14cc   :  { %3874 = vmatmul.mubr.msk.bf16.vlgmr.msra.gmra.mxu1 %vm108_vm1, %v2311_v15 }
0x14cd   :  { %3889 = vmatprep.mubr.msk.bf16.mxu1 %vm4265_vm0, %v4264_v1 }
0x158c   :  { %v2365_v39 = vpop.f32.mrf.mxu1 }
0x158d   :  { %v2366_v17 = vadd.f32 %v3501_v16, %v2365_v39 }
0x158e   :  { %v3875_v18 = vpop.f32.mrf.mxu1 }
0x158f   :  { %v2374_v19 = vadd.f32 %v2366_v17, %v4731_v25 }
0x1590   :  { %v2368_v21 = vpop.f32.mrf.mxu1 }
0x1591   :  { %v2369_v22 = vadd.f32 %v3501_v16, %v2368_v21  ;;  %v2376_v3 = vsel %vm108_vm1, %v2374_v19, 0.0 }
0x1592   :  { %2377 = vadd.xlane.f32.xlu1 %v2376_v3  ;;  %v3876_v24 = vpop.f32.mrf.mxu1 }
0x1593   :  { %v2375_v4 = vadd.f32 %v2369_v22, %v4733_v26  ;;  %v4076_v26 = vld [vmem:[%s5088_s4 + $0xb8] sm:$0xff]  }
0x1594   :  { %3886 = vmatpush3.bf16.msra.mxu1 %v4076_v26 }
0x1595   :  { %v2379_v27 = vsel %vm108_vm1, %v2375_v4, 0.0  ;;  %3887 = vmatprep.subr.bf16.mxu1 %v4264_v1 }
0x1596   :  { %2380 = vadd.xlane.f32.xlu0 %v2379_v27 }
0x1598   :  { %3888 = vmatpush3.bf16.msra.mxu1 %v4077_v38 }
0x1599   :  { %3899 = vmatprep.subr.bf16.mxu1 %v4264_v1 }
0x159b   :  { %3890 = vmatmul.mubr.msk.bf16.vlgmr.msra.gmra.mxu1 %vm108_vm1, %v4509_v31 }
0x159c   :  { %3901 = vmatprep.mubr.msk.bf16.mxu1 %vm4265_vm0, %v4264_v1 }
0x161b   :  { %v2378_v33 = vpop.xlane.xlu1 %2377 }
0x161c   :  { %v2382_v28 = vmul.f32 0.03125, %v2378_v33 }
0x161e   :  { %v2384_v32 = vsub.f32 %v2374_v19, %v2382_v28 }
0x161f   :  { %v2381_v29 = vpop.xlane.xlu0 %2380 }
0x1620   :  { %v2383_v30 = vmul.f32 0.03125, %v2381_v29  ;;  %v2386_v34 = vmul.f32 %v2384_v32, %v2384_v32 }
0x1622   :  { %v2385_v37 = vsub.f32 %v2375_v4, %v2383_v30  ;;  %v2388_v25 = vsel %vm108_vm1, %v2386_v34, 0.0 }
0x1623   :  { %2389 = vadd.xlane.f32.xlu0 %v2388_v25 }
0x1624   :  { %v2387_v35 = vmul.f32 %v2385_v37, %v2385_v37 }
0x1626   :  { %v2391_v36 = vsel %vm108_vm1, %v2387_v35, 0.0 }
0x1627   :  { %2392 = vadd.xlane.f32.xlu1 %v2391_v36 }
0x165b   :  { %v2535_v61 = vpop.f32.mrf.mxu1 }
0x165c   :  { %v2536_v13 = vadd.f32 %v3511_v59, %v2535_v61 }
0x165d   :  { %v3891_v62 = vpop.f32.mrf.mxu1 }
0x165f   :  { %v2538_v63 = vpop.f32.mrf.mxu1 }
0x1660   :  { %v2539_v0 = vadd.f32 %v3511_v59, %v2538_v63 }
0x1661   :  { %v3892_v2 = vpop.f32.mrf.mxu1 }
0x1662   :  { %v4895_v5 = vpack.c.bf16 %v2539_v0, %v2536_v13 }
0x1664   :  { %2670 = vrot.lane.b32.xlu0 %v4895_v5, %s4266_s30  ;;  %v2553_v6 = vsel %vm162_vm2, %v4895_v5, 0 }
0x16ac   :  { %v2390_v42 = vpop.xlane.xlu0 %2389 }
0x16ad   :  { %v2394_v43 = vmul.f32 0.03125, %v2390_v42 }
0x16af   :  { %v2396_v31 = vadd.f32 1e-06, %v2394_v43 }
0x16b0   :  { %v2393_v44 = vpop.xlane.xlu1 %2392 }
0x16b1   :  { %4198 = vrsqrt.f32 %v2396_v31  ;;  %v2395_v45 = vmul.f32 0.03125, %v2393_v44 }
0x16b3   :  { %v2397_v46 = vadd.f32 1e-06, %v2395_v45 }
0x16b5   :  { %4200 = vrsqrt.f32 %v2397_v46 }
0x16be   :  { %v4199_v47 = vpop.eup %4198 }
0x16bf   :  { %v2400_v48 = vmul.f32 %v4199_v47, %v2384_v32 }
0x16c1   :  { %v2406_v53 = vmul.f32 %v3505_v49, %v2400_v48 }
0x16c2   :  { %v4201_v52 = vpop.eup %4200 }
0x16c3   :  { %v2401_v60 = vmul.f32 %v4201_v52, %v2385_v37  ;;  %v4883_v56 = vadd.f32 %v3506_v54, %v2406_v53 }
0x16c5   :  { %v2407_v55 = vmul.f32 %v3505_v49, %v2401_v60 }
0x16c7   :  { %v4885_v57 = vadd.f32 %v3506_v54, %v2407_v55 }
0x16c9   :  { %v2414_v58 = vpack.c.bf16 %v4885_v57, %v4883_v56 }
0x16cb   :  { %3882 = vmatmul.mubr.msk.bf16.vlgmr.msra.gmra.mxu0 %vm108_vm1, %v2414_v58 }
0x16cc   :  { %3895 = vmatprep.mubr.msk.bf16.mxu0 %vm4265_vm0, %v4264_v1  ;;  %3894 = vmatpush3.bf16.xpose.msra.mxu0 %v2553_v6 }
0x16cd   :  { %3905 = vmatprep.subr.bf16.mxu0 %v4264_v1 }
0x16d6   :  { %v2671_v12 = vpop.permute.xlu0 %2670 }
0x16d7   :  { %v2676_v15 = vsel %vm162_vm2, %v2671_v12, 0 }
0x178b   :  { %v2473_v7 = vpop.f32.mrf.mxu0 }
0x178c   :  { %v2474_v11 = vadd.f32 %v3507_v8, %v2473_v7 }
0x178d   :  { %v3883_v9 = vpop.f32.mrf.mxu0 }
0x178f   :  { %v2476_v10 = vpop.f32.mrf.mxu0 }
0x1790   :  { %v2477_v50 = vadd.f32 %v3507_v8, %v2476_v10 }
0x1791   :  { %v3884_v14 = vpop.f32.mrf.mxu0 }
0x1792   :  { %v2547_v51 = vpack.c.bf16 %v2477_v50, %v2474_v11 }
0x1794   :  { %2789 = vrot.lane.b32.xlu0 %v2547_v51, %s4271_s11  ;;  %2668 = vrot.lane.b32.xlu1 %v2547_v51, %s4266_s30 }
0x1795   :  { %3896 = vmatmul.mubr.msk.bf16.vlgmr.msra.gmra.mxu0 %vm162_vm2, %v2547_v51 }
0x1796   :  { %3906 = vmatpush3.bf16.xpose.msra.mxu0 %v2676_v15  ;;  %3907 = vmatprep.mubr.msk.bf16.mxu0 %vm4265_vm0, %v4264_v1 }
0x1797   :  { %3917 = vmatprep.subr.bf16.mxu0 %v4264_v1 }
0x1798   :  { %2910 = vrot.lane.b32.xlu0 %v2547_v51, %s4272_s12  ;;  %2791 = vrot.lane.b32.xlu1 %v4895_v5, %s4271_s11 }
0x179c   :  { %2912 = vrot.lane.b32.xlu1 %v4895_v5, %s4272_s12  ;;  %s4281_s12 = smov [#allocation2]  }
0x1806   :  { %v2669_v16 = vpop.permute.xlu1 %2668  ;;  %v2790_v19 = vpop.permute.xlu0 %2789 }
0x1807   :  { %3908 = vmatmul.mubr.msk.bf16.vlgmr.msra.gmra.mxu0 %vm162_vm2, %v2669_v16 }
0x1808   :  { %3919 = vmatprep.mubr.msk.bf16.mxu0 %vm4265_vm0, %v4264_v1 }
0x180a   :  { %v2792_v39 = vpop.permute.xlu1 %2791  ;;  %v2911_v22 = vpop.permute.xlu0 %2910 }
0x180b   :  { %v2797_v17 = vsel %vm162_vm2, %v2792_v39, 0 }
0x180c   :  { %3918 = vmatpush3.bf16.xpose.msra.mxu0 %v2797_v17 }
0x180d   :  { %3929 = vmatprep.subr.bf16.mxu0 %v4264_v1 }
0x180e   :  { %v2913_v18 = vpop.permute.xlu1 %2912 }
0x180f   :  { %v2918_v21 = vsel %vm162_vm2, %v2913_v18, 0 }
0x1813   :  { %3920 = vmatmul.mubr.msk.bf16.vlgmr.msra.gmra.mxu0 %vm162_vm2, %v2790_v19 }
0x1814   :  { %3930 = vmatpush3.bf16.xpose.msra.mxu0 %v2918_v21  ;;  %3931 = vmatprep.mubr.msk.bf16.mxu0 %vm4265_vm0, %v4264_v1 }
0x1815   :  { %3941 = vmatprep.subr.bf16.mxu0 %v4264_v1 }
0x181b   :  { %3932 = vmatmul.mubr.msk.bf16.vlgmr.msra.gmra.mxu0 %vm162_vm2, %v2911_v22 }
0x181c   :  { %3945 = vmatprep.mubr.msk.bf16.mxu0 %vm4265_vm0, %v4264_v1 }
0x1855   :  { %v2589_v3 = vpop.f32.mrf.mxu0 }
0x1856   :  { %v2590_v24 = vadd.f32 %v2589_v3, %v4583_v20 }
0x1857   :  { %v3897_v4 = vpop.f32.mrf.mxu0 }
0x1858   :  { %v2596_v27 = vsel %vm210_vm11, %v2590_v24, -inf }
0x1859   :  { %2597 = vmax.xlane.f32.xlu1 %v2596_v27  ;;  %v2592_v33 = vpop.f32.mrf.mxu0 }
0x185a   :  { %v2593_v28 = vadd.f32 %v2592_v33, %v4589_v23 }
0x185b   :  { %v3898_v32 = vpop.f32.mrf.mxu0 }
0x185c   :  { %v2599_v29 = vsel %vm210_vm11, %v2593_v28, -inf }
0x185d   :  { %2600 = vmax.xlane.f32.xlu0 %v2599_v29 }
0x18c7   :  { %v2712_v30 = vpop.f32.mrf.mxu0 }
0x18c8   :  { %v2713_v34 = vadd.f32 %v2712_v30, %v4583_v20 }
0x18c9   :  { %v3909_v37 = vpop.f32.mrf.mxu0 }
0x18ca   :  { %v2719_v25 = vsel %vm210_vm11, %v2713_v34, -inf }
0x18cb   :  { %2720 = vmax.xlane.f32.xlu0 %v2719_v25  ;;  %v2715_v35 = vpop.f32.mrf.mxu0 }
0x18cc   :  { %v2716_v36 = vadd.f32 %v2715_v35, %v4589_v23 }
0x18cd   :  { %v3910_v26 = vpop.f32.mrf.mxu0 }
0x18ce   :  { %v2722_v38 = vsel %vm210_vm11, %v2716_v36, -inf }
0x18cf   :  { %2723 = vmax.xlane.f32.xlu1 %v2722_v38 }
0x18d3   :  { %v2833_v40 = vpop.f32.mrf.mxu0 }
0x18d4   :  { %v4939_v41 = vadd.f32 %v2833_v40, %v4583_v20 }
0x18d5   :  { %v3921_v42 = vpop.f32.mrf.mxu0 }
0x18d6   :  { %v2840_v43 = vsel %vm210_vm11, %v4939_v41, -inf }
0x18d7   :  { %2841 = vmax.xlane.f32.xlu0 %v2840_v43  ;;  %v2836_v31 = vpop.f32.mrf.mxu0 }
0x18d8   :  { %v2837_v44 = vadd.f32 %v2836_v31, %v4589_v23 }
0x18d9   :  { %v3922_v45 = vpop.f32.mrf.mxu0 }
0x18da   :  { %v2843_v46 = vsel %vm210_vm11, %v2837_v44, -inf }
0x18db   :  { %2844 = vmax.xlane.f32.xlu1 %v2843_v46  ;;  %v2954_v47 = vpop.f32.mrf.mxu0 }
0x18dc   :  { %v2955_v48 = vadd.f32 %v2954_v47, %v4583_v20 }
0x18dd   :  { %v3933_v49 = vpop.f32.mrf.mxu0 }
0x18de   :  { %v2961_v52 = vsel %vm210_vm11, %v2955_v48, -inf }
0x18df   :  { %2962 = vmax.xlane.f32.xlu0 %v2961_v52  ;;  %v2957_v60 = vpop.f32.mrf.mxu0 }
0x18e0   :  { %v2958_v53 = vadd.f32 %v2957_v60, %v4589_v23 }
0x18e1   :  { %v3934_v54 = vpop.f32.mrf.mxu0 }
0x18e2   :  { %v2598_v55 = vpop.xlane.xlu1 %2597  ;;  %v2964_v58 = vsel %vm210_vm11, %v2958_v53, -inf }
0x18e3   :  { %v2602_v59 = vsub.f32 %v2590_v24, %v2598_v55  ;;  %2965 = vmax.xlane.f32.xlu1 %v2964_v58 }
0x18e5   :  { %v2604_v61 = vmul.f32 1.442695, %v2602_v59 }
0x18e6   :  { %v2601_v62 = vpop.xlane.xlu0 %2600 }
0x18e7   :  { %4202 = vpow2.f32 %v2604_v61  ;;  %v2603_v13 = vsub.f32 %v2593_v28, %v2601_v62 }
0x18e9   :  { %v2606_v63 = vmul.f32 1.442695, %v2603_v13 }
0x18eb   :  { %4204 = vpow2.f32 %v2606_v63 }
0x18f4   :  { %v4949_v20 = vpop.eup %4202 }
0x18f5   :  { %v2608_v0 = vsel %vm210_vm11, %v4949_v20, 0.0 }
0x18f6   :  { %2609 = vadd.xlane.f32.xlu0 %v2608_v0 }
0x18f8   :  { %v4205_v2 = vpop.eup %4204 }
0x18f9   :  { %v2611_v23 = vsel %vm210_vm11, %v4205_v2, 0.0 }
0x18fa   :  { %2612 = vadd.xlane.f32.xlu1 %v2611_v23 }
0x190b   :  { %2742 = vrot.lane.b32.xlu1 %v4895_v5, %s4269_s9 }
0x1954   :  { %v2721_v6 = vpop.xlane.xlu0 %2720 }
0x1955   :  { %v2725_v7 = vsub.f32 %v2713_v34, %v2721_v6 }
0x1957   :  { %v2727_v8 = vmul.f32 1.442695, %v2725_v7 }
0x1958   :  { %v2724_v9 = vpop.xlane.xlu1 %2723 }
0x1959   :  { %4206 = vpow2.f32 %v2727_v8  ;;  %v2726_v10 = vsub.f32 %v2716_v36, %v2724_v9 }
0x195b   :  { %v2729_v11 = vmul.f32 1.442695, %v2726_v10 }
0x195d   :  { %4208 = vpow2.f32 %v2729_v11 }
0x1960   :  { %v2842_v4 = vpop.xlane.xlu0 %2841 }
0x1961   :  { %v2846_v27 = vsub.f32 %v4939_v41, %v2842_v4 }
0x1963   :  { %v2848_v28 = vmul.f32 1.442695, %v2846_v27 }
0x1964   :  { %v2845_v50 = vpop.xlane.xlu1 %2844 }
0x1965   :  { %v2847_v12 = vsub.f32 %v2837_v44, %v2845_v50 }
0x1966   :  { %v4207_v14 = vpop.eup %4206 }
0x1967   :  { %v2850_v51 = vmul.f32 1.442695, %v2847_v12  ;;  %v2731_v15 = vsel %vm210_vm11, %v4207_v14, 0.0 }
0x1968   :  { %2732 = vadd.xlane.f32.xlu0 %v2731_v15  ;;  %v2963_v33 = vpop.xlane.xlu0 %2962  ;;  %v4080_v15 = vld [vmem:[%s5088_s4 + $0xc8] sm:$0xff]  }
0x1969   :  { %4210 = vpow2.f32 %v2850_v51  ;;  %v2967_v32 = vsub.f32 %v2955_v48, %v2963_v33  ;;  %3942 = vmatpush3.bf16.msra.mxu0 %v4080_v15 }
0x196a   :  { %v4209_v16 = vpop.eup %4208  ;;  %3943 = vmatprep.subr.bf16.mxu0 %v4264_v1 }
0x196b   :  { %v2734_v39 = vsel %vm210_vm11, %v4209_v16, 0.0  ;;  %v2969_v29 = vmul.f32 1.442695, %v2967_v32 }
0x196c   :  { %2735 = vadd.xlane.f32.xlu1 %v2734_v39  ;;  %v2966_v17 = vpop.xlane.xlu1 %2965 }
0x196d   :  { %v2968_v18 = vsub.f32 %v2958_v53, %v2966_v17  ;;  %v4081_v17 = vld [vmem:[%s5088_s4 + $0xc0] sm:$0xff]  }
0x196e   :  { %3944 = vmatpush3.bf16.msra.mxu0 %v4081_v17 }
0x196f   :  { %v2971_v19 = vmul.f32 1.442695, %v2968_v18  ;;  %3957 = vmatprep.subr.bf16.mxu0 %v4264_v1 }
0x1971   :  { %4212 = vpow2.f32 %v2971_v19 }
0x1972   :  { %4214 = vpow2.f32 %v2848_v28 }
0x1973   :  { %4216 = vpow2.f32 %v2969_v29 }
0x1976   :  { %v4958_v21 = vpop.eup %4210 }
0x1977   :  { %v2855_v22 = vsel %vm210_vm11, %v4958_v21, 0.0 }
0x1978   :  { %2856 = vadd.xlane.f32.xlu1 %v2855_v22 }
0x197e   :  { %v4962_v3 = vpop.eup %4212  ;;  %2620 = vrot.lane.b32.xlu0 %v4895_v5, %s4267_s7 }
0x197f   :  { %v2976_v24 = vsel %vm210_vm11, %v4962_v3, 0.0  ;;  %v4215_v30 = vpop.eup %4214  ;;  %v2610_v36 = vpop.xlane.xlu0 %2609 }
0x1980   :  { %2977 = vadd.xlane.f32.xlu1 %v2976_v24  ;;  %v2852_v34 = vsel %vm210_vm11, %v4215_v30, 0.0  ;;  %v4217_v37 = vpop.eup %4216 }
0x1981   :  { %v2973_v25 = vsel %vm210_vm11, %v4217_v37, 0.0 }
0x1983   :  { %v2613_v35 = vpop.xlane.xlu1 %2612 }
0x1984   :  { %4218 = vrcp.f32 %v2613_v35 }
0x1985   :  { %4220 = vrcp.f32 %v2610_v36 }
0x1987   :  { %v2743_v38 = vpop.permute.xlu1 %2742 }
0x1991   :  { %2863 = vrot.lane.b32.xlu1 %v4895_v5, %s4268_s8  ;;  %v4219_v26 = vpop.eup %4218 }
0x1992   :  { %v4221_v41 = vpop.eup %4220  ;;  %v2617_v42 = vmul.f32 %v4219_v26, %v4205_v2 }
0x1993   :  { %v2616_v44 = vmul.f32 %v4221_v41, %v4949_v20 }
0x1995   :  { %v2618_v45 = vpack.c.bf16 %v2617_v42, %v2616_v44 }
0x199d   :  { %2853 = vadd.xlane.f32.xlu0 %v2852_v34 }
0x19a1   :  { %2974 = vadd.xlane.f32.xlu0 %v2973_v25 }
0x19b7   :  { %2984 = vrot.lane.b32.xlu0 %v4895_v5, %s4270_s10 }
0x19f1   :  { %v2733_v40 = vpop.xlane.xlu0 %2732 }
0x19f2   :  { %4222 = vrcp.f32 %v2733_v40 }
0x19f5   :  { %v2621_v43 = vpop.permute.xlu0 %2620  ;;  %v2736_v31 = vpop.xlane.xlu1 %2735 }
0x19f6   :  { %4224 = vrcp.f32 %v2736_v31  ;;  %3900 = vmatpush3.bf16.msra.mxu1 %v2621_v43  ;;  %v3523_v31 = vld [vmem:[%s5089_s5 + $0x13] ss:$0 sm:$0xff] }
0x19f7   :  { %3911 = vmatprep.subr.bf16.mxu1 %v4264_v1 }
0x19f9   :  { %3902 = vmatmul.mubr.msk.bf16.vlgmr.msra.gmra.mxu1 %vm210_vm11, %v2618_v45 }
0x19fa   :  { %3912 = vmatpush3.bf16.msra.mxu1 %v2743_v38  ;;  %3913 = vmatprep.mubr.msk.bf16.mxu1 %vm4265_vm0, %v4264_v1 }
0x19fb   :  { %3923 = vmatprep.subr.bf16.mxu1 %v4264_v1 }
0x19ff   :  { %v4223_v5 = vpop.eup %4222 }
0x1a00   :  { %v2739_v47 = vmul.f32 %v4223_v5, %v4207_v14 }
0x1a01   :  { %v2857_v49 = vpop.xlane.xlu1 %2856 }
0x1a02   :  { %4226 = vrcp.f32 %v2857_v49 }
0x1a03   :  { %v4225_v46 = vpop.eup %4224 }
0x1a04   :  { %v2740_v48 = vmul.f32 %v4225_v46, %v4209_v16 }
0x1a06   :  { %v2741_v52 = vpack.c.bf16 %v2740_v48, %v2739_v47 }
0x1a08   :  { %3914 = vmatmul.mubr.msk.bf16.vlgmr.msra.gmra.mxu1 %vm210_vm11, %v2741_v52 }
0x1a09   :  { %v2978_v60 = vpop.xlane.xlu1 %2977  ;;  %3925 = vmatprep.mubr.msk.bf16.mxu1 %vm4265_vm0, %v4264_v1 }
0x1a0d   :  { %v2864_v53 = vpop.permute.xlu1 %2863 }
0x1a0e   :  { %3924 = vmatpush3.bf16.msra.mxu1 %v2864_v53 }
0x1a0f   :  { %3935 = vmatprep.subr.bf16.mxu1 %v4264_v1  ;;  %v4227_v58 = vpop.eup %4226 }
0x1a10   :  { %v2861_v62 = vmul.f32 %v4227_v58, %v4958_v21 }
0x1a26   :  { %v2854_v54 = vpop.xlane.xlu0 %2853 }
0x1a27   :  { %4228 = vrcp.f32 %v2854_v54 }
0x1a2a   :  { %v2975_v55 = vpop.xlane.xlu0 %2974 }
0x1a2b   :  { %4230 = vrcp.f32 %v2975_v55 }
0x1a2c   :  { %4232 = vrcp.f32 %v2978_v60 }
0x1a2e   :  { %v2985_v20 = vpop.permute.xlu0 %2984 }
0x1a34   :  { %v4229_v59 = vpop.eup %4228 }
0x1a35   :  { %v2860_v61 = vmul.f32 %v4229_v59, %v4215_v30 }
0x1a37   :  { %v2862_v13 = vpack.c.bf16 %v2861_v62, %v2860_v61 }
0x1a38   :  { %v4231_v63 = vpop.eup %4230 }
0x1a39   :  { %3926 = vmatmul.mubr.msk.bf16.vlgmr.msra.gmra.mxu1 %vm210_vm11, %v2862_v13  ;;  %v4233_v0 = vpop.eup %4232  ;;  %v2981_v2 = vmul.f32 %v4231_v63, %v4217_v37 }
0x1a3a   :  { %3936 = vmatpush3.bf16.msra.mxu1 %v2985_v20  ;;  %3937 = vmatprep.mubr.msk.bf16.mxu1 %vm4265_vm0, %v4264_v1  ;;  %v2982_v23 = vmul.f32 %v4233_v0, %v4962_v3  ;;  %v4083_v0 = vld [vmem:[%s5088_s4 + $0xd0] sm:$0xff]  }
0x1a3b   :  { %3949 = vmatprep.subr.bf16.mxu1 %v4264_v1 }
0x1a3c   :  { %v2983_v6 = vpack.c.bf16 %v2982_v23, %v2981_v2  ;;  %v4084_v2 = vld [vmem:[%s5088_s4 + $0xf8] sm:$0xff]  }
0x1a41   :  { %3938 = vmatmul.mubr.msk.bf16.vlgmr.msra.gmra.mxu1 %vm210_vm11, %v2983_v6 }
0x1a42   :  { %3953 = vmatprep.mubr.msk.bf16.mxu1 %vm4265_vm0, %v4264_v1 }
0x1ab9   :  { %v2660_v7 = vpop.f32.mrf.mxu1 }
0x1abb   :  { %v3903_v8 = vpop.f32.mrf.mxu1 }
0x1abd   :  { %v2663_v9 = vpop.f32.mrf.mxu1 }
0x1abf   :  { %v3904_v10 = vpop.f32.mrf.mxu1 }
0x1ac8   :  { %v2782_v11 = vpop.f32.mrf.mxu1 }
0x1aca   :  { %v3915_v50 = vpop.f32.mrf.mxu1 }
0x1acc   :  { %v2785_v12 = vpop.f32.mrf.mxu1 }
0x1acd   :  { %v4041_v14 = vpack.i.bf16 %v2785_v12, %v2782_v11  ;;  %v3527_v12 = vld [vmem:[%s5089_s5 + $0x14] ss:$0 sm:$0xff] }
0x1ace   :  { %v3916_v51 = vpop.f32.mrf.mxu1 }
0x1acf   :  { %4042 = vrot.lane.b32.xlu1 %v4041_v14, %s4278_s20 }
0x1af9   :  { %v2903_v16 = vpop.f32.mrf.mxu1 }
0x1afb   :  { %v3927_v39 = vpop.f32.mrf.mxu1 }
0x1afd   :  { %v2906_v18 = vpop.f32.mrf.mxu1 }
0x1afe   :  { %v4046_v19 = vpack.i.bf16 %v2906_v18, %v2903_v16  ;;  %v3528_v16 = vld [vmem:[%s5089_s5 + $0x15] ss:$0 sm:$0xff] }
0x1aff   :  { %v3928_v21 = vpop.f32.mrf.mxu1 }
0x1b00   :  { %4047 = vrot.lane.b32.xlu0 %v4046_v19, %s4279_s23  ;;  %v4085_v21 = vld [vmem:[%s5088_s4 + $0xf0] sm:$0xff]   ;;  %s3424_s23 = sshll.u32 %s4281_s12, 4  ;;  %s3425_s23 = int_to_ptr.vmem [resolvable:$true] %s3424_s23 }
0x1b01   :  { %v3024_v22 = vpop.f32.mrf.mxu1  ;;  %p4247_p1 = scmp.lt.s32.totalorder %s3425_s23, %s3425_s23 }
0x1b03   :  { %v3939_v3 = vpop.f32.mrf.mxu1 }
0x1b04   :  { %v4087_v3 = vld [vmem:[%s5088_s4 + $0xe0] sm:$0xff]  }
0x1b05   :  { %v3027_v24 = vpop.f32.mrf.mxu1 }
0x1b06   :  { %v4051_v4 = vpack.i.bf16 %v3027_v24, %v3024_v22  ;;  %v4086_v22 = vld [vmem:[%s5088_s4 + $0xe8] sm:$0xff]   ;;  %v3529_v24 = vld [vmem:[%s5089_s5 + $0x16] ss:$0 sm:$0xff] }
0x1b07   :  { %v3940_v27 = vpop.f32.mrf.mxu1 }
0x1b08   :  { %4052 = vrot.lane.b32.xlu1 %v4051_v4, %s4280_s24  ;;  %s4242_s24 = scalar_lea.vmem %s3425_s23, 256 }
0x1b09   :  { %p4243_p0 = scmp.ne.s32.totalorder %s3425_s23, %s4242_s24  ;;  %p4248_p2 = scmp.lt.s32.totalorder %s4242_s24, %s4242_s24 }
0x1b0b   :  { %p4249_p3 = por %p4248_p2, %p4247_p1 }
0x1b0d   :  { %p4250_p4 = pnand %p4249_p3, %p4243_p0 }
0x1b41   :  { %v4043_v33 = vpop.permute.xlu1 %4042 }
0x1b42   :  { %v4045_v32 = vunpack.i.h.bf16 %v4043_v33  ;;  %v4044_v29 = vunpack.i.l.bf16 %v4043_v33 }
0x1b44   :  { %v3056_v25 = vsel %vm162_vm2, %v2663_v9, %v4045_v32  ;;  %v3055_v35 = vsel %vm162_vm2, %v2660_v7, %v4044_v29 }
0x1b72   :  { %v4048_v28 = vpop.permute.xlu0 %4047 }
0x1b73   :  { %v4050_v30 = vunpack.i.h.bf16 %v4048_v28  ;;  %v4049_v34 = vunpack.i.l.bf16 %v4048_v28 }
0x1b75   :  { %v3057_v38 = vsel %vm210_vm11, %v3055_v35, %v4049_v34  ;;  %v3058_v40 = vsel %vm210_vm11, %v3056_v25, %v4050_v30  ;;  %v3533_v25 = vld [vmem:[%s5089_s5 + $0x17] ss:$0 sm:$0xff] }
0x1b7a   :  { %v4053_v37 = vpop.permute.xlu1 %4052 }
0x1b7b   :  { %v4055_v36 = vunpack.i.h.bf16 %v4053_v37  ;;  %v4054_v26 = vunpack.i.l.bf16 %v4053_v37 }
0x1b7d   :  { %v3059_v41 = vsel %vm672_vm12, %v3057_v38, %v4054_v26  ;;  %v3060_v42 = vsel %vm672_vm12, %v3058_v40, %v4055_v36 }
0x1b7e   :  { %v3061_v43 = vpack.c.bf16 %v3060_v42, %v3059_v41 }
0x1b80   :  { %3946 = vmatmul.mubr.msk.bf16.vlgmr.msra.gmra.mxu0 %vm108_vm1, %v3061_v43 }
0x1b81   :  { %3965 = vmatprep.mubr.msk.bf16.mxu0 %vm4265_vm0, %v4264_v1  ;;  %3958 = vmatpush3.bf16.msra.mxu0 %v4084_v2 }
0x1b82   :  { %3959 = vmatprep.subr.bf16.mxu0 %v4264_v1 }
0x1b85   :  { %3960 = vmatpush3.bf16.msra.mxu0 %v4085_v21 }
0x1b86   :  { %3961 = vmatprep.subr.bf16.mxu0 %v4264_v1 }
0x1b89   :  { %3962 = vmatpush3.bf16.msra.mxu0 %v4086_v22 }
0x1b8a   :  { %3963 = vmatprep.subr.bf16.mxu0 %v4264_v1 }
0x1b8d   :  { %3964 = vmatpush3.bf16.msra.mxu0 %v4087_v3 }
0x1c40   :  { %v3115_v44 = vpop.f32.mrf.mxu0 }
0x1c41   :  { %v3116_v45 = vadd.f32 %v3523_v31, %v3115_v44 }
0x1c42   :  { %v3947_v5 = vpop.f32.mrf.mxu0 }
0x1c43   :  { %v3124_v46 = vadd.f32 %v3116_v45, %v4883_v56 }
0x1c44   :  { %v3118_v47 = vpop.f32.mrf.mxu0 }
0x1c45   :  { %v3119_v48 = vadd.f32 %v3523_v31, %v3118_v47  ;;  %v3126_v49 = vsel %vm108_vm1, %v3124_v46, 0.0 }
0x1c46   :  { %3127 = vadd.xlane.f32.xlu0 %v3126_v49  ;;  %v3948_v52 = vpop.f32.mrf.mxu0 }
0x1c47   :  { %v3125_v60 = vadd.f32 %v3119_v48, %v4885_v57  ;;  %v4082_v57 = vld [vmem:[%s5088_s4 + $0xd8] sm:$0xff]  }
0x1c48   :  { %3950 = vmatpush3.bf16.msra.mxu1 %v4082_v57 }
0x1c49   :  { %v3129_v53 = vsel %vm108_vm1, %v3125_v60, 0.0  ;;  %3951 = vmatprep.subr.bf16.mxu1 %v4264_v1 }
0x1c4a   :  { %3130 = vadd.xlane.f32.xlu1 %v3129_v53 }
0x1c4c   :  { %3952 = vmatpush3.bf16.msra.mxu1 %v4083_v0  ;;  %v3539_v0 = vld [vmem:[%s5089_s5 + $0x18] ss:$0 sm:$0xff] }
0x1c4d   :  { %3969 = vmatprep.subr.bf16.mxu1 %v4264_v1 }
0x1ccf   :  { %v3128_v54 = vpop.xlane.xlu0 %3127 }
0x1cd0   :  { %v3132_v55 = vmul.f32 0.03125, %v3128_v54 }
0x1cd2   :  { %v3134_v58 = vsub.f32 %v3124_v46, %v3132_v55  ;;  %v4088_v55 = vld [vmem:[%s5088_s4 + $0x108] sm:$0xff]  }
0x1cd3   :  { %v3131_v59 = vpop.xlane.xlu1 %3130 }
0x1cd4   :  { %v3133_v61 = vmul.f32 0.03125, %v3131_v59  ;;  %v3136_v62 = vmul.f32 %v3134_v58, %v3134_v58 }
0x1cd6   :  { %v3135_v13 = vsub.f32 %v3125_v60, %v3133_v61  ;;  %v3138_v56 = vsel %vm108_vm1, %v3136_v62, 0.0 }
0x1cd7   :  { %3139 = vadd.xlane.f32.xlu0 %v3138_v56 }
0x1cd8   :  { %v3137_v63 = vmul.f32 %v3135_v13, %v3135_v13 }
0x1cda   :  { %v3141_v20 = vsel %vm108_vm1, %v3137_v63, 0.0 }
0x1cdb   :  { %3142 = vadd.xlane.f32.xlu0 %v3141_v20 }
0x1d60   :  { %v3140_v23 = vpop.xlane.xlu0 %3139 }
0x1d61   :  { %v3144_v6 = vmul.f32 0.03125, %v3140_v23 }
0x1d63   :  { %v3146_v7 = vadd.f32 1e-06, %v3144_v6 }
0x1d64   :  { %v3143_v8 = vpop.xlane.xlu0 %3142 }
0x1d65   :  { %4234 = vrsqrt.f32 %v3146_v7  ;;  %v3145_v9 = vmul.f32 0.03125, %v3143_v8 }
0x1d67   :  { %v3147_v10 = vadd.f32 1e-06, %v3145_v9 }
0x1d69   :  { %4236 = vrsqrt.f32 %v3147_v10 }
0x1d72   :  { %v4235_v11 = vpop.eup %4234 }
0x1d73   :  { %v3150_v50 = vmul.f32 %v4235_v11, %v3134_v58  ;;  %v4089_v58 = vld [vmem:[%s5088_s4 + $0x100] sm:$0xff]  }
0x1d75   :  { %v3156_v15 = vmul.f32 %v3527_v12, %v3150_v50 }
0x1d76   :  { %v4237_v14 = vpop.eup %4236 }
0x1d77   :  { %v3151_v51 = vmul.f32 %v4237_v14, %v3135_v13  ;;  %v3162_v17 = vadd.f32 %v3528_v16, %v3156_v15 }
0x1d79   :  { %v3157_v39 = vmul.f32 %v3527_v12, %v3151_v51 }
0x1d7b   :  { %v3163_v18 = vadd.f32 %v3528_v16, %v3157_v39 }
0x1d7d   :  { %v3178_v19 = vpack.c.bf16 %v3163_v18, %v3162_v17 }
0x1d7f   :  { %3954 = vmatmul.mubr.msk.bf16.vlgmr.msra.gmra.mxu1 %vm108_vm1, %v3178_v19 }
0x1d80   :  { %3973 = vmatprep.mubr.msk.bf16.mxu1 %vm4265_vm0, %v4264_v1  ;;  %3970 = vmatpush3.bf16.msra.mxu1 %v4088_v55 }
0x1d81   :  { %3971 = vmatprep.subr.bf16.mxu1 %v4264_v1  ;;  %v3540_v1 = vld [vmem:[%s5089_s5 + $0x19] ss:$0 sm:$0xff] }
0x1d84   :  { %3972 = vmatpush3.bf16.msra.mxu1 %v4089_v58 }
0x1e3f   :  { %v3232_v4 = vpop.f32.mrf.mxu1 }
0x1e40   :  { %v3233_v33 = vadd.f32 %v3529_v24, %v3232_v4 }
0x1e41   :  { %v3955_v27 = vpop.f32.mrf.mxu1 }
0x1e42   :  { %v3239_v30 = vmax.f32 %v3233_v33, 0.0 }
0x1e43   :  { %v3235_v28 = vpop.f32.mrf.mxu1 }
0x1e44   :  { %v3236_v32 = vadd.f32 %v3529_v24, %v3235_v28 }
0x1e45   :  { %v3956_v29 = vpop.f32.mrf.mxu1 }
0x1e46   :  { %v3240_v34 = vmax.f32 %v3236_v32, 0.0 }
0x1e48   :  { %v3241_v37 = vpack.c.bf16 %v3240_v34, %v3239_v30 }
0x1e4a   :  { %3966 = vmatmul.mubr.msk.bf16.vlgmr.msra.gmra.mxu0 %vm1639_vm13, %v3241_v37 }
0x1f0a   :  { %v3307_v35 = vpop.f32.mrf.mxu0 }
0x1f0b   :  { %v3308_v36 = vadd.f32 %v3533_v25, %v3307_v35 }
0x1f0c   :  { %v3967_v26 = vpop.f32.mrf.mxu0 }
0x1f0d   :  { %v3316_v38 = vadd.f32 %v3308_v36, %v3162_v17 }
0x1f0e   :  { %v3310_v40 = vpop.f32.mrf.mxu0 }
0x1f0f   :  { %v3311_v41 = vadd.f32 %v3533_v25, %v3310_v40  ;;  %v3318_v42 = vsel %vm108_vm1, %v3316_v38, 0.0 }
0x1f10   :  { %3319 = vadd.xlane.f32.xlu1 %v3318_v42  ;;  %v3968_v43 = vpop.f32.mrf.mxu0 }
0x1f11   :  { %v3317_v31 = vadd.f32 %v3311_v41, %v3163_v18 }
0x1f13   :  { %v3321_v44 = vsel %vm108_vm1, %v3317_v31, 0.0 }
0x1f14   :  { %3322 = vadd.xlane.f32.xlu0 %v3321_v44 }
0x1f99   :  { %v3320_v45 = vpop.xlane.xlu1 %3319 }
0x1f9a   :  { %v3324_v5 = vmul.f32 0.03125, %v3320_v45 }
0x1f9c   :  { %v3326_v46 = vsub.f32 %v3316_v38, %v3324_v5 }
0x1f9d   :  { %v3323_v47 = vpop.xlane.xlu0 %3322 }
0x1f9e   :  { %v3325_v48 = vmul.f32 0.03125, %v3323_v47  ;;  %v3328_v49 = vmul.f32 %v3326_v46, %v3326_v46 }
0x1fa0   :  { %v3327_v52 = vsub.f32 %v3317_v31, %v3325_v48  ;;  %v3330_v60 = vsel %vm108_vm1, %v3328_v49, 0.0 }
0x1fa1   :  { %3331 = vadd.xlane.f32.xlu1 %v3330_v60 }
0x1fa2   :  { %v3329_v53 = vmul.f32 %v3327_v52, %v3327_v52 }
0x1fa4   :  { %v3333_v54 = vsel %vm108_vm1, %v3329_v53, 0.0 }
0x1fa5   :  { %3334 = vadd.xlane.f32.xlu0 %v3333_v54 }
0x202a   :  { %v3332_v59 = vpop.xlane.xlu1 %3331 }
0x202b   :  { %v3336_v61 = vmul.f32 0.03125, %v3332_v59 }
0x202d   :  { %v3338_v62 = vadd.f32 1e-06, %v3336_v61 }
0x202e   :  { %v3335_v13 = vpop.xlane.xlu0 %3334 }
0x202f   :  { %4238 = vrsqrt.f32 %v3338_v62  ;;  %v3337_v56 = vmul.f32 0.03125, %v3335_v13 }
0x2031   :  { %v3339_v63 = vadd.f32 1e-06, %v3337_v56 }
0x2033   :  { %4240 = vrsqrt.f32 %v3339_v63 }
0x203c   :  { %v4239_v20 = vpop.eup %4238 }
0x203d   :  { %v3342_v57 = vmul.f32 %v4239_v20, %v3326_v46 }
0x203f   :  { %v3348_v6 = vmul.f32 %v3539_v0, %v3342_v57 }
0x2040   :  { %v4241_v2 = vpop.eup %4240 }
0x2041   :  { %v3343_v23 = vmul.f32 %v4241_v2, %v3327_v52  ;;  %v3354_v8 = vadd.f32 %v3540_v1, %v3348_v6 }
0x2043   :  { %v3349_v7 = vmul.f32 %v3539_v0, %v3343_v23 }
0x2045   :  { %v3355_v9 = vadd.f32 %v3540_v1, %v3349_v7 }
0x2047   :  { %v3356_v10 = vpack.c.bf16 %v3355_v9, %v3354_v8 }
0x2049   :  { %3974 = vmatmul.mubr.msk.bf16.vlgmr.msra.gmra.mxu1 %vm108_vm1, %v3356_v10 }
0x2109   :  { %v3410_v11 = vpop.f32.mrf.mxu1 }
0x210a   :  { %3417 = vst [vmem:[#allocation2] sm:$0xff] %v3410_v11 }
0x210b   :  { %v3975_v50 = vpop.f32.mrf.mxu1 }
0x210d   :  { %v3413_v12 = vpop.f32.mrf.mxu1 }
0x210e   :  { %3418 = vst [vmem:[#allocation2 + $0x8] sm:$0xff] %v3413_v12 }
0x210f   :  { %v3976_v14 = vpop.f32.mrf.mxu1 }
0x2110   :  { %4253 = shalt.err (!%p4250_p4)
}
0x2111   :  { %s4282_s5 = smov 128  }
0x2112   :  { %3430 = dma.vmem_to_hbm [thread:$0]  %s3425_s23, 256, %s5090_s6, [#allocation3], %s4282_s5, %s4282_s5, %s4278_s20  }
0x2113   :  { %4262 = dma.done.wait [#allocation3], 256  }
0x2114   :  { %4263 = vsyncadd [#allocation3], 4294967040 }
0x2115   :  { %3434 = vsyncpa [#allocation3], 1 }

</bundles_post_ra>
